<compile_context>
chip_gen: v6e
topology: v6e:2x2x1
jax: 0.10.0
libtpu: 0.0.40
codegen_flags: <defaults>
</compile_context>

<pallas_src>
import functools

import jax
import jax.numpy as jnp
import numpy as np
from jax.experimental import pallas as pl
from jax.experimental.pallas import tpu as pltpu

LEVELS = 2          # rq.levels
NUM_EMBEDDINGS = 256
EMBED_DIM = 128
BETA = 0.25


def _round_up(x, m):
    return ((x + m - 1) // m) * m


def rvq_kernel(z_ref, cb_ref, e2_ref, qsum_ref, idx_ref, loss_ref, acc_ref,
               *, b_valid):
    """One batch tile of the residual VQ stack.

    z_ref    : (TB, D)   f32 VMEM  batch tile of input embeddings
    cb_ref   : (L, K, D) f32 VMEM  codebooks (resident across grid steps)
    e2_ref   : (L, K)    f32 VMEM  precomputed ||E_l[k]||^2 (resident)
    qsum_ref : (TB, D)   f32 VMEM  quantized-sum output tile
    idx_ref  : (TB, L)   i32 VMEM  per-level nearest-code indices
    loss_ref : (1,)      f32 SMEM  final raw sum of squared (zq - residual)
    acc_ref  : (1,)      f32 SMEM scratch  cross-tile loss accumulator
    """
    TB, D = z_ref.shape
    L, K, _ = cb_ref.shape
    pid = pl.program_id(0)

    residual = z_ref[...].astype(jnp.float32)
    quant_sum = jnp.zeros_like(residual)

    iota_k = jax.lax.broadcasted_iota(jnp.int32, (TB, K), 1)   # hoisted out of loop
    iota_l = jax.lax.broadcasted_iota(jnp.int32, (TB, L), 1)
    idx_all = jnp.zeros((TB, L), jnp.int32)

    # Ragged last tile: mask padded rows out of the loss (only when padding exists).
    needs_mask = (b_valid % TB) != 0
    if needs_mask:
        row_ids = pid * TB + jax.lax.broadcasted_iota(jnp.int32, (TB, 1), 0)
        row_mask = (row_ids < b_valid).astype(jnp.float32)

    dot_dims = (((1,), (1,)), ((), ()))   # contract last (D) dims, no batch dims
    tile_sq_sum = jnp.float32(0.0)

    for l in range(L):                    # static unroll over quantizer levels
        e = cb_ref[l]                     # (K, D) codebook of this level
        e2 = e2_ref[l:l + 1, :]           # (1, K) precomputed squared norms

        # argmin_k ||r - e_k||^2 == argmin_k (||e_k||^2 - 2 r.e_k); the ||r||^2
        # term is constant per row so it is dropped from the argmin path.
        dots = jax.lax.dot_general(residual, e, dot_dims,
                                   preferred_element_type=jnp.float32)   # (TB, K)
        dist = e2 - 2.0 * dots

        # first-occurrence argmin (matches torch.min tie-breaking), kept 2-D
        dmin = jnp.min(dist, axis=1, keepdims=True)                      # (TB, 1)
        cand = jnp.where(dist <= dmin, iota_k, K)
        idx2d = jnp.min(cand, axis=1, keepdims=True)                     # (TB, 1)

        # gather codebook rows with a one-hot matmul (MXU-friendly gather)
        onehot = (iota_k == idx2d).astype(jnp.float32)                   # (TB, K)
        zq = jax.lax.dot_general(onehot, e, (((1,), (0,)), ((), ())),
                                 preferred_element_type=jnp.float32)     # (TB, D)

        # vq loss contribution: raw sum((zq - residual)^2); the (1+beta)/(B*D)
        # normalization is applied once in the wrapper (codebook + beta*commit
        # terms have identical forward values).
        diff = zq - residual
        sq = diff * diff
        if needs_mask:
            sq = sq * row_mask
        tile_sq_sum = tile_sq_sum + jnp.sum(sq)

        quant_sum = quant_sum + zq
        residual = residual - zq
        idx_all = jnp.where(iota_l == l, idx2d, idx_all)   # accumulate in registers

    qsum_ref[...] = quant_sum.astype(qsum_ref.dtype)
    idx_ref[...] = idx_all                                 # single (TB, L) store

    @pl.when(pid == 0)
    def _init_acc():
        acc_ref[0] = jnp.float32(0.0)

    acc_ref[0] = acc_ref[0] + tile_sq_sum

    @pl.when(pid == pl.num_programs(0) - 1)
    def _finalize():
        loss_ref[0] = acc_ref[0]

    # TODO(synk): straight-through gradient (z + (z_q - z).detach()) is a
    # backward-pass construct; forward values are identical so only the forward
    # pass is implemented here.


def residual_vector_quantize(z, codebooks, beta=BETA, batch_tile=128):
    """z: (B, D) float32, codebooks: (L, K, D) float32."""
    B, D = z.shape
    L, K, _ = codebooks.shape

    TB = min(batch_tile, _round_up(B, 8))      # 128 fills MXU rows on all gens
    B_pad = _round_up(B, TB)
    z_p = jnp.pad(z, ((0, B_pad - B), (0, 0))) if B_pad != B else z
    num_tiles = B_pad // TB

    # ||E_l[k]||^2 depends only on the weights: precompute once, (L, K) = 2 KiB.
    e2 = jnp.sum(codebooks.astype(jnp.float32) ** 2, axis=-1)

    kernel = functools.partial(rvq_kernel, b_valid=B)

    qsum, idx, loss_sum = pl.pallas_call(
        kernel,
        grid=(num_tiles,),
        in_specs=[
            pl.BlockSpec((TB, D), lambda i: (i, 0)),        # z batch tile (pipelined)
            pl.BlockSpec((L, K, D), lambda i: (0, 0, 0)),   # codebooks, resident
            pl.BlockSpec((L, K), lambda i: (0, 0)),         # codebook norms, resident
        ],
        out_specs=(
            pl.BlockSpec((TB, D), lambda i: (i, 0)),        # quant_sum tile
            pl.BlockSpec((TB, L), lambda i: (i, 0)),        # per-level indices
            pl.BlockSpec(memory_space=pltpu.MemorySpace.SMEM),  # total loss (raw sum)
        ),
        out_shape=(
            jax.ShapeDtypeStruct((B_pad, D), jnp.float32),
            jax.ShapeDtypeStruct((B_pad, L), jnp.int32),
            jax.ShapeDtypeStruct((1,), jnp.float32),
        ),
        scratch_shapes=[pltpu.SMEM((1,), jnp.float32)],     # cross-tile loss acc
        compiler_params=pltpu.CompilerParams(
            # The loss accumulator is carried across batch tiles, so the batch
            # axis must be sequential.  (Per-tile partial losses reduced outside
            # the kernel would allow "parallel" for v7x 2-TC sharding.)
            dimension_semantics=("arbitrary",)),
    )(z_p, codebooks, e2)

    total_loss = (1.0 + beta) * loss_sum[0] / jnp.float32(B * D)
    quant_sum = qsum[:B]
    all_indices = [idx[:B, l] for l in range(L)]
    return quant_sum, all_indices, total_loss


def rvq_reference(z, codebooks, beta=BETA):
    """Pure-JAX reference mirroring the PyTorch forward (exact distances)."""
    residual = z
    quant_sum = jnp.zeros_like(z)
    total = jnp.float32(0.0)
    idxs = []
    for l in range(codebooks.shape[0]):
        e = codebooks[l]
        d = jnp.sum((residual[:, None, :] - e[None, :, :]) ** 2, axis=2)
        idx = jnp.argmin(d, axis=1)
        zq = e[idx]
        total = total + (1.0 + beta) * jnp.mean((zq - residual) ** 2)
        quant_sum = quant_sum + zq
        residual = residual - zq
        idxs.append(idx)
    return quant_sum, idxs, total


if __name__ == "__main__":
    key = jax.random.PRNGKey(0)
    kz, kc = jax.random.split(key)

    B = 200   # not a multiple of the 128-row tile: exercises padding + loss masking
    z = jax.random.normal(kz, (B, EMBED_DIM), dtype=jnp.float32)
    # nn.init.normal_(embedding.weight, mean=0.0, std=0.02) for each level
    codebooks = 0.02 * jax.random.normal(
        kc, (LEVELS, NUM_EMBEDDINGS, EMBED_DIM), dtype=jnp.float32)

    quant_sum, all_indices, vq_loss = residual_vector_quantize(z, codebooks)
    quant_sum = jax.block_until_ready(quant_sum)

    ref_sum, ref_idx, ref_loss = rvq_reference(z, codebooks)

    assert np.allclose(np.asarray(quant_sum), np.asarray(ref_sum),
                       rtol=1e-4, atol=1e-5)
    for l in range(LEVELS):
        assert np.array_equal(np.asarray(all_indices[l]), np.asarray(ref_idx[l]))
    assert np.allclose(float(vq_loss), float(ref_loss), rtol=1e-4, atol=1e-6)

    print("KERNEL_OK")
</pallas_src>

<mosaic_0001>
module attributes {stable_mosaic.version = 11 : i64} {
  func.func @rvq_kernel(%arg0: i32, %arg1: memref<128x128xf32, #tpu.memory_space<vmem>>, %arg2: memref<2x256x128xf32, #tpu.memory_space<vmem>>, %arg3: memref<2x256xf32, #tpu.memory_space<vmem>>, %arg4: memref<128x128xf32, #tpu.memory_space<vmem>>, %arg5: memref<128x2xi32, #tpu.memory_space<vmem>>, %arg6: memref<1xf32, #tpu.memory_space<smem>>, %arg7: memref<1xf32, #tpu.memory_space<smem>>) attributes {dimension_semantics = [#tpu.dimension_semantics<arbitrary>], iteration_bounds = array<i64: 2>, scalar_prefetch = 0 : i64, scratch_operands = 1 : i64, tpu.core_type = #tpu.core_type<tc>, window_params = [{transform_indices = @transform_0, window_bounds = array<i64: 128, 128>}, {pipeline_mode = #tpu.pipeline_mode<synchronous>, transform_indices = @transform_1, window_bounds = array<i64: 2, 256, 128>}, {pipeline_mode = #tpu.pipeline_mode<synchronous>, transform_indices = @transform_2, window_bounds = array<i64: 2, 256>}, {transform_indices = @transform_3, window_bounds = array<i64: 128, 128>}, {transform_indices = @transform_4, window_bounds = array<i64: 128, 2>}, {transform_indices = @transform_5, window_bounds = array<i64: 1>}]} {
    %c0 = arith.constant 0 : index
    %c0_0 = arith.constant 0 : index
    %0 = vector.load %arg1[%c0, %c0_0] : memref<128x128xf32, #tpu.memory_space<vmem>>, vector<128x128xf32>
    %cst = arith.constant 0.000000e+00 : f32
    %1 = vector.broadcast %cst : f32 to vector<128x128xf32>
    %2 = tpu.iota {dimensions = array<i32: 1>} : vector<128x256xi32>
    %3 = tpu.iota {dimensions = array<i32: 1>} : vector<128x2xi32>
    %c0_i32 = arith.constant 0 : i32
    %4 = vector.broadcast %c0_i32 : i32 to vector<128x2xi32>
    %c128_i32 = arith.constant 128 : i32
    %5 = arith.muli %arg0, %c128_i32 : i32
    %6 = tpu.iota {dimensions = array<i32: 0>} : vector<128x1xi32>
    %7 = vector.broadcast %5 : i32 to vector<128x1xi32>
    %8 = arith.addi %7, %6 : vector<128x1xi32>
    %c200_i32 = arith.constant 200 : i32
    %9 = vector.broadcast %c200_i32 : i32 to vector<128x1xi32>
    %10 = arith.cmpi slt, %8, %9 : vector<128x1xi32>
    %11 = arith.extui %10 : vector<128x1xi1> to vector<128x1xi32>
    %12 = arith.sitofp %11 : vector<128x1xi32> to vector<128x1xf32>
    %c0_1 = arith.constant 0 : index
    %c0_2 = arith.constant 0 : index
    %c0_3 = arith.constant 0 : index
    %13 = vector.load %arg2[%c0_1, %c0_2, %c0_3] : memref<2x256x128xf32, #tpu.memory_space<vmem>>, vector<1x256x128xf32>
    %14 = vector.shape_cast %13 : vector<1x256x128xf32> to vector<256x128xf32>
    %c0_4 = arith.constant 0 : index
    %c0_5 = arith.constant 0 : index
    %15 = vector.load %arg3[%c0_4, %c0_5] : memref<2x256xf32, #tpu.memory_space<vmem>>, vector<1x256xf32>
    %cst_6 = arith.constant dense<0.000000e+00> : vector<128x256xf32>
    %16 = tpu.matmul %0, %14, %cst_6 {dimension_numbers = #tpu.dot_dimension_numbers<[1], [1], [0], [0], [0, 0, 1, 0], [], []>} : vector<128x128xf32>, vector<256x128xf32>, vector<128x256xf32> -> vector<128x256xf32>
    %cst_7 = arith.constant 2.000000e+00 : f32
    %17 = vector.broadcast %cst_7 : f32 to vector<128x256xf32>
    %18 = arith.mulf %17, %16 : vector<128x256xf32>
    %19 = vector.broadcast %15 : vector<1x256xf32> to vector<128x256xf32>
    %20 = arith.subf %19, %18 : vector<128x256xf32>
    %cst_8 = arith.constant dense<0x7F800000> : vector<128xf32>
    %21 = vector.multi_reduction <minimumf>, %20, %cst_8 [1] : vector<128x256xf32> to vector<128xf32>
    %22 = vector.shape_cast %21 : vector<128xf32> to vector<128x1xf32>
    %23 = vector.broadcast %22 : vector<128x1xf32> to vector<128x256xf32>
    %24 = arith.cmpf ole, %20, %23 : vector<128x256xf32>
    %c256_i32 = arith.constant 256 : i32
    %25 = vector.broadcast %c256_i32 : i32 to vector<128x256xi32>
    %26 = arith.select %24, %2, %25 : vector<128x256xi1>, vector<128x256xi32>
    %cst_9 = arith.constant dense<2147483647> : vector<128xi32>
    %27 = vector.multi_reduction <minsi>, %26, %cst_9 [1] : vector<128x256xi32> to vector<128xi32>
    %28 = vector.shape_cast %27 : vector<128xi32> to vector<128x1xi32>
    %29 = vector.broadcast %28 : vector<128x1xi32> to vector<128x256xi32>
    %30 = arith.cmpi eq, %2, %29 : vector<128x256xi32>
    %31 = arith.extui %30 : vector<128x256xi1> to vector<128x256xi32>
    %32 = arith.sitofp %31 : vector<128x256xi32> to vector<128x256xf32>
    %cst_10 = arith.constant dense<0.000000e+00> : vector<128x128xf32>
    %33 = tpu.matmul %32, %14, %cst_10 {dimension_numbers = #tpu.dot_dimension_numbers<[1], [0], [0], [1], [0, 0, 1, 1], [], []>} : vector<128x256xf32>, vector<256x128xf32>, vector<128x128xf32> -> vector<128x128xf32>
    %34 = arith.subf %33, %0 : vector<128x128xf32>
    %35 = arith.mulf %34, %34 : vector<128x128xf32>
    %36 = vector.broadcast %12 : vector<128x1xf32> to vector<128x128xf32>
    %37 = arith.mulf %35, %36 : vector<128x128xf32>
    %38 = vector.shape_cast %37 : vector<128x128xf32> to vector<1x128x128xf32>
    %cst_11 = arith.constant dense<0.000000e+00> : vector<1xf32>
    %39 = vector.multi_reduction <add>, %38, %cst_11 [1, 2] : vector<1x128x128xf32> to vector<1xf32>
    %40 = vector.shape_cast %39 : vector<1xf32> to vector<1x1x1xf32>
    %41 = vector.extract %40[0, 0, 0] : f32 from vector<1x1x1xf32>
    %cst_12 = arith.constant 0.000000e+00 : f32
    %42 = arith.addf %cst_12, %41 : f32
    %43 = arith.addf %1, %33 : vector<128x128xf32>
    %44 = arith.subf %0, %33 : vector<128x128xf32>
    %c0_i32_13 = arith.constant 0 : i32
    %45 = vector.broadcast %c0_i32_13 : i32 to vector<128x2xi32>
    %46 = arith.cmpi eq, %3, %45 : vector<128x2xi32>
    %47 = vector.shape_cast %28 : vector<128x1xi32> to vector<128x1xi32>
    %48 = vector.broadcast %47 : vector<128x1xi32> to vector<128x2xi32>
    %49 = arith.select %46, %48, %4 : vector<128x2xi1>, vector<128x2xi32>
    %c1 = arith.constant 1 : index
    %c0_14 = arith.constant 0 : index
    %c0_15 = arith.constant 0 : index
    %50 = vector.load %arg2[%c1, %c0_14, %c0_15] : memref<2x256x128xf32, #tpu.memory_space<vmem>>, vector<1x256x128xf32>
    %51 = vector.shape_cast %50 : vector<1x256x128xf32> to vector<256x128xf32>
    %c1_16 = arith.constant 1 : index
    %c0_17 = arith.constant 0 : index
    %52 = vector.load %arg3[%c1_16, %c0_17] : memref<2x256xf32, #tpu.memory_space<vmem>>, vector<1x256xf32>
    %cst_18 = arith.constant dense<0.000000e+00> : vector<128x256xf32>
    %53 = tpu.matmul %44, %51, %cst_18 {dimension_numbers = #tpu.dot_dimension_numbers<[1], [1], [0], [0], [0, 0, 1, 0], [], []>} : vector<128x128xf32>, vector<256x128xf32>, vector<128x256xf32> -> vector<128x256xf32>
    %cst_19 = arith.constant 2.000000e+00 : f32
    %54 = vector.broadcast %cst_19 : f32 to vector<128x256xf32>
    %55 = arith.mulf %54, %53 : vector<128x256xf32>
    %56 = vector.broadcast %52 : vector<1x256xf32> to vector<128x256xf32>
    %57 = arith.subf %56, %55 : vector<128x256xf32>
    %cst_20 = arith.constant dense<0x7F800000> : vector<128xf32>
    %58 = vector.multi_reduction <minimumf>, %57, %cst_20 [1] : vector<128x256xf32> to vector<128xf32>
    %59 = vector.shape_cast %58 : vector<128xf32> to vector<128x1xf32>
    %60 = vector.broadcast %59 : vector<128x1xf32> to vector<128x256xf32>
    %61 = arith.cmpf ole, %57, %60 : vector<128x256xf32>
    %c256_i32_21 = arith.constant 256 : i32
    %62 = vector.broadcast %c256_i32_21 : i32 to vector<128x256xi32>
    %63 = arith.select %61, %2, %62 : vector<128x256xi1>, vector<128x256xi32>
    %cst_22 = arith.constant dense<2147483647> : vector<128xi32>
    %64 = vector.multi_reduction <minsi>, %63, %cst_22 [1] : vector<128x256xi32> to vector<128xi32>
    %65 = vector.shape_cast %64 : vector<128xi32> to vector<128x1xi32>
    %66 = vector.broadcast %65 : vector<128x1xi32> to vector<128x256xi32>
    %67 = arith.cmpi eq, %2, %66 : vector<128x256xi32>
    %68 = arith.extui %67 : vector<128x256xi1> to vector<128x256xi32>
    %69 = arith.sitofp %68 : vector<128x256xi32> to vector<128x256xf32>
    %cst_23 = arith.constant dense<0.000000e+00> : vector<128x128xf32>
    %70 = tpu.matmul %69, %51, %cst_23 {dimension_numbers = #tpu.dot_dimension_numbers<[1], [0], [0], [1], [0, 0, 1, 1], [], []>} : vector<128x256xf32>, vector<256x128xf32>, vector<128x128xf32> -> vector<128x128xf32>
    %71 = arith.subf %70, %44 : vector<128x128xf32>
    %72 = arith.mulf %71, %71 : vector<128x128xf32>
    %73 = vector.broadcast %12 : vector<128x1xf32> to vector<128x128xf32>
    %74 = arith.mulf %72, %73 : vector<128x128xf32>
    %75 = vector.shape_cast %74 : vector<128x128xf32> to vector<1x128x128xf32>
    %cst_24 = arith.constant dense<0.000000e+00> : vector<1xf32>
    %76 = vector.multi_reduction <add>, %75, %cst_24 [1, 2] : vector<1x128x128xf32> to vector<1xf32>
    %77 = vector.shape_cast %76 : vector<1xf32> to vector<1x1x1xf32>
    %78 = vector.extract %77[0, 0, 0] : f32 from vector<1x1x1xf32>
    %79 = arith.addf %42, %78 : f32
    %80 = arith.addf %43, %70 : vector<128x128xf32>
    %c1_i32 = arith.constant 1 : i32
    %81 = vector.broadcast %c1_i32 : i32 to vector<128x2xi32>
    %82 = arith.cmpi eq, %3, %81 : vector<128x2xi32>
    %83 = vector.shape_cast %65 : vector<128x1xi32> to vector<128x1xi32>
    %84 = vector.broadcast %83 : vector<128x1xi32> to vector<128x2xi32>
    %85 = arith.select %82, %84, %49 : vector<128x2xi1>, vector<128x2xi32>
    %c0_25 = arith.constant 0 : index
    %c0_26 = arith.constant 0 : index
    %86 = vector.load %arg4[%c0_25, %c0_26] : memref<128x128xf32, #tpu.memory_space<vmem>>, vector<128x128xf32>
    tpu.vector_store %arg4[%c0_25, %c0_26], %80 {strides = array<i32>} : memref<128x128xf32, #tpu.memory_space<vmem>>, vector<128x128xf32>,
    %c0_27 = arith.constant 0 : index
    %c0_28 = arith.constant 0 : index
    %87 = vector.load %arg5[%c0_27, %c0_28] : memref<128x2xi32, #tpu.memory_space<vmem>>, vector<128x2xi32>
    tpu.vector_store %arg5[%c0_27, %c0_28], %85 {strides = array<i32>} : memref<128x2xi32, #tpu.memory_space<vmem>>, vector<128x2xi32>,
    %c0_i32_29 = arith.constant 0 : i32
    %88 = arith.cmpi eq, %arg0, %c0_i32_29 : i32
    %89 = arith.extui %88 : i1 to i32
    %c0_i32_30 = arith.constant 0 : i32
    %90 = arith.cmpi ne, %89, %c0_i32_30 : i32
    scf.if %90 {
      %cst_35 = arith.constant 0.000000e+00 : f32
      %c0_36 = arith.constant 0 : index
      %97 = memref.load %arg7[%c0_36] : memref<1xf32, #tpu.memory_space<smem>>
      memref.store %cst_35, %arg7[%c0_36] : memref<1xf32, #tpu.memory_space<smem>>
    } else {
    }
    %c0_31 = arith.constant 0 : index
    %91 = memref.load %arg7[%c0_31] : memref<1xf32, #tpu.memory_space<smem>>
    %92 = arith.addf %91, %79 : f32
    %c0_32 = arith.constant 0 : index
    %93 = memref.load %arg7[%c0_32] : memref<1xf32, #tpu.memory_space<smem>>
    memref.store %92, %arg7[%c0_32] : memref<1xf32, #tpu.memory_space<smem>>
    %c1_i32_33 = arith.constant 1 : i32
    %94 = arith.cmpi eq, %arg0, %c1_i32_33 : i32
    %95 = arith.extui %94 : i1 to i32
    %c0_i32_34 = arith.constant 0 : i32
    %96 = arith.cmpi ne, %95, %c0_i32_34 : i32
    scf.if %96 {
      %c0_35 = arith.constant 0 : index
      %97 = memref.load %arg7[%c0_35] : memref<1xf32, #tpu.memory_space<smem>>
      %c0_36 = arith.constant 0 : index
      %98 = memref.load %arg6[%c0_36] : memref<1xf32, #tpu.memory_space<smem>>
      memref.store %97, %arg6[%c0_36] : memref<1xf32, #tpu.memory_space<smem>>
    } else {
    }
    return
  }
  func.func @transform_0(%arg0: i32) -> (i32, i32) {
    %c0_i32 = arith.constant 0 : i32
    %c0_i32_0 = arith.constant 0 : i32
    return %arg0, %c0_i32 : i32, i32
  }
  func.func @transform_1(%arg0: i32) -> (i32, i32, i32) {
    %c0_i32 = arith.constant 0 : i32
    %c0_i32_0 = arith.constant 0 : i32
    %c0_i32_1 = arith.constant 0 : i32
    %c0_i32_2 = arith.constant 0 : i32
    return %c0_i32, %c0_i32_0, %c0_i32_1 : i32, i32, i32
  }
  func.func @transform_2(%arg0: i32) -> (i32, i32) {
    %c0_i32 = arith.constant 0 : i32
    %c0_i32_0 = arith.constant 0 : i32
    %c0_i32_1 = arith.constant 0 : i32
    return %c0_i32, %c0_i32_0 : i32, i32
  }
  func.func @transform_3(%arg0: i32) -> (i32, i32) {
    %c0_i32 = arith.constant 0 : i32
    %c0_i32_0 = arith.constant 0 : i32
    return %arg0, %c0_i32 : i32, i32
  }
  func.func @transform_4(%arg0: i32) -> (i32, i32) {
    %c0_i32 = arith.constant 0 : i32
    %c0_i32_0 = arith.constant 0 : i32
    return %arg0, %c0_i32 : i32, i32
  }
  func.func @transform_5(%arg0: i32) -> i32 {
    %c0_i32 = arith.constant 0 : i32
    %c0_i32_0 = arith.constant 0 : i32
    return %c0_i32 : i32
  }
}

</mosaic_0001>

<bundles_post_ra>
// kernel: tpu_custom_call.1
= control target key start
LH: loop header
LB: loop body
LE: loop exit
PB: predicated region body
PF: predicated region fallthrough
CT: control target
= control target key end

     0   :  { %11 = vsyncpa [#allocation4], 0  ;;  %s5272_s0 = inlined_call_operand.hbm [shape: f32[256,128], index: 0, kind: input, shape index: {}]   ;;  %s5273_s1 = inlined_call_operand.hbm [shape: f32[2,256,128], index: 1, kind: input, shape index: {}]   ;;  %s5274_s2 = inlined_call_operand.hbm [shape: f32[2,256], index: 2, kind: input, shape index: {}]   ;;  %s5275_s3 = inlined_call_operand.hbm [shape: f32[256,128], index: 3, kind: output, shape index: {0}]   ;;  %s5276_s4 = inlined_call_operand.vmem [shape: s32[256,2], index: 4, kind: output, shape index: {1}]   ;;  %s5277_s5 = inlined_call_operand.hbm [shape: f32[1], index: 5, kind: output, shape index: {2}]  }
   0x1   :  { %13 = vsyncpa [#allocation4 + $0x1], 0 }
   0x2   :  { %14 = vsyncpa [#allocation8], 0 }
   0x3   :  { %15 = vsyncpa [#allocation5], 0 }
   0x4   :  { %17 = vsyncpa [#allocation5 + $0x1], 0 }
   0x5   :  { %18 = vsyncpa [#allocation6], 0  ;;  %s3389_s18 = smov 0   ;;  %s3391_s19 = smov 0  }
   0x6   :  { %s3393_s20 = smov 0   ;;  %s3395_s21 = smov 0  }
   0x7 LB: > { %s3410_s22 = sadd.s32 4294967295, %s3345_s21   ;;  %s2585_s23 = sadd.s32 4294967294, %s3345_s21   ;;  %s3345_s21 = sphi %s3395_s21, %s5491_s21   ;;  %s3341_s20 = sphi %s3393_s20, %s5490_s20   ;;  %s3337_s19 = sphi %s3391_s19, %s5489_s19   ;;  %s3333_s18 = sphi %s3389_s18, %s5488_s18  }
   0x8   : > { %p44_p0 = scmp.ne.s32.totalorder %s3337_s19, %s3333_s18  ;;  %p5279_p1 = scmp.eq.s32.totalorder %s3410_s22, 0 }
   0x9   : > { %p5278_p2 = scmp.eq.s32.totalorder %s3410_s22, 1  ;;  %p116_p3 = scmp.eq.s32.totalorder %s2585_s23, 1 }
   0xa   : > { %p3419_p4 = por %p5279_p1, %p44_p0  ;;  %p2586_p5 = scmp.ge.s32.totalorder %s3345_s21, 1 }
   0xb   : > { %p3424_p6 = por %p116_p3, %p44_p0  ;;  %p170_p7 = scmp.lt.s32.totalorder %s3345_s21, 3 }
   0xc   : > { %s5353_s24 = scalar_select %p3419_p4, 1, 0 }
   0xd   : > { %s5354_s25 = scalar_select %p3424_p6, 1, 0 }
   0xe   : > { %p3429_p8 = pnand %p2586_p5, %p170_p7  ;;  %s3347_s27 = smov [#allocation7]  }
   0xf   : > { %s182_s28 = sshll.u32 %s3347_s27, 4  ;;  %s3348_s30 = smov [#allocation9]   ;;  %s183_s28 = int_to_ptr.vmem [resolvable:$true] %s182_s28 }
  0x10   : > { %s5355_s26 = scalar_select %p3429_p8, 1, 0 }
  0x11   : > { %p3100_p9 = pneg %p3429_p8  ;;  %s196_s6 = sshll.u32 %s3348_s30, 4  ;;  %s197_s6 = int_to_ptr.vmem [resolvable:$true] %s196_s6 }
  0x12   : > { %s3194_s7 = scalar_lea.vmem %s183_s28, 8192  ;;  %p3202_p5 = scmp.lt.s32.totalorder %s183_s28, %s183_s28 }
  0x13   : > { %p3438_p11 = pnand %p3100_p9, %p5279_p1  ;;  %p3195_p13 = scmp.ne.s32.totalorder %s183_s28, %s3194_s7 }
  0x14   : > { %p3203_p7 = scmp.lt.s32.totalorder %s3194_s7, %s3194_s7 }
  0x15   : > { %p3185_p12 = pneg %p3438_p11 }
  0x16   : > { %p3204_p10 = por %p3203_p7, %p3202_p5 }
  0x17   : > { %p3197_p0 = pnand %p3195_p13, %p3185_p12 }
  0x19   : > { %p3198_p3 = pneg %p3197_p0 }
  0x1b   : > { %p3205_p9 = pnand %p3204_p10, %p3198_p3 }
  0x1d   : > { %3208 = shalt.err (!%p3205_p9)
}
  0x1e   : > { %s5280_s8 = smov 128   ;;  %s3350_s9 = smov 8  }
  0x1f   : > { %3103 = dma.hbm_to_vmem [thread:$0]  (!%p3438_p11), %s5273_s1, 8192, %s183_s28, [#allocation8], %s5280_s8, %s5280_s8, %s3350_s9  }
  0x20   : > { %s3220_s12 = scalar_lea.vmem %s197_s6, 64  ;;  %p3228_p10 = scmp.lt.s32.totalorder %s197_s6, %s197_s6 }
  0x21   : > { %p3221_p13 = scmp.ne.s32.totalorder %s197_s6, %s3220_s12  ;;  %p3229_p3 = scmp.lt.s32.totalorder %s3220_s12, %s3220_s12 }
  0x23   : > { %p3223_p0 = pnand %p3221_p13, %p3185_p12  ;;  %p3230_p7 = por %p3229_p3, %p3228_p10 }
  0x25   : > { %p3224_p5 = pneg %p3223_p0 }
  0x27   : > { %p3231_p9 = pnand %p3230_p7, %p3224_p5 }
  0x29   : > { %3234 = shalt.err (!%p3231_p9)
}
  0x2a   : > { %3106 = dma.hbm_to_vmem [thread:$0]  (!%p3438_p11), %s5274_s2, 64, %s197_s6, [#allocation8]  }
  0x2b   : > { %s3464_s15 = sadd.s32 1, %s3345_s21   ;;  %s31_s16 = sadd.s32 1, %s3341_s20 }
  0x2c   : > { %s28_s17 = ssub.s32 %s3345_s21, %s3464_s15  ;;  %p38_p12 = scmp.ne.s32.totalorder %s3341_s20, %s3337_s19 }
  0x2d   : > { %p29_p13 = scmp.eq.s32.totalorder %s28_s17, 0  ;;  %p39_p0 = scmp.eq.s32.totalorder %s3345_s21, 0 }
  0x2e   : > { %p3474_p5 = por %p5278_p2, %p38_p12  ;;  %p3117_p10 = scmp.lt.s32.totalorder %s3345_s21, 2 }
  0x2f   : > { %s3480_s27 = scalar_select %p29_p13, %s3341_s20, %s31_s16  }
  0x30   : > { %s5357_s23 = scalar_select %p3474_p5, 1, 0 }
  0x31   : > { %p40_p3 = por %p39_p0, %p38_p12  ;;  %s207_s28 = sand.u32 1, %s3341_s20  }
  0x32   : > { %s2590_s29 = sshll.u32 %s207_s28, 7  ;;  %s2754_s30 = sshll.u32 %s3345_s21, 11 }
  0x33   : > { %s3487_s10 = scalar_lea.hbm %s5272_s0, %s2754_s30  ;;  %s211_s11 = scalar_lea.vmem [#allocation3], %s2590_s29 }
  0x34   : > { %s218_s12 = sshll.u32 %s211_s11, 4  ;;  %p3491_p11 = pnand %p3117_p10, %p40_p3  ;;  %s3489_s12 = int_to_ptr.vmem [resolvable:$true] %s218_s12 }
  0x35   : > { %s3495_s14 = scalar_lea.sflag [#allocation4], %s207_s28  ;;  %s3235_s16 = scalar_lea.hbm %s3487_s10, 2048 }
  0x36   : > { %p3236_p7 = scmp.ne.s32.totalorder %s3487_s10, %s3235_s16  ;;  %p3237_p9 = pneg %p3491_p11 }
  0x37   : > { %s3240_s29 = scalar_lea.hbm %s5272_s0, 4096  ;;  %p3241_p0 = scmp.lt.s32.totalorder %s3487_s10, %s5272_s0 }
  0x38   : > { %p3238_p12 = pnand %p3237_p9, %p3236_p7  ;;  %p3242_p10 = scmp.lt.s32.totalorder %s3240_s29, %s3235_s16 }
  0x3a   : > { %p3239_p13 = pneg %p3238_p12  ;;  %p3243_p3 = por %p3242_p10, %p3241_p0 }
  0x3c   : > { %p3244_p2 = pnand %p3243_p3, %p3239_p13 }
  0x3e   : > { %3247 = shalt.err (!%p3244_p2)
}
  0x3f   : > { %s3248_s28 = scalar_lea.vmem %s3489_s12, 2048  ;;  %s3351_s11 = smov [#allocation3]  }
  0x40   : > { %p3249_p1 = scmp.ne.s32.totalorder %s3489_s12, %s3248_s28  ;;  %s3253_s8 = sshll.u32 %s3351_s11, 4  ;;  %s3254_s8 = int_to_ptr.vmem [resolvable:$false] %s3253_s8 }
  0x41   : > { %s3255_s17 = scalar_lea.vmem %s3254_s8, 4096  ;;  %p3256_p12 = scmp.lt.s32.totalorder %s3489_s12, %s3254_s8 }
  0x42   : > { %p3251_p6 = pnand %p3249_p1, %p3237_p9  ;;  %p3257_p5 = scmp.lt.s32.totalorder %s3255_s17, %s3248_s28 }
  0x44   : > { %p3252_p7 = pneg %p3251_p6  ;;  %p3258_p4 = por %p3257_p5, %p3256_p12 }
  0x46   : > { %p3259_p8 = pnand %p3258_p4, %p3252_p7 }
  0x48   : > { %3262 = shalt.err (!%p3259_p8)
}
  0x49   : > { %s5359_s16 = smov 128   ;;  %p5360_p1 = scmp.ne.s32.totalorder %s5355_s26, 0 }
  0x4a   : > { %3110 = dma.hbm_to_vmem [thread:$0]  (!%p3491_p11), %s3487_s10, 2048, %s3489_s12, %s3495_s14, %s5359_s16, %s5359_s16, %s3350_s9  }
  0x4b   : > { %230 = sbr.rel (%p5360_p1) target bundleno = 2090 (0x82a), region = 32 }
  0x50   : > { %s3522_s30 = sand.u32 1, %s3337_s19   ;;  %p5361_p2 = scmp.ne.s32.totalorder %s5353_s24, 0 }
  0x51   : > { %s2594_s8 = sshll.u32 %s3522_s30, 7  ;;  %s233_s29 = scalar_lea.sflag [#allocation4], %s3522_s30 }
  0x52   : > { %s3528_s13 = scalar_lea.vmem [#allocation3], %s2594_s8 }
  0x53   : > { %3316 = dma.done.wait (%p5361_p2), %s233_s29, 2048  }
  0x54   : > { %3318 = vsyncadd (%p5361_p2), %s233_s29, 4294965248  ;;  %p5362_p4 = scmp.eq.s32.totalorder %s3410_s22, 0 }
  0x56   : > { %3320 = dma.done.wait (%p5362_p4), [#allocation8], 8256   ;;  %p5363_p6 = pmov %p5362_p4 }
  0x57   : > { %v417_v0 = vld [vmem:[#allocation7 + $0xf8] sm:$0xff]  ;;  %v416_v2 = vld [vmem:[#allocation7 + $0xf0] sm:$0xff]  ;;  %v415_v4 = vld [vmem:[#allocation7 + $0xe8] sm:$0xff]  ;;  %v300_v48 = vlaneseq  ;;  %s2600_s24 = sshll.u32 %s3410_s22, 7  ;;  %s2598_s26 = sshll.u32 %s3410_s22, 4 }
  0x58   : > { %3322 = vsyncadd (%p5363_p6), [#allocation8], 4294959040  ;;  %v401_v1 = vld [vmem:[#allocation7 + $0x78] sm:$0xff]  ;;  %2756 = vmatprep.subr.mxu0 %v417_v0  ;;  %2820 = vmatprep.subr.mxu1 %v417_v0  ;;  %v400_v3 = vld [vmem:[#allocation7 + $0x70] sm:$0xff]  ;;  %p279_p8 = scmp.lt.s32.totalorder %s2598_s26, 31  ;;  %s5144_s6 = scalar_lea.vmem [#allocation10], %s2594_s8 }
  0x59   : > { %2757 = vmatpush3.xpose.msra.mxu0 %v401_v1  ;;  %2821 = vmatpush3.msra.mxu1 %v401_v1  ;;  %v399_v5 = vld [vmem:[#allocation7 + $0x68] sm:$0xff]  ;;  %v414_v6 = vld [vmem:[#allocation7 + $0xe0] sm:$0xff]  ;;  %v413_v8 = vld [vmem:[#allocation7 + $0xd8] sm:$0xff]  ;;  %v3559_v49 = vshrl.u32 %v300_v48, 7  ;;  %s3354_s7 = smov 0.0   ;;  %p5480_p5 = pmov %p5362_p4 }
  0x5a   : > { %2758 = vmatprep.subr.mxu0 %v416_v2  ;;  %2822 = vmatprep.subr.mxu1 %v416_v2  ;;  %v398_v7 = vld [vmem:[#allocation7 + $0x60] sm:$0xff]  ;;  %v397_v9 = vld [vmem:[#allocation7 + $0x58] sm:$0xff]  ;;  %v412_v11 = vld [vmem:[#allocation7 + $0xd0] sm:$0xff]  ;;  %s5493_s26 = smov (!%p279_p8, %s2598_s26), 31  ;;  %s2755_s28 = sshll.u32 %s3410_s22, 11 }
  0x5b   : > { %2823 = vmatpush3.msra.mxu1 %v400_v3  ;;  %v3539_v10 = vld [vmem:[%s3528_s13] sm:$0xff]  ;;  %v396_v12 = vld [vmem:[#allocation7 + $0x50] sm:$0xff]  ;;  %v411_v13 = vld [vmem:[#allocation7 + $0xc8] sm:$0xff]  ;;  %v5287_v50 = vsub.s32 0, %v3559_v49  ;;  %v5286_v51 = vsub.s32 1, %v3559_v49  ;;  %s2599_s9 = sshll.u32 %s5493_s26, 3  ;;  %s5215_s16 = scalar_lea.hbm %s5275_s3, %s2755_s28 }
  0x5c   : > { %2824 = vmatprep.subr.mxu1 %v415_v4  ;;  %2788 = vmatprep.mubr.f32.mxu0 %v3539_v10  ;;  %v395_v14 = vld [vmem:[#allocation7 + $0x48] sm:$0xff]  ;;  %v410_v15 = vld [vmem:[#allocation7 + $0xc0] sm:$0xff]  ;;  %v409_v17 = vld [vmem:[#allocation7 + $0xb8] sm:$0xff]  ;;  %s4949_s14 = scalar_lea.vmem %s5276_s4, %s2599_s9  ;;  %3091 = sst [smem:[#allocation2]] (%p5480_p5), %s3354_s7 }
  0x5d   : > { %2759 = vmatpush3.xpose.msra.mxu0 %v400_v3  ;;  %2825 = vmatpush3.msra.mxu1 %v399_v5  ;;  %v394_v16 = vld [vmem:[#allocation7 + $0x40] sm:$0xff]  ;;  %v393_v18 = vld [vmem:[#allocation7 + $0x38] sm:$0xff]  ;;  %v408_v19 = vld [vmem:[#allocation7 + $0xb0] sm:$0xff]  ;;  %s2441_s8 = sshll.u32 %s5144_s6, 4  ;;  %s2423_s29 = scalar_lea.sflag [#allocation5], %s3522_s30  ;;  %s5218_s8 = int_to_ptr.vmem [resolvable:$true] %s2441_s8 }
  0x5e   : > { %2760 = vmatprep.subr.mxu0 %v415_v4  ;;  %2826 = vmatprep.subr.mxu1 %v414_v6  ;;  %v392_v20 = vld [vmem:[#allocation7 + $0x30] sm:$0xff]  ;;  %v407_v21 = vld [vmem:[#allocation7 + $0xa8] sm:$0xff]  ;;  %v406_v23 = vld [vmem:[#allocation7 + $0xa0] sm:$0xff]  ;;  %p5481_p9 = scmp.ne.s32.totalorder %s5357_s23, 0 }
  0x5f   : > { %2827 = vmatpush3.msra.mxu1 %v398_v7  ;;  %v391_v22 = vld [vmem:[#allocation7 + $0x28] sm:$0xff]  ;;  %v390_v24 = vld [vmem:[#allocation7 + $0x20] sm:$0xff]  ;;  %v405_v25 = vld [vmem:[#allocation7 + $0x98] sm:$0xff] }
  0x60   : > { %2828 = vmatprep.subr.mxu1 %v413_v8  ;;  %v389_v26 = vld [vmem:[#allocation7 + $0x18] sm:$0xff]  ;;  %v404_v27 = vld [vmem:[#allocation7 + $0x90] sm:$0xff]  ;;  %v403_v29 = vld [vmem:[#allocation7 + $0x88] sm:$0xff] }
  0x61   : > { %2761 = vmatpush3.xpose.msra.mxu0 %v399_v5  ;;  %2829 = vmatpush3.msra.mxu1 %v397_v9  ;;  %v388_v28 = vld [vmem:[#allocation7 + $0x10] sm:$0xff]  ;;  %v387_v30 = vld [vmem:[#allocation7 + $0x8] sm:$0xff]  ;;  %v402_v31 = vld [vmem:[#allocation7 + $0x80] sm:$0xff] }
  0x62   : > { %2762 = vmatprep.subr.mxu0 %v414_v6  ;;  %2830 = vmatprep.subr.mxu1 %v412_v11  ;;  %v386_v32 = vld [vmem:[#allocation7] sm:$0xff]  ;;  %v285_v33 = vld [vmem:[%s3528_s13 + $0x8] sm:$0xff]  ;;  %v286_v34 = vld [vmem:[%s3528_s13 + $0x10] sm:$0xff] }
  0x63   : > { %2831 = vmatpush3.msra.mxu1 %v396_v12  ;;  %v287_v35 = vld [vmem:[%s3528_s13 + $0x18] sm:$0xff]  ;;  %v288_v36 = vld [vmem:[%s3528_s13 + $0x20] sm:$0xff]  ;;  %v289_v37 = vld [vmem:[%s3528_s13 + $0x28] sm:$0xff] }
  0x64   : > { %2832 = vmatprep.subr.mxu1 %v411_v13  ;;  %v290_v38 = vld [vmem:[%s3528_s13 + $0x30] sm:$0xff]  ;;  %v291_v39 = vld [vmem:[%s3528_s13 + $0x38] sm:$0xff]  ;;  %v292_v40 = vld [vmem:[%s3528_s13 + $0x40] sm:$0xff] }
  0x65   : > { %2763 = vmatpush3.xpose.msra.mxu0 %v398_v7  ;;  %2833 = vmatpush3.msra.mxu1 %v395_v14  ;;  %v293_v41 = vld [vmem:[%s3528_s13 + $0x48] sm:$0xff]  ;;  %v294_v42 = vld [vmem:[%s3528_s13 + $0x50] sm:$0xff]  ;;  %v295_v43 = vld [vmem:[%s3528_s13 + $0x58] sm:$0xff] }
  0x66   : > { %2764 = vmatprep.subr.mxu0 %v413_v8  ;;  %2834 = vmatprep.subr.mxu1 %v410_v15  ;;  %v296_v44 = vld [vmem:[%s3528_s13 + $0x60] sm:$0xff]  ;;  %v297_v45 = vld [vmem:[%s3528_s13 + $0x68] sm:$0xff]  ;;  %v298_v46 = vld [vmem:[%s3528_s13 + $0x70] sm:$0xff] }
  0x67   : > { %2835 = vmatpush3.msra.mxu1 %v394_v16  ;;  %v299_v47 = vld [vmem:[%s3528_s13 + $0x78] sm:$0xff]  ;;  %v418_v52 = vld [vmem:[#allocation9] ss:$2 sm:$0x3] }
  0x68   : > { %2836 = vmatprep.subr.mxu1 %v409_v17  ;;  %v3565_v55 = vrot.slane %v418_v52, %v5287_v50  ;;  %v3569_v56 = vrot.slane %v418_v52, %v5286_v51 }
  0x69   : > { %2765 = vmatpush3.xpose.msra.mxu0 %v397_v9  ;;  %2837 = vmatpush3.msra.mxu1 %v393_v18 }
  0x6a   : > { %2766 = vmatprep.subr.mxu0 %v412_v11  ;;  %2838 = vmatprep.subr.mxu1 %v408_v19 }
  0x6b   : > { %2839 = vmatpush3.msra.mxu1 %v392_v20 }
  0x6c   : > { %2840 = vmatprep.subr.mxu1 %v407_v21 }
  0x6d   : > { %2767 = vmatpush3.xpose.msra.mxu0 %v396_v12  ;;  %2841 = vmatpush3.msra.mxu1 %v391_v22 }
  0x6e   : > { %2768 = vmatprep.subr.mxu0 %v411_v13  ;;  %2842 = vmatprep.subr.mxu1 %v406_v23 }
  0x6f   : > { %2843 = vmatpush3.msra.mxu1 %v390_v24 }
  0x70   : > { %2844 = vmatprep.subr.mxu1 %v405_v25 }
  0x71   : > { %2769 = vmatpush3.xpose.msra.mxu0 %v395_v14  ;;  %2845 = vmatpush3.msra.mxu1 %v389_v26 }
  0x72   : > { %2770 = vmatprep.subr.mxu0 %v410_v15  ;;  %2846 = vmatprep.subr.mxu1 %v404_v27 }
  0x73   : > { %2847 = vmatpush3.msra.mxu1 %v388_v28 }
  0x74   : > { %2848 = vmatprep.subr.mxu1 %v403_v29 }
  0x75   : > { %2771 = vmatpush3.xpose.msra.mxu0 %v394_v16  ;;  %2849 = vmatpush3.msra.mxu1 %v387_v30 }
  0x76   : > { %2772 = vmatprep.subr.mxu0 %v409_v17  ;;  %2850 = vmatprep.subr.mxu1 %v402_v31 }
  0x77   : > { %2851 = vmatpush3.msra.mxu1 %v386_v32 }
  0x79   : > { %2773 = vmatpush3.xpose.msra.mxu0 %v393_v18 }
  0x7a   : > { %2774 = vmatprep.subr.mxu0 %v408_v19 }
  0x7d   : > { %2775 = vmatpush3.xpose.msra.mxu0 %v392_v20 }
  0x7e   : > { %2776 = vmatprep.subr.mxu0 %v407_v21 }
  0x81   : > { %2777 = vmatpush3.xpose.msra.mxu0 %v391_v22 }
  0x82   : > { %2778 = vmatprep.subr.mxu0 %v406_v23 }
  0x85   : > { %2779 = vmatpush3.xpose.msra.mxu0 %v390_v24 }
  0x86   : > { %2780 = vmatprep.subr.mxu0 %v405_v25 }
  0x89   : > { %2781 = vmatpush3.xpose.msra.mxu0 %v389_v26 }
  0x8a   : > { %2782 = vmatprep.subr.mxu0 %v404_v27 }
  0x8d   : > { %2783 = vmatpush3.xpose.msra.mxu0 %v388_v28 }
  0x8e   : > { %2784 = vmatprep.subr.mxu0 %v403_v29 }
  0x91   : > { %2785 = vmatpush3.xpose.msra.mxu0 %v387_v30 }
  0x92   : > { %2786 = vmatprep.subr.mxu0 %v402_v31 }
  0x95   : > { %2787 = vmatpush3.xpose.msra.mxu0 %v386_v32 }
  0x98   : > { %2789 = vmatmul.mubr.f32.vlgmr.msra.gmra.mxu0 %v3539_v10 }
  0x99   : > { %2790 = vmatprep.mubr.f32.mxu0 %v285_v33 }
  0x9c   : > { %2791 = vmatmul.mubr.f32.gmra.mxu0 %v285_v33 }
  0x9d   : > { %2792 = vmatprep.mubr.f32.mxu0 %v286_v34 }
  0xa0   : > { %2793 = vmatmul.mubr.f32.gmra.mxu0 %v286_v34 }
  0xa1   : > { %2794 = vmatprep.mubr.f32.mxu0 %v287_v35 }
  0xa4   : > { %2795 = vmatmul.mubr.f32.gmra.mxu0 %v287_v35 }
  0xa5   : > { %2796 = vmatprep.mubr.f32.mxu0 %v288_v36 }
  0xa8   : > { %2797 = vmatmul.mubr.f32.gmra.mxu0 %v288_v36 }
  0xa9   : > { %2798 = vmatprep.mubr.f32.mxu0 %v289_v37 }
  0xac   : > { %2799 = vmatmul.mubr.f32.gmra.mxu0 %v289_v37 }
  0xad   : > { %2800 = vmatprep.mubr.f32.mxu0 %v290_v38 }
  0xb0   : > { %2801 = vmatmul.mubr.f32.gmra.mxu0 %v290_v38 }
  0xb1   : > { %2802 = vmatprep.mubr.f32.mxu0 %v291_v39 }
  0xb4   : > { %2803 = vmatmul.mubr.f32.gmra.mxu0 %v291_v39 }
  0xb5   : > { %2804 = vmatprep.mubr.f32.mxu0 %v292_v40 }
  0xb8   : > { %2805 = vmatmul.mubr.f32.gmra.mxu0 %v292_v40 }
  0xb9   : > { %2806 = vmatprep.mubr.f32.mxu0 %v293_v41 }
  0xbc   : > { %2807 = vmatmul.mubr.f32.gmra.mxu0 %v293_v41 }
  0xbd   : > { %2808 = vmatprep.mubr.f32.mxu0 %v294_v42 }
  0xc0   : > { %2809 = vmatmul.mubr.f32.gmra.mxu0 %v294_v42 }
  0xc1   : > { %2810 = vmatprep.mubr.f32.mxu0 %v295_v43 }
  0xc4   : > { %2811 = vmatmul.mubr.f32.gmra.mxu0 %v295_v43 }
  0xc5   : > { %2812 = vmatprep.mubr.f32.mxu0 %v296_v44 }
  0xc8   : > { %2813 = vmatmul.mubr.f32.gmra.mxu0 %v296_v44 }
  0xc9   : > { %2814 = vmatprep.mubr.f32.mxu0 %v297_v45 }
  0xcc   : > { %2815 = vmatmul.mubr.f32.gmra.mxu0 %v297_v45 }
  0xcd   : > { %2816 = vmatprep.mubr.f32.mxu0 %v298_v46 }
  0xd0   : > { %2817 = vmatmul.mubr.f32.gmra.mxu0 %v298_v46 }
  0xd1   : > { %2818 = vmatprep.mubr.f32.mxu0 %v299_v47 }
  0xd4   : > { %2819 = vmatmul.mubr.f32.gmra.mxu0 %v299_v47 }
 0x158   : > { %v485_v53 = vpop.f32.mrf.mxu0 }
 0x159   : > { %v580_v54 = vmul.f32 2.0, %v485_v53 }
 0x15a   : > { %v487_v57 = vpop.f32.mrf.mxu0 }
 0x15b   : > { %v581_v58 = vmul.f32 2.0, %v487_v57  ;;  %v3572_v61 = vsub.f32 %v3565_v55, %v580_v54 }
 0x15c   : > { %v491_v59 = vpop.f32.mrf.mxu0 }
 0x15d   : > { %v582_v60 = vmul.f32 2.0, %v491_v59  ;;  %v3575_v62 = vsub.f32 %v3569_v56, %v581_v58 }
 0x15e   : > { %v493_v63 = vpop.f32.mrf.mxu0 }
 0x15f   : > { %v583_v0 = vmul.f32 2.0, %v493_v63  ;;  %v655_v1 = vmin.f32 %v3572_v61, %v3575_v62  ;;  %v3580_v3 = vsub.f32 %v3565_v55, %v582_v60 }
 0x160   : > { %v497_v2 = vpop.f32.mrf.mxu0 }
 0x161   : > { %v3583_v4 = vsub.f32 %v3569_v56, %v583_v0  ;;  %v584_v5 = vmul.f32 2.0, %v497_v2  ;;  %656 = vmin.xlane.f32.xlu0 %v655_v1 }
 0x162   : > { %v499_v6 = vpop.f32.mrf.mxu0 }
 0x163   : > { %v585_v7 = vmul.f32 2.0, %v499_v6  ;;  %v658_v8 = vmin.f32 %v3580_v3, %v3583_v4  ;;  %v3588_v11 = vsub.f32 %v3565_v55, %v584_v5 }
 0x164   : > { %v503_v9 = vpop.f32.mrf.mxu0 }
 0x165   : > { %v586_v10 = vmul.f32 2.0, %v503_v9  ;;  %659 = vmin.xlane.f32.xlu0 %v658_v8  ;;  %v3591_v12 = vsub.f32 %v3569_v56, %v585_v7 }
 0x166   : > { %v505_v13 = vpop.f32.mrf.mxu0 }
 0x167   : > { %v587_v14 = vmul.f32 2.0, %v505_v13  ;;  %v661_v15 = vmin.f32 %v3588_v11, %v3591_v12  ;;  %v3596_v17 = vsub.f32 %v3565_v55, %v586_v10 }
 0x168   : > { %v509_v16 = vpop.f32.mrf.mxu0 }
 0x169   : > { %v3599_v18 = vsub.f32 %v3569_v56, %v587_v14  ;;  %v588_v19 = vmul.f32 2.0, %v509_v16  ;;  %662 = vmin.xlane.f32.xlu1 %v661_v15 }
 0x16a   : > { %v511_v20 = vpop.f32.mrf.mxu0 }
 0x16b   : > { %v589_v21 = vmul.f32 2.0, %v511_v20  ;;  %v664_v22 = vmin.f32 %v3596_v17, %v3599_v18  ;;  %v3604_v24 = vsub.f32 %v3565_v55, %v588_v19 }
 0x16c   : > { %v515_v23 = vpop.f32.mrf.mxu0 }
 0x16d   : > { %v3607_v25 = vsub.f32 %v3569_v56, %v589_v21  ;;  %v590_v26 = vmul.f32 2.0, %v515_v23  ;;  %665 = vmin.xlane.f32.xlu1 %v664_v22 }
 0x16e   : > { %v517_v27 = vpop.f32.mrf.mxu0 }
 0x16f   : > { %v591_v28 = vmul.f32 2.0, %v517_v27  ;;  %v667_v29 = vmin.f32 %v3604_v24, %v3607_v25  ;;  %v3612_v31 = vsub.f32 %v3565_v55, %v590_v26 }
 0x170   : > { %v521_v30 = vpop.f32.mrf.mxu0 }
 0x171   : > { %v3615_v32 = vsub.f32 %v3569_v56, %v591_v28  ;;  %v592_v33 = vmul.f32 2.0, %v521_v30  ;;  %668 = vmin.xlane.f32.xlu0 %v667_v29 }
 0x172   : > { %v523_v34 = vpop.f32.mrf.mxu0 }
 0x173   : > { %v593_v35 = vmul.f32 2.0, %v523_v34  ;;  %v670_v36 = vmin.f32 %v3612_v31, %v3615_v32  ;;  %v3620_v38 = vsub.f32 %v3565_v55, %v592_v33 }
 0x174   : > { %v527_v37 = vpop.f32.mrf.mxu0 }
 0x175   : > { %v3623_v39 = vsub.f32 %v3569_v56, %v593_v35  ;;  %v594_v40 = vmul.f32 2.0, %v527_v37  ;;  %671 = vmin.xlane.f32.xlu1 %v670_v36 }
 0x176   : > { %v529_v41 = vpop.f32.mrf.mxu0 }
 0x177   : > { %v595_v42 = vmul.f32 2.0, %v529_v41  ;;  %v673_v43 = vmin.f32 %v3620_v38, %v3623_v39  ;;  %v3628_v45 = vsub.f32 %v3565_v55, %v594_v40 }
 0x178   : > { %v533_v44 = vpop.f32.mrf.mxu0 }
 0x179   : > { %v3631_v46 = vsub.f32 %v3569_v56, %v595_v42  ;;  %v596_v47 = vmul.f32 2.0, %v533_v44  ;;  %674 = vmin.xlane.f32.xlu0 %v673_v43 }
 0x17a   : > { %v535_v52 = vpop.f32.mrf.mxu0 }
 0x17b   : > { %v597_v53 = vmul.f32 2.0, %v535_v52  ;;  %v676_v54 = vmin.f32 %v3628_v45, %v3631_v46  ;;  %v3636_v58 = vsub.f32 %v3565_v55, %v596_v47 }
 0x17c   : > { %v539_v57 = vpop.f32.mrf.mxu0 }
 0x17d   : > { %v3639_v59 = vsub.f32 %v3569_v56, %v597_v53  ;;  %v598_v60 = vmul.f32 2.0, %v539_v57  ;;  %677 = vmin.xlane.f32.xlu1 %v676_v54 }
 0x17e   : > { %v541_v63 = vpop.f32.mrf.mxu0 }
 0x17f   : > { %v599_v0 = vmul.f32 2.0, %v541_v63  ;;  %v679_v1 = vmin.f32 %v3636_v58, %v3639_v59  ;;  %v3644_v5 = vsub.f32 %v3565_v55, %v598_v60 }
 0x180   : > { %v545_v2 = vpop.f32.mrf.mxu0 }
 0x181   : > { %v3647_v6 = vsub.f32 %v3569_v56, %v599_v0  ;;  %v600_v7 = vmul.f32 2.0, %v545_v2  ;;  %680 = vmin.xlane.f32.xlu0 %v679_v1 }
 0x182   : > { %v547_v8 = vpop.f32.mrf.mxu0 }
 0x183   : > { %v601_v9 = vmul.f32 2.0, %v547_v8  ;;  %v682_v10 = vmin.f32 %v3644_v5, %v3647_v6  ;;  %v3652_v14 = vsub.f32 %v3565_v55, %v600_v7 }
 0x184   : > { %v551_v13 = vpop.f32.mrf.mxu0 }
 0x185   : > { %v3655_v15 = vsub.f32 %v3569_v56, %v601_v9  ;;  %v602_v16 = vmul.f32 2.0, %v551_v13  ;;  %683 = vmin.xlane.f32.xlu1 %v682_v10  ;;  %v3700_v13 = vand.u32 127, %v300_v48 }
 0x186   : > { %v553_v19 = vpop.f32.mrf.mxu0 }
 0x187   : > { %v603_v20 = vmul.f32 2.0, %v553_v19  ;;  %v685_v21 = vmin.f32 %v3652_v14, %v3655_v15  ;;  %v3660_v23 = vsub.f32 %v3565_v55, %v602_v16  ;;  %v3703_v16 = vadd.s32 128, %v3700_v13 }
 0x188   : > { %v557_v22 = vpop.f32.mrf.mxu0 }
 0x189   : > { %v3663_v26 = vsub.f32 %v3569_v56, %v603_v20  ;;  %v604_v27 = vmul.f32 2.0, %v557_v22  ;;  %686 = vmin.xlane.f32.xlu0 %v685_v21  ;;  %5364 = vst [vmem:[#allocation16_spill] sm:$0xff] %v3703_v16 }
 0x18a   : > { %v559_v28 = vpop.f32.mrf.mxu0 }
 0x18b   : > { %v605_v29 = vmul.f32 2.0, %v559_v28  ;;  %v688_v30 = vmin.f32 %v3660_v23, %v3663_v26  ;;  %v3668_v34 = vsub.f32 %v3565_v55, %v604_v27 }
 0x18c   : > { %v563_v33 = vpop.f32.mrf.mxu0 }
 0x18d   : > { %v3671_v35 = vsub.f32 %v3569_v56, %v605_v29  ;;  %v606_v36 = vmul.f32 2.0, %v563_v33  ;;  %689 = vmin.xlane.f32.xlu1 %v688_v30 }
 0x18e   : > { %v565_v37 = vpop.f32.mrf.mxu0 }
 0x18f   : > { %v607_v40 = vmul.f32 2.0, %v565_v37  ;;  %v691_v41 = vmin.f32 %v3668_v34, %v3671_v35  ;;  %v3676_v43 = vsub.f32 %v3565_v55, %v606_v36 }
 0x190   : > { %v569_v42 = vpop.f32.mrf.mxu0 }
 0x191   : > { %v3679_v44 = vsub.f32 %v3569_v56, %v607_v40  ;;  %v608_v47 = vmul.f32 2.0, %v569_v42  ;;  %692 = vmin.xlane.f32.xlu0 %v691_v41 }
 0x192   : > { %v571_v52 = vpop.f32.mrf.mxu0 }
 0x193   : > { %v609_v53 = vmul.f32 2.0, %v571_v52  ;;  %v694_v54 = vmin.f32 %v3676_v43, %v3679_v44  ;;  %v3684_v60 = vsub.f32 %v3565_v55, %v608_v47 }
 0x194   : > { %v575_v57 = vpop.f32.mrf.mxu0 }
 0x195   : > { %v3687_v63 = vsub.f32 %v3569_v56, %v609_v53  ;;  %v610_v0 = vmul.f32 2.0, %v575_v57  ;;  %695 = vmin.xlane.f32.xlu1 %v694_v54 }
 0x196   : > { %v577_v1 = vpop.f32.mrf.mxu0 }
 0x197   : > { %v611_v2 = vmul.f32 2.0, %v577_v1  ;;  %v697_v7 = vmin.f32 %v3684_v60, %v3687_v63  ;;  %v3692_v8 = vsub.f32 %v3565_v55, %v610_v0 }
 0x199   : > { %v3695_v9 = vsub.f32 %v3569_v56, %v611_v2  ;;  %698 = vmin.xlane.f32.xlu0 %v697_v7 }
 0x19b   : > { %v700_v10 = vmin.f32 %v3692_v8, %v3695_v9 }
 0x19d   : > { %701 = vmin.xlane.f32.xlu1 %v700_v10 }
 0x1ea   : > { %v657_v19 = vpop.xlane.xlu0 %656 }
 0x1eb   : > { %vm703_vm0 = vcmp.le.f32.partialorder %v3572_v61, %v657_v19  ;;  %vm704_vm1 = vcmp.le.f32.partialorder %v3575_v62, %v657_v19 }
 0x1ec   : > { %v735_v55 = vsel %vm703_vm0, %v3700_v13, 256  ;;  %v736_v56 = vsel %vm704_vm1, %v3703_v16, 256 }
 0x1ed   : > { %vm767_vm2 = vcmp.lt.s32.totalorder %v735_v55, %v736_v56 }
 0x1ee   : > { %v660_v20 = vpop.xlane.xlu0 %659  ;;  %v3709_v21 = vsel %vm767_vm2, %v735_v55, %v736_v56 }
 0x1ef   : > { %vm705_vm3 = vcmp.le.f32.partialorder %v3580_v3, %v660_v20  ;;  %vm706_vm4 = vcmp.le.f32.partialorder %v3583_v4, %v660_v20  ;;  %v770_v48 = vshra.s32 %v3709_v21, 16 }
 0x1f0   : > { %v737_v22 = vsel %vm705_vm3, %v3700_v13, 256  ;;  %v738_v61 = vsel %vm706_vm4, %v3703_v16, 256 }
 0x1f1   : > { %vm783_vm5 = vcmp.lt.s32.totalorder %v737_v22, %v738_v61  ;;  %v3716_v62 = vcvt.s32.f32 %v770_v48 }
 0x1f2   : > { %v663_v27 = vpop.xlane.xlu1 %662  ;;  %v3718_v28 = vsel %vm783_vm5, %v737_v22, %v738_v61 }
 0x1f3   : > { %vm707_vm6 = vcmp.le.f32.partialorder %v3588_v11, %v663_v27  ;;  %vm708_vm7 = vcmp.le.f32.partialorder %v3591_v12, %v663_v27  ;;  %773 = vmin.xlane.f32.xlu0 %v3716_v62  ;;  %v786_v3 = vshra.s32 %v3718_v28, 16 }
 0x1f4   : > { %v739_v4 = vsel %vm707_vm6, %v3700_v13, 256  ;;  %v740_v29 = vsel %vm708_vm7, %v3703_v16, 256 }
 0x1f5   : > { %vm799_vm8 = vcmp.lt.s32.totalorder %v739_v4, %v740_v29  ;;  %v3726_v30 = vcvt.s32.f32 %v786_v3 }
 0x1f6   : > { %v666_v33 = vpop.xlane.xlu1 %665  ;;  %v3728_v36 = vsel %vm799_vm8, %v739_v4, %v740_v29 }
 0x1f7   : > { %vm709_vm9 = vcmp.le.f32.partialorder %v3596_v17, %v666_v33  ;;  %vm710_vm10 = vcmp.le.f32.partialorder %v3599_v18, %v666_v33  ;;  %789 = vmin.xlane.f32.xlu1 %v3726_v30  ;;  %v802_v11 = vshra.s32 %v3728_v36, 16 }
 0x1f8   : > { %v741_v12 = vsel %vm709_vm9, %v3700_v13, 256  ;;  %v742_v37 = vsel %vm710_vm10, %v3703_v16, 256 }
 0x1f9   : > { %vm815_vm11 = vcmp.lt.s32.totalorder %v741_v12, %v742_v37  ;;  %v3736_v40 = vcvt.s32.f32 %v802_v11 }
 0x1fa   : > { %v669_v41 = vpop.xlane.xlu0 %668  ;;  %v3738_v42 = vsel %vm815_vm11, %v741_v12, %v742_v37 }
 0x1fb   : > { %vm711_vm12 = vcmp.le.f32.partialorder %v3604_v24, %v669_v41  ;;  %vm712_vm13 = vcmp.le.f32.partialorder %v3607_v25, %v669_v41  ;;  %805 = vmin.xlane.f32.xlu0 %v3736_v40  ;;  %v818_v17 = vshra.s32 %v3738_v42, 16 }
 0x1fc   : > { %v743_v18 = vsel %vm711_vm12, %v3700_v13, 256  ;;  %v744_v47 = vsel %vm712_vm13, %v3703_v16, 256 }
 0x1fd   : > { %vm831_vm14 = vcmp.lt.s32.totalorder %v743_v18, %v744_v47  ;;  %v3746_v52 = vcvt.s32.f32 %v818_v17 }
 0x1fe   : > { %v672_v53 = vpop.xlane.xlu1 %671  ;;  %v3748_v54 = vsel %vm831_vm14, %v743_v18, %v744_v47 }
 0x1ff   : > { %vm713_vm15 = vcmp.le.f32.partialorder %v3612_v31, %v672_v53  ;;  %vm714_vm0 = vcmp.le.f32.partialorder %v3615_v32, %v672_v53  ;;  %821 = vmin.xlane.f32.xlu1 %v3746_v52  ;;  %v834_v24 = vshra.s32 %v3748_v54, 16 }
 0x200   : > { %v745_v25 = vsel %vm713_vm15, %v3700_v13, 256  ;;  %v746_v57 = vsel %vm714_vm0, %v3703_v16, 256 }
 0x201   : > { %vm847_vm1 = vcmp.lt.s32.totalorder %v745_v25, %v746_v57  ;;  %v3756_v0 = vcvt.s32.f32 %v834_v24 }
 0x202   : > { %v675_v1 = vpop.xlane.xlu0 %674  ;;  %v3758_v2 = vsel %vm847_vm1, %v745_v25, %v746_v57 }
 0x203   : > { %vm715_vm2 = vcmp.le.f32.partialorder %v3620_v38, %v675_v1  ;;  %vm716_vm3 = vcmp.le.f32.partialorder %v3623_v39, %v675_v1  ;;  %837 = vmin.xlane.f32.xlu0 %v3756_v0  ;;  %v850_v31 = vshra.s32 %v3758_v2, 16 }
 0x204   : > { %v747_v32 = vsel %vm715_vm2, %v3700_v13, 256  ;;  %v748_v7 = vsel %vm716_vm3, %v3703_v16, 256 }
 0x205   : > { %vm863_vm4 = vcmp.lt.s32.totalorder %v747_v32, %v748_v7  ;;  %v3766_v10 = vcvt.s32.f32 %v850_v31 }
 0x206   : > { %v678_v19 = vpop.xlane.xlu1 %677  ;;  %v3768_v55 = vsel %vm863_vm4, %v747_v32, %v748_v7 }
 0x207   : > { %vm717_vm5 = vcmp.le.f32.partialorder %v3628_v45, %v678_v19  ;;  %vm718_vm6 = vcmp.le.f32.partialorder %v3631_v46, %v678_v19  ;;  %853 = vmin.xlane.f32.xlu1 %v3766_v10  ;;  %v866_v38 = vshra.s32 %v3768_v55, 16 }
 0x208   : > { %v749_v39 = vsel %vm717_vm5, %v3700_v13, 256  ;;  %v750_v56 = vsel %vm718_vm6, %v3703_v16, 256 }
 0x209   : > { %vm879_vm7 = vcmp.lt.s32.totalorder %v749_v39, %v750_v56  ;;  %v3776_v20 = vcvt.s32.f32 %v866_v38 }
 0x20a   : > { %v681_v48 = vpop.xlane.xlu0 %680  ;;  %v3778_v22 = vsel %vm879_vm7, %v749_v39, %v750_v56 }
 0x20b   : > { %vm719_vm8 = vcmp.le.f32.partialorder %v3636_v58, %v681_v48  ;;  %vm720_vm9 = vcmp.le.f32.partialorder %v3639_v59, %v681_v48  ;;  %869 = vmin.xlane.f32.xlu0 %v3776_v20  ;;  %v882_v45 = vshra.s32 %v3778_v22, 16 }
 0x20c   : > { %v751_v46 = vsel %vm719_vm8, %v3700_v13, 256  ;;  %v752_v61 = vsel %vm720_vm9, %v3703_v16, 256 }
 0x20d   : > { %vm895_vm10 = vcmp.lt.s32.totalorder %v751_v46, %v752_v61  ;;  %v3786_v27 = vcvt.s32.f32 %v882_v45 }
 0x20e   : > { %v684_v3 = vpop.xlane.xlu1 %683  ;;  %v3788_v4 = vsel %vm895_vm10, %v751_v46, %v752_v61 }
 0x20f   : > { %vm721_vm11 = vcmp.le.f32.partialorder %v3644_v5, %v684_v3  ;;  %vm722_vm12 = vcmp.le.f32.partialorder %v3647_v6, %v684_v3  ;;  %885 = vmin.xlane.f32.xlu1 %v3786_v27  ;;  %v898_v58 = vshra.s32 %v3788_v4, 16 }
 0x210   : > { %v753_v59 = vsel %vm721_vm11, %v3700_v13, 256  ;;  %v754_v29 = vsel %vm722_vm12, %v3703_v16, 256 }
 0x211   : > { %vm911_vm13 = vcmp.lt.s32.totalorder %v753_v59, %v754_v29  ;;  %v3796_v33 = vcvt.s32.f32 %v898_v58 }
 0x212   : > { %v687_v11 = vpop.xlane.xlu0 %686  ;;  %v3798_v12 = vsel %vm911_vm13, %v753_v59, %v754_v29 }
 0x213   : > { %vm723_vm14 = vcmp.le.f32.partialorder %v3652_v14, %v687_v11  ;;  %vm724_vm15 = vcmp.le.f32.partialorder %v3655_v15, %v687_v11  ;;  %901 = vmin.xlane.f32.xlu0 %v3796_v33  ;;  %v914_v5 = vshra.s32 %v3798_v12, 16 }
 0x214   : > { %v755_v6 = vsel %vm723_vm14, %v3700_v13, 256  ;;  %v756_v37 = vsel %vm724_vm15, %v3703_v16, 256 }
 0x215   : > { %vm927_vm0 = vcmp.lt.s32.totalorder %v755_v6, %v756_v37  ;;  %v3806_v41 = vcvt.s32.f32 %v914_v5  ;;  %v785_v5 = vand.u32 65535, %v3718_v28  ;;  %v817_v28 = vand.u32 65535, %v3738_v42 }
 0x216   : > { %v690_v17 = vpop.xlane.xlu1 %689  ;;  %v3808_v18 = vsel %vm927_vm0, %v755_v6, %v756_v37  ;;  %v849_v42 = vand.u32 65535, %v3758_v2  ;;  %v881_v2 = vand.u32 65535, %v3778_v22  ;;  %v913_v22 = vand.u32 65535, %v3798_v12 }
 0x217   : > { %vm725_vm1 = vcmp.le.f32.partialorder %v3660_v23, %v690_v17  ;;  %vm726_vm2 = vcmp.le.f32.partialorder %v3663_v26, %v690_v17  ;;  %917 = vmin.xlane.f32.xlu1 %v3806_v41  ;;  %v930_v14 = vshra.s32 %v3808_v18, 16  ;;  %v787_v17 = vcvt.s32.f32 %v785_v5 }
 0x218   : > { %v757_v15 = vsel %vm725_vm1, %v3700_v13, 256  ;;  %v758_v47 = vsel %vm726_vm2, %v3703_v16, 256 }
 0x219   : > { %vm943_vm3 = vcmp.lt.s32.totalorder %v757_v15, %v758_v47  ;;  %v3816_v53 = vcvt.s32.f32 %v930_v14  ;;  %v801_v14 = vand.u32 65535, %v3728_v36  ;;  %v833_v36 = vand.u32 65535, %v3748_v54 }
 0x21a   : > { %v693_v24 = vpop.xlane.xlu0 %692  ;;  %v3818_v25 = vsel %vm943_vm3, %v757_v15, %v758_v47  ;;  %v865_v54 = vand.u32 65535, %v3768_v55  ;;  %v897_v55 = vand.u32 65535, %v3788_v4  ;;  %v929_v4 = vand.u32 65535, %v3808_v18 }
 0x21b   : > { %vm727_vm4 = vcmp.le.f32.partialorder %v3668_v34, %v693_v24  ;;  %vm728_vm5 = vcmp.le.f32.partialorder %v3671_v35, %v693_v24  ;;  %933 = vmin.xlane.f32.xlu0 %v3816_v53  ;;  %v946_v23 = vshra.s32 %v3818_v25, 16  ;;  %v803_v47 = vcvt.s32.f32 %v801_v14 }
 0x21c   : > { %v759_v26 = vsel %vm727_vm4, %v3700_v13, 256  ;;  %v760_v57 = vsel %vm728_vm5, %v3703_v16, 256  ;;  %v945_v12 = vand.u32 65535, %v3818_v25 }
 0x21d   : > { %vm959_vm6 = vcmp.lt.s32.totalorder %v759_v26, %v760_v57  ;;  %v3826_v1 = vcvt.s32.f32 %v946_v23  ;;  %v819_v23 = vcvt.s32.f32 %v817_v28 }
 0x21e   : > { %v696_v31 = vpop.xlane.xlu1 %695  ;;  %v3828_v32 = vsel %vm959_vm6, %v759_v26, %v760_v57  ;;  %v835_v57 = vcvt.s32.f32 %v833_v36  ;;  %v3963_v36 = vld [vmem:[#allocation7 + $0x1e0] sm:$0xff] }
 0x21f   : > { %vm729_vm7 = vcmp.le.f32.partialorder %v3676_v43, %v696_v31  ;;  %vm730_vm8 = vcmp.le.f32.partialorder %v3679_v44, %v696_v31  ;;  %949 = vmin.xlane.f32.xlu1 %v3826_v1  ;;  %v962_v34 = vshra.s32 %v3828_v32, 16  ;;  %v961_v18 = vand.u32 65535, %v3828_v32 }
 0x220   : > { %v761_v35 = vsel %vm729_vm7, %v3700_v13, 256  ;;  %v762_v7 = vsel %vm730_vm8, %v3703_v16, 256 }
 0x221   : > { %vm975_vm9 = vcmp.lt.s32.totalorder %v761_v35, %v762_v7  ;;  %v3836_v19 = vcvt.s32.f32 %v962_v34  ;;  %v851_v34 = vcvt.s32.f32 %v849_v42  ;;  %v963_v5 = vcvt.s32.f32 %v961_v18  ;;  %v3972_v42 = vld [vmem:[#allocation7 + $0x158] sm:$0xff] }
 0x222   : > { %v699_v38 = vpop.xlane.xlu0 %698  ;;  %v3838_v39 = vsel %vm975_vm9, %v761_v35, %v762_v7  ;;  %v867_v7 = vcvt.s32.f32 %v865_v54  ;;  %v3981_v54 = vld [vmem:[#allocation7 + $0x1c8] sm:$0xff] }
 0x223   : > { %vm731_vm10 = vcmp.le.f32.partialorder %v3684_v60, %v699_v38  ;;  %vm732_vm11 = vcmp.le.f32.partialorder %v3687_v63, %v699_v38  ;;  %965 = vmin.xlane.f32.xlu0 %v3836_v19  ;;  %v978_v43 = vshra.s32 %v3838_v39, 16  ;;  %v977_v25 = vand.u32 65535, %v3838_v39 }
 0x224   : > { %v763_v44 = vsel %vm731_vm10, %v3700_v13, 256  ;;  %v764_v56 = vsel %vm732_vm11, %v3703_v16, 256 }
 0x225   : > { %vm991_vm12 = vcmp.lt.s32.totalorder %v763_v44, %v764_v56  ;;  %v3846_v48 = vcvt.s32.f32 %v978_v43  ;;  %v883_v43 = vcvt.s32.f32 %v881_v2  ;;  %v3990_v2 = vld [vmem:[#allocation7 + $0x140] sm:$0xff] }
 0x226   : > { %v702_v45 = vpop.xlane.xlu1 %701  ;;  %v3848_v46 = vsel %vm991_vm12, %v763_v44, %v764_v56  ;;  %v899_v56 = vcvt.s32.f32 %v897_v55  ;;  %v3999_v55 = vld [vmem:[#allocation7 + $0x1b0] sm:$0xff] }
 0x227   : > { %vm733_vm13 = vcmp.le.f32.partialorder %v3692_v8, %v702_v45  ;;  %vm734_vm14 = vcmp.le.f32.partialorder %v3695_v9, %v702_v45  ;;  %981 = vmin.xlane.f32.xlu1 %v3846_v48  ;;  %v994_v60 = vshra.s32 %v3848_v46, 16  ;;  %v769_v9 = vand.u32 65535, %v3709_v21 }
 0x228   : > { %v765_v63 = vsel %vm733_vm13, %v3700_v13, 256  ;;  %v766_v61 = vsel %vm734_vm14, %v3703_v16, 256  ;;  %v993_v32 = vand.u32 65535, %v3848_v46 }
 0x229   : > { %vm1007_vm15 = vcmp.lt.s32.totalorder %v765_v63, %v766_v61  ;;  %v3856_v3 = vcvt.s32.f32 %v994_v60  ;;  %v771_v11 = vcvt.s32.f32 %v769_v9  ;;  %v915_v60 = vcvt.s32.f32 %v913_v22  ;;  %v4008_v22 = vld [vmem:[#allocation7 + $0x128] sm:$0xff] }
 0x22a   : > { %v3858_v58 = vsel %vm1007_vm15, %v765_v63, %v766_v61  ;;  %v931_v61 = vcvt.s32.f32 %v929_v4  ;;  %v947_v9 = vcvt.s32.f32 %v945_v12  ;;  %v4017_v4 = vld [vmem:[#allocation7 + $0x198] sm:$0xff]  ;;  %v4026_v12 = vld [vmem:[#allocation7 + $0x110] sm:$0xff] }
 0x22b   : > { %997 = vmin.xlane.f32.xlu0 %v3856_v3  ;;  %v1010_v59 = vshra.s32 %v3858_v58, 16  ;;  %v1009_v39 = vand.u32 65535, %v3858_v58  ;;  %v3951_v58 = vld [vmem:[#allocation7 + $0x1f0] sm:$0xff] }
 0x22d   : > { %v3862_v8 = vcvt.s32.f32 %v1010_v59  ;;  %v1011_v28 = vcvt.s32.f32 %v1009_v39  ;;  %v5284_v39 = vmov 1.0  }
 0x22f   : > { %1013 = vmin.xlane.f32.xlu1 %v3862_v8 }
 0x27c   : > { %v3866_v29 = vpop.xlane.xlu0 %773 }
 0x27d   : > { %vm775_vm0 = vcmp.eq.f32.partialorder %v3716_v62, %v3866_v29 }
 0x27e   : > { %v776_v6 = vsel %vm775_vm0, %v771_v11, inf }
 0x27f   : > { %777 = vmin.xlane.f32.xlu0 %v776_v6 }
 0x280   : > { %v3871_v37 = vpop.xlane.xlu1 %789 }
 0x281   : > { %vm791_vm1 = vcmp.eq.f32.partialorder %v3726_v30, %v3871_v37 }
 0x282   : > { %v792_v15 = vsel %vm791_vm1, %v787_v17, inf  ;;  %v979_v17 = vcvt.s32.f32 %v977_v25 }
 0x283   : > { %793 = vmin.xlane.f32.xlu1 %v792_v15  ;;  %v995_v15 = vcvt.s32.f32 %v993_v32 }
 0x284   : > { %v3876_v21 = vpop.xlane.xlu0 %805 }
 0x285   : > { %vm807_vm2 = vcmp.eq.f32.partialorder %v3736_v40, %v3876_v21 }
 0x286   : > { %v808_v62 = vsel %vm807_vm2, %v803_v47, inf }
 0x287   : > { %809 = vmin.xlane.f32.xlu0 %v808_v62  ;;  %v3948_v62 = vld [vmem:[#allocation7 + $0x178] sm:$0xff] }
 0x288   : > { %v3881_v24 = vpop.xlane.xlu1 %821 }
 0x289   : > { %vm823_vm3 = vcmp.eq.f32.partialorder %v3746_v52, %v3881_v24 }
 0x28a   : > { %v824_v30 = vsel %vm823_vm3, %v819_v23, inf  ;;  %v3957_v23 = vld [vmem:[#allocation7 + $0x1e8] sm:$0xff] }
 0x28b   : > { %825 = vmin.xlane.f32.xlu1 %v824_v30  ;;  %v3966_v30 = vld [vmem:[#allocation7 + $0x160] sm:$0xff] }
 0x28c   : > { %v3886_v26 = vpop.xlane.xlu0 %837 }
 0x28d   : > { %vm839_vm4 = vcmp.eq.f32.partialorder %v3756_v0, %v3886_v26 }
 0x28e   : > { %v840_v40 = vsel %vm839_vm4, %v835_v57, inf  ;;  %v3969_v57 = vld [vmem:[#allocation7 + $0x1d8] sm:$0xff] }
 0x28f   : > { %841 = vmin.xlane.f32.xlu0 %v840_v40  ;;  %v3975_v40 = vld [vmem:[#allocation7 + $0x1d0] sm:$0xff] }
 0x290   : > { %v3891_v31 = vpop.xlane.xlu1 %853 }
 0x291   : > { %vm855_vm5 = vcmp.eq.f32.partialorder %v3766_v10, %v3891_v31 }
 0x292   : > { %v856_v52 = vsel %vm855_vm5, %v851_v34, inf  ;;  %v3978_v34 = vld [vmem:[#allocation7 + $0x150] sm:$0xff] }
 0x293   : > { %857 = vmin.xlane.f32.xlu1 %v856_v52  ;;  %v3984_v52 = vld [vmem:[#allocation7 + $0x148] sm:$0xff] }
 0x294   : > { %v3896_v35 = vpop.xlane.xlu0 %869 }
 0x295   : > { %vm871_vm6 = vcmp.eq.f32.partialorder %v3776_v20, %v3896_v35 }
 0x296   : > { %v872_v0 = vsel %vm871_vm6, %v867_v7, inf  ;;  %v3987_v7 = vld [vmem:[#allocation7 + $0x1c0] sm:$0xff] }
 0x297   : > { %873 = vmin.xlane.f32.xlu0 %v872_v0  ;;  %v3993_v0 = vld [vmem:[#allocation7 + $0x1b8] sm:$0xff] }
 0x298   : > { %v3901_v38 = vpop.xlane.xlu1 %885 }
 0x299   : > { %vm887_vm7 = vcmp.eq.f32.partialorder %v3786_v27, %v3901_v38 }
 0x29a   : > { %v888_v10 = vsel %vm887_vm7, %v883_v43, inf  ;;  %v3996_v43 = vld [vmem:[#allocation7 + $0x138] sm:$0xff] }
 0x29b   : > { %889 = vmin.xlane.f32.xlu1 %v888_v10  ;;  %v4002_v10 = vld [vmem:[#allocation7 + $0x130] sm:$0xff] }
 0x29c   : > { %v3906_v44 = vpop.xlane.xlu0 %901 }
 0x29d   : > { %vm903_vm8 = vcmp.eq.f32.partialorder %v3796_v33, %v3906_v44 }
 0x29e   : > { %v904_v20 = vsel %vm903_vm8, %v899_v56, inf  ;;  %v4005_v56 = vld [vmem:[#allocation7 + $0x1a8] sm:$0xff] }
 0x29f   : > { %905 = vmin.xlane.f32.xlu0 %v904_v20  ;;  %v4011_v20 = vld [vmem:[#allocation7 + $0x1a0] sm:$0xff] }
 0x2a0   : > { %v3911_v45 = vpop.xlane.xlu1 %917 }
 0x2a1   : > { %vm919_vm9 = vcmp.eq.f32.partialorder %v3806_v41, %v3911_v45 }
 0x2a2   : > { %v920_v27 = vsel %vm919_vm9, %v915_v60, inf  ;;  %v4014_v60 = vld [vmem:[#allocation7 + $0x120] sm:$0xff] }
 0x2a3   : > { %921 = vmin.xlane.f32.xlu1 %v920_v27  ;;  %v4020_v27 = vld [vmem:[#allocation7 + $0x118] sm:$0xff] }
 0x2a4   : > { %v3916_v63 = vpop.xlane.xlu0 %933 }
 0x2a5   : > { %vm935_vm10 = vcmp.eq.f32.partialorder %v3816_v53, %v3916_v63 }
 0x2a6   : > { %v936_v33 = vsel %vm935_vm10, %v931_v61, inf  ;;  %v4023_v61 = vld [vmem:[#allocation7 + $0x190] sm:$0xff] }
 0x2a7   : > { %937 = vmin.xlane.f32.xlu0 %v936_v33  ;;  %v4029_v33 = vld [vmem:[#allocation7 + $0x188] sm:$0xff] }
 0x2a8   : > { %v3921_v59 = vpop.xlane.xlu1 %949 }
 0x2a9   : > { %vm951_vm11 = vcmp.eq.f32.partialorder %v3826_v1, %v3921_v59 }
 0x2aa   : > { %v952_v41 = vsel %vm951_vm11, %v947_v9, inf  ;;  %v780_v9 = vcvt.f32.s32 %v3866_v29 }
 0x2ab   : > { %953 = vmin.xlane.f32.xlu1 %v952_v41 }
 0x2ac   : > { %v3926_v11 = vpop.xlane.xlu0 %965  ;;  %v781_v41 = vshll.u32 %v780_v9, 16  ;;  %v844_v9 = vcvt.f32.s32 %v3886_v26 }
 0x2ad   : > { %vm967_vm12 = vcmp.eq.f32.partialorder %v3836_v19, %v3926_v11 }
 0x2ae   : > { %v968_v53 = vsel %vm967_vm12, %v963_v5, inf  ;;  %v796_v5 = vcvt.f32.s32 %v3871_v37  ;;  %v845_v26 = vshll.u32 %v844_v9, 16  ;;  %v892_v9 = vcvt.f32.s32 %v3901_v38 }
 0x2af   : > { %969 = vmin.xlane.f32.xlu0 %v968_v53 }
 0x2b0   : > { %v3931_v6 = vpop.xlane.xlu1 %981  ;;  %v893_v38 = vshll.u32 %v892_v9, 16 }
 0x2b1   : > { %vm983_vm13 = vcmp.eq.f32.partialorder %v3846_v48, %v3931_v6  ;;  %v3945_v48 = vld [vmem:[#allocation7 + $0x1f8] sm:$0xff] }
 0x2b2   : > { %v984_v1 = vsel %vm983_vm13, %v979_v17, inf  ;;  %2900 = vmatprep.subr.mxu1 %v3945_v48  ;;  %2964 = vmatprep.subr.mxu0 %v3945_v48  ;;  %v812_v17 = vcvt.f32.s32 %v3876_v21  ;;  %v828_v21 = vcvt.f32.s32 %v3881_v24 }
 0x2b3   : > { %985 = vmin.xlane.f32.xlu1 %v984_v1  ;;  %2965 = vmatpush3.msra.mxu0 %v3948_v62  ;;  %v797_v1 = vshll.u32 %v796_v5, 16 }
 0x2b4   : > { %v3936_v14 = vpop.xlane.xlu0 %997  ;;  %2966 = vmatprep.subr.mxu0 %v3951_v58  ;;  %v813_v37 = vshll.u32 %v812_v17, 16  ;;  %v829_v24 = vshll.u32 %v828_v21, 16  ;;  %v860_v17 = vcvt.f32.s32 %v3891_v31 }
 0x2b5   : > { %vm999_vm14 = vcmp.eq.f32.partialorder %v3856_v3, %v3936_v14  ;;  %v3954_v3 = vld [vmem:[#allocation7 + $0x170] sm:$0xff] }
 0x2b6   : > { %v1000_v19 = vsel %vm999_vm14, %v995_v15, inf  ;;  %2967 = vmatpush3.msra.mxu0 %v3954_v3  ;;  %v861_v31 = vshll.u32 %v860_v17, 16 }
 0x2b7   : > { %1001 = vmin.xlane.f32.xlu0 %v1000_v19  ;;  %2968 = vmatprep.subr.mxu0 %v3957_v23 }
 0x2b8   : > { %v3941_v47 = vpop.xlane.xlu1 %1013 }
 0x2b9   : > { %vm1015_vm15 = vcmp.eq.f32.partialorder %v3862_v8, %v3941_v47  ;;  %v3960_v8 = vld [vmem:[#allocation7 + $0x168] sm:$0xff] }
 0x2ba   : > { %v1016_v46 = vsel %vm1015_vm15, %v1011_v28, inf  ;;  %2969 = vmatpush3.msra.mxu0 %v3960_v8 }
 0x2bb   : > { %1017 = vmin.xlane.f32.xlu1 %v1016_v46  ;;  %2970 = vmatprep.subr.mxu0 %v3963_v36 }
 0x2bc   : > { %2971 = vmatpush3.msra.mxu0 %v3966_v30 }
 0x2bd   : > { %2972 = vmatprep.subr.mxu0 %v3969_v57 }
 0x2be   : > { %2973 = vmatpush3.msra.mxu0 %v3972_v42 }
 0x2bf   : > { %2974 = vmatprep.subr.mxu0 %v3975_v40 }
 0x2c0   : > { %2975 = vmatpush3.msra.mxu0 %v3978_v34 }
 0x2c1   : > { %2976 = vmatprep.subr.mxu0 %v3981_v54 }
 0x2c2   : > { %2977 = vmatpush3.msra.mxu0 %v3984_v52 }
 0x2c3   : > { %2978 = vmatprep.subr.mxu0 %v3987_v7 }
 0x2c4   : > { %2979 = vmatpush3.msra.mxu0 %v3990_v2 }
 0x2c5   : > { %2980 = vmatprep.subr.mxu0 %v3993_v0 }
 0x2c6   : > { %2981 = vmatpush3.msra.mxu0 %v3996_v43 }
 0x2c7   : > { %2982 = vmatprep.subr.mxu0 %v3999_v55 }
 0x2c8   : > { %2983 = vmatpush3.msra.mxu0 %v4002_v10 }
 0x2c9   : > { %2984 = vmatprep.subr.mxu0 %v4005_v56 }
 0x2ca   : > { %2985 = vmatpush3.msra.mxu0 %v4008_v22 }
 0x2cb   : > { %2986 = vmatprep.subr.mxu0 %v4011_v20 }
 0x2cc   : > { %2987 = vmatpush3.msra.mxu0 %v4014_v60 }
 0x2cd   : > { %2988 = vmatprep.subr.mxu0 %v4017_v4 }
 0x2ce   : > { %2989 = vmatpush3.msra.mxu0 %v4020_v27 }
 0x2cf   : > { %2990 = vmatprep.subr.mxu0 %v4023_v61 }
 0x2d0   : > { %2991 = vmatpush3.msra.mxu0 %v4026_v12 }
 0x2d1   : > { %2992 = vmatprep.subr.mxu0 %v4029_v33 }
 0x308   : > { %v778_v18 = vpop.xlane.xlu0 %777 }
 0x309   : > { %v779_v25 = vcvt.f32.s32 %v778_v18 }
 0x30b   : > { %v4035_v53 = vadd.s32 %v781_v41, %v779_v25 }
 0x30c   : > { %v794_v32 = vpop.xlane.xlu1 %793 }
 0x30d   : > { %5365 = vst [vmem:[#allocation17_spill] sm:$0xff] %v4035_v53  ;;  %v795_v15 = vcvt.f32.s32 %v794_v32  ;;  %vm1024_vm0 = vcmp.eq.s32.totalorder %v3703_v16, %v4035_v53  ;;  %vm1023_vm1 = vcmp.eq.s32.totalorder %v3700_v13, %v4035_v53 }
 0x30e   : > { %2649 = vmatprep.mubr.msk.f32.mxu1 %vm1024_vm0, %v5284_v39 }
 0x30f   : > { %v4043_v29 = vadd.s32 %v797_v1, %v795_v15  ;;  %2650 = vmatmul.mubr.msk.f32.vlgmr.msra.gmra.mxu1 %vm1023_vm1, %v5284_v39  ;;  %v876_v15 = vcvt.f32.s32 %v3896_v35 }
 0x310   : > { %v810_v19 = vpop.xlane.xlu0 %809  ;;  %2901 = vmatpush3.xpose.msra.mxu1 %v3948_v62 }
 0x311   : > { %5366 = vst [vmem:[#allocation18_spill] sm:$0xff] %v4043_v29  ;;  %v811_v28 = vcvt.f32.s32 %v810_v19  ;;  %vm1026_vm2 = vcmp.eq.s32.totalorder %v3703_v16, %v4043_v29  ;;  %vm1025_vm3 = vcmp.eq.s32.totalorder %v3700_v13, %v4043_v29  ;;  %2902 = vmatprep.subr.mxu1 %v3951_v58  ;;  %v877_v35 = vshll.u32 %v876_v15, 16 }
 0x312   : > { %2651 = vmatprep.mubr.msk.f32.mxu1 %vm1026_vm2, %v5284_v39  ;;  %v924_v15 = vcvt.f32.s32 %v3911_v45 }
 0x313   : > { %v4054_v46 = vadd.s32 %v813_v37, %v811_v28  ;;  %2652 = vmatmul.mubr.msk.f32.gmra.mxu1 %vm1025_vm3, %v5284_v39 }
 0x314   : > { %v826_v18 = vpop.xlane.xlu1 %825  ;;  %2903 = vmatpush3.xpose.msra.mxu1 %v3954_v3  ;;  %v925_v45 = vshll.u32 %v924_v15, 16 }
 0x315   : > { %5367 = vst [vmem:[#allocation19_spill] sm:$0xff] %v4054_v46  ;;  %v827_v41 = vcvt.f32.s32 %v826_v18  ;;  %vm1028_vm4 = vcmp.eq.s32.totalorder %v3703_v16, %v4054_v46  ;;  %vm1027_vm5 = vcmp.eq.s32.totalorder %v3700_v13, %v4054_v46  ;;  %2904 = vmatprep.subr.mxu1 %v3957_v23 }
 0x316   : > { %2653 = vmatprep.mubr.msk.f32.mxu1 %vm1028_vm4, %v5284_v39 }
 0x317   : > { %v4065_v5 = vadd.s32 %v829_v24, %v827_v41  ;;  %2654 = vmatmul.mubr.msk.f32.gmra.mxu1 %vm1027_vm5, %v5284_v39  ;;  %v908_v41 = vcvt.f32.s32 %v3906_v44 }
 0x318   : > { %v842_v25 = vpop.xlane.xlu0 %841  ;;  %2905 = vmatpush3.xpose.msra.mxu1 %v3960_v8 }
 0x319   : > { %5368 = vst [vmem:[#allocation20_spill] sm:$0xff] %v4065_v5  ;;  %v843_v32 = vcvt.f32.s32 %v842_v25  ;;  %vm1030_vm6 = vcmp.eq.s32.totalorder %v3703_v16, %v4065_v5  ;;  %vm1029_vm7 = vcmp.eq.s32.totalorder %v3700_v13, %v4065_v5  ;;  %2906 = vmatprep.subr.mxu1 %v3963_v36  ;;  %v909_v44 = vshll.u32 %v908_v41, 16 }
 0x31a   : > { %2655 = vmatprep.mubr.msk.f32.mxu1 %vm1030_vm6, %v5284_v39  ;;  %v956_v41 = vcvt.f32.s32 %v3921_v59 }
 0x31b   : > { %v4076_v1 = vadd.s32 %v845_v26, %v843_v32  ;;  %2656 = vmatmul.mubr.msk.f32.gmra.mxu1 %vm1029_vm7, %v5284_v39 }
 0x31c   : > { %v858_v37 = vpop.xlane.xlu1 %857  ;;  %2907 = vmatpush3.xpose.msra.mxu1 %v3966_v30  ;;  %v957_v59 = vshll.u32 %v956_v41, 16 }
 0x31d   : > { %5369 = vst [vmem:[#allocation21_spill] sm:$0xff] %v4076_v1  ;;  %v859_v19 = vcvt.f32.s32 %v858_v37  ;;  %vm1032_vm8 = vcmp.eq.s32.totalorder %v3703_v16, %v4076_v1  ;;  %vm1031_vm9 = vcmp.eq.s32.totalorder %v3700_v13, %v4076_v1  ;;  %2908 = vmatprep.subr.mxu1 %v3969_v57 }
 0x31e   : > { %2657 = vmatprep.mubr.msk.f32.mxu1 %vm1032_vm8, %v5284_v39 }
 0x31f   : > { %v4087_v21 = vadd.s32 %v861_v31, %v859_v19  ;;  %2658 = vmatmul.mubr.msk.f32.gmra.mxu1 %vm1031_vm9, %v5284_v39  ;;  %v940_v19 = vcvt.f32.s32 %v3916_v63 }
 0x320   : > { %v874_v28 = vpop.xlane.xlu0 %873  ;;  %2909 = vmatpush3.xpose.msra.mxu1 %v3972_v42 }
 0x321   : > { %5370 = vst [vmem:[#allocation22_spill] sm:$0xff] %v4087_v21  ;;  %v875_v18 = vcvt.f32.s32 %v874_v28  ;;  %vm1034_vm10 = vcmp.eq.s32.totalorder %v3703_v16, %v4087_v21  ;;  %vm1033_vm11 = vcmp.eq.s32.totalorder %v3700_v13, %v4087_v21  ;;  %2910 = vmatprep.subr.mxu1 %v3975_v40  ;;  %v941_v63 = vshll.u32 %v940_v19, 16 }
 0x322   : > { %2659 = vmatprep.mubr.msk.f32.mxu1 %vm1034_vm10, %v5284_v39  ;;  %v988_v19 = vcvt.f32.s32 %v3931_v6 }
 0x323   : > { %v4098_v24 = vadd.s32 %v877_v35, %v875_v18  ;;  %2660 = vmatmul.mubr.msk.f32.gmra.mxu1 %vm1033_vm11, %v5284_v39 }
 0x324   : > { %v890_v26 = vpop.xlane.xlu1 %889  ;;  %2911 = vmatpush3.xpose.msra.mxu1 %v3978_v34  ;;  %v989_v6 = vshll.u32 %v988_v19, 16  ;;  %v4205_v19 = vld [vmem:[#allocation7 + $0x108] sm:$0xff] }
 0x325   : > { %5371 = vst [vmem:[#allocation23_spill] sm:$0xff] %v4098_v24  ;;  %v891_v25 = vcvt.f32.s32 %v890_v26  ;;  %vm1036_vm12 = vcmp.eq.s32.totalorder %v3703_v16, %v4098_v24  ;;  %vm1035_vm13 = vcmp.eq.s32.totalorder %v3700_v13, %v4098_v24  ;;  %2912 = vmatprep.subr.mxu1 %v3981_v54  ;;  %2993 = vmatpush3.msra.mxu0 %v4205_v19 }
 0x326   : > { %2661 = vmatprep.mubr.msk.f32.mxu1 %vm1036_vm12, %v5284_v39 }
 0x327   : > { %v4109_v17 = vadd.s32 %v893_v38, %v891_v25  ;;  %2662 = vmatmul.mubr.msk.f32.gmra.mxu1 %vm1035_vm13, %v5284_v39  ;;  %v972_v25 = vcvt.f32.s32 %v3926_v11 }
 0x328   : > { %v906_v32 = vpop.xlane.xlu0 %905  ;;  %2913 = vmatpush3.xpose.msra.mxu1 %v3984_v52 }
 0x329   : > { %5372 = vst [vmem:[#allocation24_spill] sm:$0xff] %v4109_v17  ;;  %v907_v37 = vcvt.f32.s32 %v906_v32  ;;  %vm1038_vm14 = vcmp.eq.s32.totalorder %v3703_v16, %v4109_v17  ;;  %vm1037_vm15 = vcmp.eq.s32.totalorder %v3700_v13, %v4109_v17  ;;  %2914 = vmatprep.subr.mxu1 %v3987_v7  ;;  %v973_v11 = vshll.u32 %v972_v25, 16 }
 0x32a   : > { %2663 = vmatprep.mubr.msk.f32.mxu1 %vm1038_vm14, %v5284_v39  ;;  %v1020_v25 = vcvt.f32.s32 %v3941_v47 }
 0x32b   : > { %v4120_v31 = vadd.s32 %v909_v44, %v907_v37  ;;  %2664 = vmatmul.mubr.msk.f32.gmra.mxu1 %vm1037_vm15, %v5284_v39 }
 0x32c   : > { %v922_v35 = vpop.xlane.xlu1 %921  ;;  %2915 = vmatpush3.xpose.msra.mxu1 %v3990_v2 }
 0x32d   : > { %5373 = vst [vmem:[#allocation25_spill] sm:$0xff] %v4120_v31  ;;  %v923_v28 = vcvt.f32.s32 %v922_v35  ;;  %vm1040_vm0 = vcmp.eq.s32.totalorder %v3703_v16, %v4120_v31  ;;  %vm1039_vm1 = vcmp.eq.s32.totalorder %v3700_v13, %v4120_v31  ;;  %2916 = vmatprep.subr.mxu1 %v3993_v0 }
 0x32e   : > { %2665 = vmatprep.mubr.msk.f32.mxu1 %vm1040_vm0, %v5284_v39 }
 0x32f   : > { %v4131_v9 = vadd.s32 %v925_v45, %v923_v28  ;;  %2666 = vmatmul.mubr.msk.f32.gmra.mxu1 %vm1039_vm1, %v5284_v39  ;;  %v1004_v28 = vcvt.f32.s32 %v3936_v14 }
 0x330   : > { %v938_v18 = vpop.xlane.xlu0 %937  ;;  %2917 = vmatpush3.xpose.msra.mxu1 %v3996_v43 }
 0x331   : > { %5374 = vst [vmem:[#allocation26_spill] sm:$0xff] %v4131_v9  ;;  %v939_v26 = vcvt.f32.s32 %v938_v18  ;;  %vm1042_vm2 = vcmp.eq.s32.totalorder %v3703_v16, %v4131_v9  ;;  %vm1041_vm3 = vcmp.eq.s32.totalorder %v3700_v13, %v4131_v9  ;;  %2918 = vmatprep.subr.mxu1 %v3999_v55  ;;  %v1005_v14 = vshll.u32 %v1004_v28, 16  ;;  %v4212_v28 = vld [vmem:[#allocation7 + $0x100] sm:$0xff] }
 0x332   : > { %2667 = vmatprep.mubr.msk.f32.mxu1 %vm1042_vm2, %v5284_v39 }
 0x333   : > { %v4142_v38 = vadd.s32 %v941_v63, %v939_v26  ;;  %2668 = vmatmul.mubr.msk.f32.gmra.mxu1 %vm1041_vm3, %v5284_v39 }
 0x334   : > { %v954_v44 = vpop.xlane.xlu1 %953  ;;  %2919 = vmatpush3.xpose.msra.mxu1 %v4002_v10 }
 0x335   : > { %5375 = vst [vmem:[#allocation27_spill] sm:$0xff] %v4142_v38  ;;  %v955_v32 = vcvt.f32.s32 %v954_v44  ;;  %vm1044_vm4 = vcmp.eq.s32.totalorder %v3703_v16, %v4142_v38  ;;  %vm1043_vm5 = vcmp.eq.s32.totalorder %v3700_v13, %v4142_v38  ;;  %2920 = vmatprep.subr.mxu1 %v4005_v56 }
 0x336   : > { %2669 = vmatprep.mubr.msk.f32.mxu1 %vm1044_vm4, %v5284_v39 }
 0x337   : > { %v4153_v15 = vadd.s32 %v957_v59, %v955_v32  ;;  %2670 = vmatmul.mubr.msk.f32.gmra.mxu1 %vm1043_vm5, %v5284_v39 }
 0x338   : > { %v970_v37 = vpop.xlane.xlu0 %969  ;;  %2921 = vmatpush3.xpose.msra.mxu1 %v4008_v22 }
 0x339   : > { %5376 = vst [vmem:[#allocation28_spill] sm:$0xff] %v4153_v15  ;;  %v971_v35 = vcvt.f32.s32 %v970_v37  ;;  %vm1046_vm6 = vcmp.eq.s32.totalorder %v3703_v16, %v4153_v15  ;;  %vm1045_vm7 = vcmp.eq.s32.totalorder %v3700_v13, %v4153_v15  ;;  %2922 = vmatprep.subr.mxu1 %v4011_v20 }
 0x33a   : > { %2671 = vmatprep.mubr.msk.f32.mxu1 %vm1046_vm6, %v5284_v39 }
 0x33b   : > { %v4164_v45 = vadd.s32 %v973_v11, %v971_v35  ;;  %2672 = vmatmul.mubr.msk.f32.gmra.mxu1 %vm1045_vm7, %v5284_v39  ;;  %v1021_v11 = vshll.u32 %v1020_v25, 16  ;;  %v4209_v35 = vld [vmem:[#allocation7 + $0x180] sm:$0xff] }
 0x33c   : > { %v986_v63 = vpop.xlane.xlu1 %985  ;;  %2923 = vmatpush3.xpose.msra.mxu1 %v4014_v60  ;;  %2994 = vmatprep.subr.mxu0 %v4209_v35 }
 0x33d   : > { %5377 = vst [vmem:[#allocation29_spill] sm:$0xff] %v4164_v45  ;;  %v987_v18 = vcvt.f32.s32 %v986_v63  ;;  %vm1048_vm8 = vcmp.eq.s32.totalorder %v3703_v16, %v4164_v45  ;;  %vm1047_vm9 = vcmp.eq.s32.totalorder %v3700_v13, %v4164_v45  ;;  %2924 = vmatprep.subr.mxu1 %v4017_v4  ;;  %2995 = vmatpush3.msra.mxu0 %v4212_v28 }
 0x33e   : > { %2673 = vmatprep.mubr.msk.f32.mxu1 %vm1048_vm8, %v5284_v39 }
 0x33f   : > { %v4175_v41 = vadd.s32 %v989_v6, %v987_v18  ;;  %2674 = vmatmul.mubr.msk.f32.gmra.mxu1 %vm1047_vm9, %v5284_v39 }
 0x340   : > { %v1002_v26 = vpop.xlane.xlu0 %1001  ;;  %2925 = vmatpush3.xpose.msra.mxu1 %v4020_v27 }
 0x341   : > { %5378 = vst [vmem:[#allocation30_spill] sm:$0xff] %v4175_v41  ;;  %v1003_v44 = vcvt.f32.s32 %v1002_v26  ;;  %vm1050_vm10 = vcmp.eq.s32.totalorder %v3703_v16, %v4175_v41  ;;  %vm1049_vm11 = vcmp.eq.s32.totalorder %v3700_v13, %v4175_v41  ;;  %2926 = vmatprep.subr.mxu1 %v4023_v61  ;;  %v4221_v26 = vld [vmem:[%s3528_s13] sm:$0xff] }
 0x342   : > { %2675 = vmatprep.mubr.msk.f32.mxu1 %vm1050_vm10, %v5284_v39 }
 0x343   : > { %v4186_v59 = vadd.s32 %v1005_v14, %v1003_v44  ;;  %2676 = vmatmul.mubr.msk.f32.gmra.mxu1 %vm1049_vm11, %v5284_v39 }
 0x344   : > { %v1018_v32 = vpop.xlane.xlu1 %1017  ;;  %2927 = vmatpush3.xpose.msra.mxu1 %v4026_v12 }
 0x345   : > { %5379 = vst [vmem:[#allocation31_spill] sm:$0xff] %v4186_v59  ;;  %v1019_v47 = vcvt.f32.s32 %v1018_v32  ;;  %vm1052_vm12 = vcmp.eq.s32.totalorder %v3703_v16, %v4186_v59  ;;  %vm1051_vm13 = vcmp.eq.s32.totalorder %v3700_v13, %v4186_v59  ;;  %2928 = vmatprep.subr.mxu1 %v4029_v33 }
 0x346   : > { %2677 = vmatprep.mubr.msk.f32.mxu1 %vm1052_vm12, %v5284_v39 }
 0x347   : > { %v4196_v37 = vadd.s32 %v1021_v11, %v1019_v47  ;;  %2678 = vmatmul.mubr.msk.f32.gmra.mxu1 %vm1051_vm13, %v5284_v39 }
 0x348   : > { %2929 = vmatpush3.xpose.msra.mxu1 %v4205_v19 }
 0x349   : > { %5380 = vst [vmem:[#allocation32_spill] sm:$0xff] %v4196_v37  ;;  %vm1054_vm14 = vcmp.eq.s32.totalorder %v3703_v16, %v4196_v37  ;;  %vm1053_vm15 = vcmp.eq.s32.totalorder %v3700_v13, %v4196_v37  ;;  %2930 = vmatprep.subr.mxu1 %v4209_v35 }
 0x34a   : > { %2679 = vmatprep.mubr.msk.f32.mxu1 %vm1054_vm14, %v5284_v39 }
 0x34b   : > { %2680 = vmatmul.mubr.msk.f32.gmra.mxu1 %vm1053_vm15, %v5284_v39 }
 0x34c   : > { %2931 = vmatpush3.xpose.msra.mxu1 %v4212_v28 }
 0x34d   : > { %3044 = vmatprep.subr.mxu1 %v3945_v48  ;;  %v4232_v48 = vld [vmem:[%s3528_s13 + $0x8] sm:$0xff] }
 0x3cf   : > { %v2852_v63 = vpop.f32.mrf.mxu1 }
 0x3d1   : > { %v2853_v6 = vpop.f32.mrf.mxu1 }
 0x3d2   : > { %v4218_v18 = vadd.f32 %v2853_v6, %v2852_v63 }
 0x3d3   : > { %v2855_v14 = vpop.f32.mrf.mxu1 }
 0x3d4   : > { %v4225_v25 = vsub.f32 %v4221_v26, %v4218_v18 }
 0x3d5   : > { %v2856_v44 = vpop.f32.mrf.mxu1 }
 0x3d6   : > { %5381 = vst [vmem:[#allocation33_spill] sm:$0xff] %v4225_v25  ;;  %v4227_v32 = vadd.f32 %v2856_v44, %v2855_v14  ;;  %2932 = vmatprep.mubr.f32.mxu1 %v4225_v25  ;;  %v4247_v44 = vld [vmem:[%s3528_s13 + $0x10] sm:$0xff] }
 0x3d7   : > { %v2858_v11 = vpop.f32.mrf.mxu1  ;;  %2933 = vmatmul.mubr.f32.vlgmr.msra.gmra.mxu1 %v4225_v25 }
 0x3d8   : > { %5382 = vst [vmem:[#allocation34_spill] sm:$0xff] %v4227_v32  ;;  %v4236_v47 = vsub.f32 %v4232_v48, %v4227_v32  ;;  %3060 = vmatpush3.msra.mxu1 %v3948_v62 }
 0x3d9   : > { %v2859_v63 = vpop.f32.mrf.mxu1  ;;  %3045 = vmatprep.subr.mxu1 %v3951_v58 }
 0x3da   : > { %5383 = vst [vmem:[#allocation35_spill] sm:$0xff] %v4236_v47  ;;  %v4240_v6 = vadd.f32 %v2859_v63, %v2858_v11  ;;  %2934 = vmatprep.mubr.f32.mxu1 %v4236_v47  ;;  %3061 = vmatpush3.msra.mxu1 %v3954_v3 }
 0x3db   : > { %v2861_v14 = vpop.f32.mrf.mxu1  ;;  %2935 = vmatmul.mubr.f32.gmra.mxu1 %v4236_v47  ;;  %3046 = vmatprep.subr.mxu1 %v3957_v23  ;;  %v4262_v23 = vld [vmem:[%s3528_s13 + $0x18] sm:$0xff] }
 0x3dc   : > { %5384 = vst [vmem:[#allocation36_spill] sm:$0xff] %v4240_v6  ;;  %v4251_v62 = vsub.f32 %v4247_v44, %v4240_v6  ;;  %3062 = vmatpush3.msra.mxu1 %v3960_v8 }
 0x3dd   : > { %v2862_v58 = vpop.f32.mrf.mxu1  ;;  %3047 = vmatprep.subr.mxu1 %v3963_v36 }
 0x3de   : > { %5385 = vst [vmem:[#allocation37_spill] sm:$0xff] %v4251_v62  ;;  %v4255_v11 = vadd.f32 %v2862_v58, %v2861_v14  ;;  %2936 = vmatprep.mubr.f32.mxu1 %v4251_v62  ;;  %3063 = vmatpush3.msra.mxu1 %v3966_v30 }
 0x3df   : > { %v2864_v3 = vpop.f32.mrf.mxu1  ;;  %2937 = vmatmul.mubr.f32.gmra.mxu1 %v4251_v62  ;;  %3048 = vmatprep.subr.mxu1 %v3969_v57  ;;  %v4277_v57 = vld [vmem:[%s3528_s13 + $0x20] sm:$0xff] }
 0x3e0   : > { %v4266_v8 = vsub.f32 %v4262_v23, %v4255_v11  ;;  %3064 = vmatpush3.msra.mxu1 %v3972_v42 }
 0x3e1   : > { %v2865_v36 = vpop.f32.mrf.mxu1  ;;  %3049 = vmatprep.subr.mxu1 %v3975_v40 }
 0x3e2   : > { %5386 = vst [vmem:[#allocation38_spill] sm:$0xff] %v4266_v8  ;;  %v4270_v63 = vadd.f32 %v2865_v36, %v2864_v3  ;;  %2938 = vmatprep.mubr.f32.mxu1 %v4266_v8  ;;  %3065 = vmatpush3.msra.mxu1 %v3978_v34 }
 0x3e3   : > { %v2867_v30 = vpop.f32.mrf.mxu1  ;;  %2939 = vmatmul.mubr.f32.gmra.mxu1 %v4266_v8  ;;  %3050 = vmatprep.subr.mxu1 %v3981_v54  ;;  %v4292_v54 = vld [vmem:[%s3528_s13 + $0x28] sm:$0xff] }
 0x3e4   : > { %v4281_v42 = vsub.f32 %v4277_v57, %v4270_v63  ;;  %3066 = vmatpush3.msra.mxu1 %v3984_v52 }
 0x3e5   : > { %v2868_v40 = vpop.f32.mrf.mxu1  ;;  %3051 = vmatprep.subr.mxu1 %v3987_v7 }
 0x3e6   : > { %5387 = vst [vmem:[#allocation39_spill] sm:$0xff] %v4281_v42  ;;  %v4285_v14 = vadd.f32 %v2868_v40, %v2867_v30  ;;  %2940 = vmatprep.mubr.f32.mxu1 %v4281_v42  ;;  %3067 = vmatpush3.msra.mxu1 %v3990_v2 }
 0x3e7   : > { %v2870_v34 = vpop.f32.mrf.mxu1  ;;  %2941 = vmatmul.mubr.f32.gmra.mxu1 %v4281_v42  ;;  %3052 = vmatprep.subr.mxu1 %v3993_v0  ;;  %v4307_v0 = vld [vmem:[%s3528_s13 + $0x30] sm:$0xff] }
 0x3e8   : > { %v4296_v52 = vsub.f32 %v4292_v54, %v4285_v14  ;;  %3068 = vmatpush3.msra.mxu1 %v3996_v43 }
 0x3e9   : > { %v2871_v7 = vpop.f32.mrf.mxu1  ;;  %3053 = vmatprep.subr.mxu1 %v3999_v55 }
 0x3ea   : > { %5388 = vst [vmem:[#allocation40_spill] sm:$0xff] %v4296_v52  ;;  %v4300_v58 = vadd.f32 %v2871_v7, %v2870_v34  ;;  %2942 = vmatprep.mubr.f32.mxu1 %v4296_v52  ;;  %3069 = vmatpush3.msra.mxu1 %v4002_v10 }
 0x3eb   : > { %v2873_v2 = vpop.f32.mrf.mxu1  ;;  %2943 = vmatmul.mubr.f32.gmra.mxu1 %v4296_v52  ;;  %3054 = vmatprep.subr.mxu1 %v4005_v56  ;;  %v4322_v56 = vld [vmem:[%s3528_s13 + $0x38] sm:$0xff]  ;;  %v5414_v52 = vsub.s32 1, %v3559_v49 }
 0x3ec   : > { %v4311_v43 = vsub.f32 %v4307_v0, %v4300_v58  ;;  %3070 = vmatpush3.msra.mxu1 %v4008_v22 }
 0x3ed   : > { %v2874_v55 = vpop.f32.mrf.mxu1  ;;  %3055 = vmatprep.subr.mxu1 %v4011_v20 }
 0x3ee   : > { %5389 = vst [vmem:[#allocation41_spill] sm:$0xff] %v4311_v43  ;;  %v4315_v3 = vadd.f32 %v2874_v55, %v2873_v2  ;;  %2944 = vmatprep.mubr.f32.mxu1 %v4311_v43  ;;  %3071 = vmatpush3.msra.mxu1 %v4014_v60 }
 0x3ef   : > { %v2876_v10 = vpop.f32.mrf.mxu1  ;;  %2945 = vmatmul.mubr.f32.gmra.mxu1 %v4311_v43  ;;  %3056 = vmatprep.subr.mxu1 %v4017_v4  ;;  %v4337_v4 = vld [vmem:[%s3528_s13 + $0x40] sm:$0xff] }
 0x3f0   : > { %v4326_v22 = vsub.f32 %v4322_v56, %v4315_v3  ;;  %3072 = vmatpush3.msra.mxu1 %v4020_v27 }
 0x3f1   : > { %v2877_v20 = vpop.f32.mrf.mxu1  ;;  %3057 = vmatprep.subr.mxu1 %v4023_v61 }
 0x3f2   : > { %5390 = vst [vmem:[#allocation42_spill] sm:$0xff] %v4326_v22  ;;  %v4330_v36 = vadd.f32 %v2877_v20, %v2876_v10  ;;  %2946 = vmatprep.mubr.f32.mxu1 %v4326_v22  ;;  %3073 = vmatpush3.msra.mxu1 %v4026_v12  ;;  %v4373_v20 = vld [vmem:[%s3528_s13 + $0x58] sm:$0xff] }
 0x3f3   : > { %v2879_v60 = vpop.f32.mrf.mxu1  ;;  %2947 = vmatmul.mubr.f32.gmra.mxu1 %v4326_v22  ;;  %3058 = vmatprep.subr.mxu1 %v4029_v33  ;;  %v4351_v33 = vld [vmem:[%s3528_s13 + $0x48] sm:$0xff]  ;;  %5399 = vst [vmem:[#allocation51_spill] sm:$0xff] %v4373_v20 }
 0x3f4   : > { %v4341_v27 = vsub.f32 %v4337_v4, %v4330_v36  ;;  %3074 = vmatpush3.msra.mxu1 %v4205_v19  ;;  %5393 = vst [vmem:[#allocation45_spill] sm:$0xff] %v4351_v33 }
 0x3f5   : > { %v2880_v61 = vpop.f32.mrf.mxu1  ;;  %3059 = vmatprep.subr.mxu1 %v4209_v35 }
 0x3f6   : > { %5391 = vst [vmem:[#allocation43_spill] sm:$0xff] %v4341_v27  ;;  %v4345_v30 = vadd.f32 %v2880_v61, %v2879_v60  ;;  %2948 = vmatprep.mubr.f32.mxu1 %v4341_v27  ;;  %3075 = vmatpush3.msra.mxu1 %v4212_v28  ;;  %v4362_v28 = vld [vmem:[%s3528_s13 + $0x50] sm:$0xff] }
 0x3f7   : > { %v2882_v12 = vpop.f32.mrf.mxu1  ;;  %2949 = vmatmul.mubr.f32.gmra.mxu1 %v4341_v27  ;;  %5396 = vst [vmem:[#allocation48_spill] sm:$0xff] %v4362_v28 }
 0x3f8   : > { %5392 = vst [vmem:[#allocation44_spill] sm:$0xff] %v4345_v30  ;;  %v4355_v40 = vsub.f32 %v4351_v33, %v4345_v30 }
 0x3f9   : > { %v2883_v19 = vpop.f32.mrf.mxu1 }
 0x3fa   : > { %5394 = vst [vmem:[#allocation46_spill] sm:$0xff] %v4355_v40  ;;  %v4357_v34 = vadd.f32 %v2883_v19, %v2882_v12  ;;  %2950 = vmatprep.mubr.f32.mxu1 %v4355_v40 }
 0x3fb   : > { %v2885_v35 = vpop.f32.mrf.mxu1  ;;  %2951 = vmatmul.mubr.f32.gmra.mxu1 %v4355_v40 }
 0x3fc   : > { %5395 = vst [vmem:[#allocation47_spill] sm:$0xff] %v4357_v34  ;;  %v4366_v7 = vsub.f32 %v4362_v28, %v4357_v34 }
 0x3fd   : > { %v2886_v2 = vpop.f32.mrf.mxu1 }
 0x3fe   : > { %5397 = vst [vmem:[#allocation49_spill] sm:$0xff] %v4366_v7  ;;  %v4368_v55 = vadd.f32 %v2886_v2, %v2885_v35  ;;  %2952 = vmatprep.mubr.f32.mxu1 %v4366_v7  ;;  %v4384_v35 = vld [vmem:[%s3528_s13 + $0x60] sm:$0xff] }
 0x3ff   : > { %v2888_v10 = vpop.f32.mrf.mxu1  ;;  %2953 = vmatmul.mubr.f32.gmra.mxu1 %v4366_v7  ;;  %5402 = vst [vmem:[#allocation54_spill] sm:$0xff] %v4384_v35 }
 0x400   : > { %5398 = vst [vmem:[#allocation50_spill] sm:$0xff] %v4368_v55  ;;  %v4377_v60 = vsub.f32 %v4373_v20, %v4368_v55 }
 0x401   : > { %v2889_v61 = vpop.f32.mrf.mxu1 }
 0x402   : > { %5400 = vst [vmem:[#allocation52_spill] sm:$0xff] %v4377_v60  ;;  %v4379_v12 = vadd.f32 %v2889_v61, %v2888_v10  ;;  %2954 = vmatprep.mubr.f32.mxu1 %v4377_v60  ;;  %v4395_v61 = vld [vmem:[%s3528_s13 + $0x68] sm:$0xff] }
 0x403   : > { %v2891_v19 = vpop.f32.mrf.mxu1  ;;  %2955 = vmatmul.mubr.f32.gmra.mxu1 %v4377_v60  ;;  %5405 = vst [vmem:[#allocation57_spill] sm:$0xff] %v4395_v61 }
 0x404   : > { %5401 = vst [vmem:[#allocation53_spill] sm:$0xff] %v4379_v12  ;;  %v4388_v2 = vsub.f32 %v4384_v35, %v4379_v12 }
 0x405   : > { %v2892_v39 = vpop.f32.mrf.mxu1 }
 0x406   : > { %5403 = vst [vmem:[#allocation55_spill] sm:$0xff] %v4388_v2  ;;  %v4390_v51 = vadd.f32 %v2892_v39, %v2891_v19  ;;  %2956 = vmatprep.mubr.f32.mxu1 %v4388_v2  ;;  %v4406_v39 = vld [vmem:[%s3528_s13 + $0x70] sm:$0xff] }
 0x407   : > { %v2894_v10 = vpop.f32.mrf.mxu1  ;;  %2957 = vmatmul.mubr.f32.gmra.mxu1 %v4388_v2  ;;  %5408 = vst [vmem:[#allocation60_spill] sm:$0xff] %v4406_v39 }
 0x408   : > { %5404 = vst [vmem:[#allocation56_spill] sm:$0xff] %v4390_v51  ;;  %v4399_v50 = vsub.f32 %v4395_v61, %v4390_v51 }
 0x409   : > { %v2895_v60 = vpop.f32.mrf.mxu1 }
 0x40a   : > { %5406 = vst [vmem:[#allocation58_spill] sm:$0xff] %v4399_v50  ;;  %v4401_v7 = vadd.f32 %v2895_v60, %v2894_v10  ;;  %2958 = vmatprep.mubr.f32.mxu1 %v4399_v50  ;;  %v4417_v60 = vld [vmem:[%s3528_s13 + $0x78] sm:$0xff]  ;;  %s3263_s13 = scalar_lea.vmem %s5218_s8, 2048 }
 0x40b   : > { %v2897_v40 = vpop.f32.mrf.mxu1  ;;  %2959 = vmatmul.mubr.f32.gmra.mxu1 %v4399_v50  ;;  %5411 = vst [vmem:[#allocation63_spill] sm:$0xff] %v4417_v60  ;;  %v1420_v50 = vld [vmem:[#allocation9 + $0x1] ss:$2 sm:$0x3]  ;;  %p3264_p11 = scmp.ne.s32.totalorder %s5218_s8, %s3263_s13 }
 0x40c   : > { %5407 = vst [vmem:[#allocation59_spill] sm:$0xff] %v4401_v7  ;;  %v4410_v19 = vsub.f32 %v4406_v39, %v4401_v7 }
 0x40d   : > { %v2898_v2 = vpop.f32.mrf.mxu1  ;;  %p3265_p13 = pnand %p3264_p11, %p5481_p9 }
 0x40e   : > { %5409 = vst [vmem:[#allocation61_spill] sm:$0xff] %v4410_v19  ;;  %v4412_v27 = vadd.f32 %v2898_v2, %v2897_v40  ;;  %2960 = vmatprep.mubr.f32.mxu1 %v4410_v19  ;;  %v5413_v40 = vsub.s32 0, %v3559_v49 }
 0x40f   : > { %2961 = vmatmul.mubr.f32.gmra.mxu1 %v4410_v19  ;;  %v4431_v19 = vrot.slane %v1420_v50, %v5414_v52  ;;  %p3266_p0 = pneg %p3265_p13 }
 0x410   : > { %5410 = vst [vmem:[#allocation62_spill] sm:$0xff] %v4412_v27  ;;  %v4421_v10 = vsub.f32 %v4417_v60, %v4412_v27  ;;  %v4427_v2 = vrot.slane %v1420_v50, %v5413_v40 }
 0x412   : > { %5412 = vst [vmem:[#allocation64_spill] sm:$0xff] %v4421_v10  ;;  %2962 = vmatprep.mubr.f32.mxu1 %v4421_v10 }
 0x413   : > { %2963 = vmatmul.mubr.f32.gmra.mxu1 %v4421_v10 }
 0x497   : > { %v1487_v22 = vpop.f32.mrf.mxu1 }
 0x498   : > { %v1582_v43 = vmul.f32 2.0, %v1487_v22 }
 0x499   : > { %v1489_v42 = vpop.f32.mrf.mxu1 }
 0x49a   : > { %v1583_v8 = vmul.f32 2.0, %v1489_v42  ;;  %v4434_v25 = vsub.f32 %v4427_v2, %v1582_v43 }
 0x49b   : > { %v1493_v62 = vpop.f32.mrf.mxu1 }
 0x49c   : > { %v4437_v47 = vsub.f32 %v4431_v19, %v1583_v8  ;;  %v1584_v10 = vmul.f32 2.0, %v1493_v62 }
 0x49d   : > { %v1495_v37 = vpop.f32.mrf.mxu1 }
 0x49e   : > { %v1585_v22 = vmul.f32 2.0, %v1495_v37  ;;  %v1657_v40 = vmin.f32 %v4434_v25, %v4437_v47  ;;  %v4442_v41 = vsub.f32 %v4427_v2, %v1584_v10 }
 0x49f   : > { %v1499_v59 = vpop.f32.mrf.mxu1 }
 0x4a0   : > { %v4445_v50 = vsub.f32 %v4431_v19, %v1585_v22  ;;  %v1586_v42 = vmul.f32 2.0, %v1499_v59  ;;  %1658 = vmin.xlane.f32.xlu0 %v1657_v40 }
 0x4a1   : > { %v1501_v52 = vpop.f32.mrf.mxu1 }
 0x4a2   : > { %v1587_v43 = vmul.f32 2.0, %v1501_v52  ;;  %v1660_v8 = vmin.f32 %v4442_v41, %v4445_v50  ;;  %v4450_v37 = vsub.f32 %v4427_v2, %v1586_v42 }
 0x4a3   : > { %v1505_v62 = vpop.f32.mrf.mxu1 }
 0x4a4   : > { %v4453_v45 = vsub.f32 %v4431_v19, %v1587_v43  ;;  %v1588_v15 = vmul.f32 2.0, %v1505_v62  ;;  %1661 = vmin.xlane.f32.xlu1 %v1660_v8 }
 0x4a5   : > { %v1507_v10 = vpop.f32.mrf.mxu1 }
 0x4a6   : > { %v1589_v38 = vmul.f32 2.0, %v1507_v10  ;;  %v1663_v59 = vmin.f32 %v4450_v37, %v4453_v45  ;;  %v4458_v40 = vsub.f32 %v4427_v2, %v1588_v15 }
 0x4a7   : > { %v1511_v22 = vpop.f32.mrf.mxu1 }
 0x4a8   : > { %v4461_v52 = vsub.f32 %v4431_v19, %v1589_v38  ;;  %v1590_v9 = vmul.f32 2.0, %v1511_v22  ;;  %1664 = vmin.xlane.f32.xlu0 %v1663_v59 }
 0x4a9   : > { %v1513_v42 = vpop.f32.mrf.mxu1 }
 0x4aa   : > { %v1591_v31 = vmul.f32 2.0, %v1513_v42  ;;  %v1666_v43 = vmin.f32 %v4458_v40, %v4461_v52  ;;  %v4466_v62 = vsub.f32 %v4427_v2, %v1590_v9 }
 0x4ab   : > { %v1517_v8 = vpop.f32.mrf.mxu1 }
 0x4ac   : > { %v4469_v10 = vsub.f32 %v4431_v19, %v1591_v31  ;;  %v1592_v17 = vmul.f32 2.0, %v1517_v8  ;;  %1667 = vmin.xlane.f32.xlu1 %v1666_v43 }
 0x4ad   : > { %v1519_v15 = vpop.f32.mrf.mxu1 }
 0x4ae   : > { %v1593_v24 = vmul.f32 2.0, %v1519_v15  ;;  %v1669_v38 = vmin.f32 %v4466_v62, %v4469_v10  ;;  %v4474_v22 = vsub.f32 %v4427_v2, %v1592_v17 }
 0x4af   : > { %v1523_v59 = vpop.f32.mrf.mxu1 }
 0x4b0   : > { %v4477_v42 = vsub.f32 %v4431_v19, %v1593_v24  ;;  %v1594_v21 = vmul.f32 2.0, %v1523_v59  ;;  %1670 = vmin.xlane.f32.xlu0 %v1669_v38 }
 0x4b1   : > { %v1525_v9 = vpop.f32.mrf.mxu1 }
 0x4b2   : > { %v1595_v1 = vmul.f32 2.0, %v1525_v9  ;;  %v1672_v31 = vmin.f32 %v4474_v22, %v4477_v42  ;;  %v4482_v8 = vsub.f32 %v4427_v2, %v1594_v21 }
 0x4b3   : > { %v1529_v43 = vpop.f32.mrf.mxu1 }
 0x4b4   : > { %v4485_v15 = vsub.f32 %v4431_v19, %v1595_v1  ;;  %v1596_v5 = vmul.f32 2.0, %v1529_v43  ;;  %1673 = vmin.xlane.f32.xlu1 %v1672_v31 }
 0x4b5   : > { %v1531_v17 = vpop.f32.mrf.mxu1 }
 0x4b6   : > { %v1597_v46 = vmul.f32 2.0, %v1531_v17  ;;  %v1675_v24 = vmin.f32 %v4482_v8, %v4485_v15  ;;  %v4490_v59 = vsub.f32 %v4427_v2, %v1596_v5 }
 0x4b7   : > { %v1535_v38 = vpop.f32.mrf.mxu1 }
 0x4b8   : > { %v4493_v9 = vsub.f32 %v4431_v19, %v1597_v46  ;;  %v1598_v29 = vmul.f32 2.0, %v1535_v38  ;;  %1676 = vmin.xlane.f32.xlu0 %v1675_v24 }
 0x4b9   : > { %v1537_v21 = vpop.f32.mrf.mxu1 }
 0x4ba   : > { %v1599_v53 = vmul.f32 2.0, %v1537_v21  ;;  %v1678_v1 = vmin.f32 %v4490_v59, %v4493_v9  ;;  %v4498_v43 = vsub.f32 %v4427_v2, %v1598_v29 }
 0x4bb   : > { %v1541_v31 = vpop.f32.mrf.mxu1 }
 0x4bc   : > { %v4501_v17 = vsub.f32 %v4431_v19, %v1599_v53  ;;  %v1600_v27 = vmul.f32 2.0, %v1541_v31  ;;  %1679 = vmin.xlane.f32.xlu1 %v1678_v1 }
 0x4bd   : > { %v1543_v5 = vpop.f32.mrf.mxu1 }
 0x4be   : > { %v1601_v60 = vmul.f32 2.0, %v1543_v5  ;;  %v1681_v46 = vmin.f32 %v4498_v43, %v4501_v17  ;;  %v4506_v38 = vsub.f32 %v4427_v2, %v1600_v27 }
 0x4bf   : > { %v1547_v24 = vpop.f32.mrf.mxu1 }
 0x4c0   : > { %v4509_v21 = vsub.f32 %v4431_v19, %v1601_v60  ;;  %v1602_v7 = vmul.f32 2.0, %v1547_v24  ;;  %1682 = vmin.xlane.f32.xlu0 %v1681_v46 }
 0x4c1   : > { %v1549_v29 = vpop.f32.mrf.mxu1 }
 0x4c2   : > { %v1603_v39 = vmul.f32 2.0, %v1549_v29  ;;  %v1684_v53 = vmin.f32 %v4506_v38, %v4509_v21  ;;  %v4514_v31 = vsub.f32 %v4427_v2, %v1602_v7 }
 0x4c3   : > { %v1553_v1 = vpop.f32.mrf.mxu1 }
 0x4c4   : > { %v4517_v5 = vsub.f32 %v4431_v19, %v1603_v39  ;;  %v1604_v51 = vmul.f32 2.0, %v1553_v1  ;;  %1685 = vmin.xlane.f32.xlu1 %v1684_v53 }
 0x4c5   : > { %v1555_v27 = vpop.f32.mrf.mxu1 }
 0x4c6   : > { %v1605_v61 = vmul.f32 2.0, %v1555_v27  ;;  %v1687_v60 = vmin.f32 %v4514_v31, %v4517_v5  ;;  %v4522_v24 = vsub.f32 %v4427_v2, %v1604_v51 }
 0x4c7   : > { %v1559_v46 = vpop.f32.mrf.mxu1 }
 0x4c8   : > { %v4525_v29 = vsub.f32 %v4431_v19, %v1605_v61  ;;  %v1606_v12 = vmul.f32 2.0, %v1559_v46  ;;  %1688 = vmin.xlane.f32.xlu0 %v1687_v60 }
 0x4c9   : > { %v1561_v7 = vpop.f32.mrf.mxu1 }
 0x4ca   : > { %v1607_v35 = vmul.f32 2.0, %v1561_v7  ;;  %v1690_v39 = vmin.f32 %v4522_v24, %v4525_v29  ;;  %v4530_v1 = vsub.f32 %v4427_v2, %v1606_v12 }
 0x4cb   : > { %v1565_v53 = vpop.f32.mrf.mxu1 }
 0x4cc   : > { %v4533_v27 = vsub.f32 %v4431_v19, %v1607_v35  ;;  %v1608_v55 = vmul.f32 2.0, %v1565_v53  ;;  %1691 = vmin.xlane.f32.xlu0 %v1690_v39 }
 0x4cd   : > { %v1567_v51 = vpop.f32.mrf.mxu1 }
 0x4ce   : > { %v1609_v20 = vmul.f32 2.0, %v1567_v51  ;;  %v1693_v61 = vmin.f32 %v4530_v1, %v4533_v27  ;;  %v4538_v46 = vsub.f32 %v4427_v2, %v1608_v55 }
 0x4cf   : > { %v1571_v60 = vpop.f32.mrf.mxu1 }
 0x4d0   : > { %v4541_v7 = vsub.f32 %v4431_v19, %v1609_v20  ;;  %v1610_v34 = vmul.f32 2.0, %v1571_v60  ;;  %1694 = vmin.xlane.f32.xlu1 %v1693_v61 }
 0x4d1   : > { %v1573_v12 = vpop.f32.mrf.mxu1 }
 0x4d2   : > { %v1611_v28 = vmul.f32 2.0, %v1573_v12  ;;  %v1696_v35 = vmin.f32 %v4538_v46, %v4541_v7  ;;  %v4546_v53 = vsub.f32 %v4427_v2, %v1610_v34 }
 0x4d3   : > { %v1577_v39 = vpop.f32.mrf.mxu1 }
 0x4d4   : > { %v4549_v51 = vsub.f32 %v4431_v19, %v1611_v28  ;;  %v1612_v30 = vmul.f32 2.0, %v1577_v39  ;;  %1697 = vmin.xlane.f32.xlu1 %v1696_v35 }
 0x4d5   : > { %v1579_v55 = vpop.f32.mrf.mxu1 }
 0x4d6   : > { %v1613_v33 = vmul.f32 2.0, %v1579_v55  ;;  %v1699_v20 = vmin.f32 %v4546_v53, %v4549_v51  ;;  %v4554_v61 = vsub.f32 %v4427_v2, %v1612_v30 }
 0x4d8   : > { %v4557_v60 = vsub.f32 %v4431_v19, %v1613_v33  ;;  %1700 = vmin.xlane.f32.xlu0 %v1699_v20 }
 0x4da   : > { %v1702_v34 = vmin.f32 %v4554_v61, %v4557_v60 }
 0x4dc   : > { %1703 = vmin.xlane.f32.xlu1 %v1702_v34 }
 0x529   : > { %v1659_v28 = vpop.xlane.xlu0 %1658 }
 0x52a   : > { %vm1705_vm0 = vcmp.le.f32.partialorder %v4434_v25, %v1659_v28  ;;  %vm1706_vm1 = vcmp.le.f32.partialorder %v4437_v47, %v1659_v28 }
 0x52b   : > { %v1737_v12 = vsel %vm1705_vm0, %v3700_v13, 256  ;;  %v1738_v35 = vsel %vm1706_vm1, %v3703_v16, 256 }
 0x52c   : > { %vm1769_vm2 = vcmp.lt.s32.totalorder %v1737_v12, %v1738_v35 }
 0x52d   : > { %v1662_v30 = vpop.xlane.xlu1 %1661  ;;  %v4565_v2 = vsel %vm1769_vm2, %v1737_v12, %v1738_v35 }
 0x52e   : > { %vm1707_vm3 = vcmp.le.f32.partialorder %v4442_v41, %v1662_v30  ;;  %vm1708_vm4 = vcmp.le.f32.partialorder %v4445_v50, %v1662_v30  ;;  %v1772_v33 = vshra.s32 %v4565_v2, 16 }
 0x52f   : > { %v1739_v19 = vsel %vm1707_vm3, %v3700_v13, 256  ;;  %v1740_v25 = vsel %vm1708_vm4, %v3703_v16, 256 }
 0x530   : > { %vm1785_vm5 = vcmp.lt.s32.totalorder %v1739_v19, %v1740_v25  ;;  %v4572_v47 = vcvt.s32.f32 %v1772_v33 }
 0x531   : > { %v1665_v39 = vpop.xlane.xlu0 %1664  ;;  %v4574_v55 = vsel %vm1785_vm5, %v1739_v19, %v1740_v25 }
 0x532   : > { %vm1709_vm6 = vcmp.le.f32.partialorder %v4450_v37, %v1665_v39  ;;  %vm1710_vm7 = vcmp.le.f32.partialorder %v4453_v45, %v1665_v39  ;;  %1775 = vmin.xlane.f32.xlu0 %v4572_v47  ;;  %v1788_v41 = vshra.s32 %v4574_v55, 16 }
 0x533   : > { %v1741_v50 = vsel %vm1709_vm6, %v3700_v13, 256  ;;  %v1742_v20 = vsel %vm1710_vm7, %v3703_v16, 256 }
 0x534   : > { %vm1801_vm8 = vcmp.lt.s32.totalorder %v1741_v50, %v1742_v20  ;;  %v4582_v34 = vcvt.s32.f32 %v1788_v41 }
 0x535   : > { %v1668_v28 = vpop.xlane.xlu1 %1667  ;;  %v4584_v12 = vsel %vm1801_vm8, %v1741_v50, %v1742_v20 }
 0x536   : > { %vm1711_vm9 = vcmp.le.f32.partialorder %v4458_v40, %v1668_v28  ;;  %vm1712_vm10 = vcmp.le.f32.partialorder %v4461_v52, %v1668_v28  ;;  %1791 = vmin.xlane.f32.xlu1 %v4582_v34  ;;  %v1804_v45 = vshra.s32 %v4584_v12, 16 }
 0x537   : > { %v1743_v37 = vsel %vm1711_vm9, %v3700_v13, 256  ;;  %v1744_v35 = vsel %vm1712_vm10, %v3703_v16, 256 }
 0x538   : > { %vm1817_vm11 = vcmp.lt.s32.totalorder %v1743_v37, %v1744_v35  ;;  %v4592_v30 = vcvt.s32.f32 %v1804_v45 }
 0x539   : > { %v1671_v33 = vpop.xlane.xlu0 %1670  ;;  %v4594_v19 = vsel %vm1817_vm11, %v1743_v37, %v1744_v35 }
 0x53a   : > { %vm1713_vm12 = vcmp.le.f32.partialorder %v4466_v62, %v1671_v33  ;;  %vm1714_vm13 = vcmp.le.f32.partialorder %v4469_v10, %v1671_v33  ;;  %1807 = vmin.xlane.f32.xlu0 %v4592_v30  ;;  %v1820_v40 = vshra.s32 %v4594_v19, 16 }
 0x53b   : > { %v1745_v52 = vsel %vm1713_vm12, %v3700_v13, 256  ;;  %v1746_v25 = vsel %vm1714_vm13, %v3703_v16, 256 }
 0x53c   : > { %vm1833_vm14 = vcmp.lt.s32.totalorder %v1745_v52, %v1746_v25  ;;  %v4602_v39 = vcvt.s32.f32 %v1820_v40 }
 0x53d   : > { %v1674_v41 = vpop.xlane.xlu1 %1673  ;;  %v4604_v50 = vsel %vm1833_vm14, %v1745_v52, %v1746_v25 }
 0x53e   : > { %vm1715_vm15 = vcmp.le.f32.partialorder %v4474_v22, %v1674_v41  ;;  %vm1716_vm0 = vcmp.le.f32.partialorder %v4477_v42, %v1674_v41  ;;  %1823 = vmin.xlane.f32.xlu1 %v4602_v39  ;;  %v1836_v62 = vshra.s32 %v4604_v50, 16 }
 0x53f   : > { %v1747_v10 = vsel %vm1715_vm15, %v3700_v13, 256  ;;  %v1748_v20 = vsel %vm1716_vm0, %v3703_v16, 256 }
 0x540   : > { %vm1849_vm1 = vcmp.lt.s32.totalorder %v1747_v10, %v1748_v20  ;;  %v4612_v28 = vcvt.s32.f32 %v1836_v62 }
 0x541   : > { %v1677_v45 = vpop.xlane.xlu0 %1676  ;;  %v4614_v37 = vsel %vm1849_vm1, %v1747_v10, %v1748_v20 }
 0x542   : > { %vm1717_vm2 = vcmp.le.f32.partialorder %v4482_v8, %v1677_v45  ;;  %vm1718_vm3 = vcmp.le.f32.partialorder %v4485_v15, %v1677_v45  ;;  %1839 = vmin.xlane.f32.xlu0 %v4612_v28  ;;  %v1852_v22 = vshra.s32 %v4614_v37, 16 }
 0x543   : > { %v1749_v42 = vsel %vm1717_vm2, %v3700_v13, 256  ;;  %v1750_v35 = vsel %vm1718_vm3, %v3703_v16, 256 }
 0x544   : > { %vm1865_vm4 = vcmp.lt.s32.totalorder %v1749_v42, %v1750_v35  ;;  %v4622_v33 = vcvt.s32.f32 %v1852_v22 }
 0x545   : > { %v1680_v40 = vpop.xlane.xlu1 %1679  ;;  %v4624_v52 = vsel %vm1865_vm4, %v1749_v42, %v1750_v35 }
 0x546   : > { %vm1719_vm5 = vcmp.le.f32.partialorder %v4490_v59, %v1680_v40  ;;  %vm1720_vm6 = vcmp.le.f32.partialorder %v4493_v9, %v1680_v40  ;;  %1855 = vmin.xlane.f32.xlu1 %v4622_v33  ;;  %v1868_v8 = vshra.s32 %v4624_v52, 16 }
 0x547   : > { %v1751_v15 = vsel %vm1719_vm5, %v3700_v13, 256  ;;  %v1752_v25 = vsel %vm1720_vm6, %v3703_v16, 256 }
 0x548   : > { %vm1881_vm7 = vcmp.lt.s32.totalorder %v1751_v15, %v1752_v25  ;;  %v4632_v41 = vcvt.s32.f32 %v1868_v8 }
 0x549   : > { %v1683_v62 = vpop.xlane.xlu0 %1682  ;;  %v4634_v10 = vsel %vm1881_vm7, %v1751_v15, %v1752_v25 }
 0x54a   : > { %vm1721_vm8 = vcmp.le.f32.partialorder %v4498_v43, %v1683_v62  ;;  %vm1722_vm9 = vcmp.le.f32.partialorder %v4501_v17, %v1683_v62  ;;  %1871 = vmin.xlane.f32.xlu0 %v4632_v41  ;;  %v1884_v59 = vshra.s32 %v4634_v10, 16 }
 0x54b   : > { %v1753_v9 = vsel %vm1721_vm8, %v3700_v13, 256  ;;  %v1754_v20 = vsel %vm1722_vm9, %v3703_v16, 256 }
 0x54c   : > { %vm1897_vm10 = vcmp.lt.s32.totalorder %v1753_v9, %v1754_v20  ;;  %v4642_v45 = vcvt.s32.f32 %v1884_v59 }
 0x54d   : > { %v1686_v22 = vpop.xlane.xlu1 %1685  ;;  %v4644_v42 = vsel %vm1897_vm10, %v1753_v9, %v1754_v20 }
 0x54e   : > { %vm1723_vm11 = vcmp.le.f32.partialorder %v4506_v38, %v1686_v22  ;;  %vm1724_vm12 = vcmp.le.f32.partialorder %v4509_v21, %v1686_v22  ;;  %1887 = vmin.xlane.f32.xlu1 %v4642_v45  ;;  %v1900_v43 = vshra.s32 %v4644_v42, 16 }
 0x54f   : > { %v1755_v17 = vsel %vm1723_vm11, %v3700_v13, 256  ;;  %v1756_v35 = vsel %vm1724_vm12, %v3703_v16, 256 }
 0x550   : > { %vm1913_vm13 = vcmp.lt.s32.totalorder %v1755_v17, %v1756_v35  ;;  %v4652_v40 = vcvt.s32.f32 %v1900_v43 }
 0x551   : > { %v1689_v8 = vpop.xlane.xlu0 %1688  ;;  %v4654_v15 = vsel %vm1913_vm13, %v1755_v17, %v1756_v35 }
 0x552   : > { %vm1725_vm14 = vcmp.le.f32.partialorder %v4514_v31, %v1689_v8  ;;  %vm1726_vm15 = vcmp.le.f32.partialorder %v4517_v5, %v1689_v8  ;;  %1903 = vmin.xlane.f32.xlu0 %v4652_v40  ;;  %v1916_v38 = vshra.s32 %v4654_v15, 16 }
 0x553   : > { %v1757_v21 = vsel %vm1725_vm14, %v3700_v13, 256  ;;  %v1758_v25 = vsel %vm1726_vm15, %v3703_v16, 256 }
 0x554   : > { %vm1929_vm0 = vcmp.lt.s32.totalorder %v1757_v21, %v1758_v25  ;;  %v4662_v62 = vcvt.s32.f32 %v1916_v38 }
 0x555   : > { %v1692_v59 = vpop.xlane.xlu0 %1691  ;;  %v4664_v9 = vsel %vm1929_vm0, %v1757_v21, %v1758_v25 }
 0x556   : > { %vm1727_vm1 = vcmp.le.f32.partialorder %v4522_v24, %v1692_v59  ;;  %vm1728_vm2 = vcmp.le.f32.partialorder %v4525_v29, %v1692_v59  ;;  %1919 = vmin.xlane.f32.xlu1 %v4662_v62  ;;  %v1932_v31 = vshra.s32 %v4664_v9, 16 }
 0x557   : > { %v1759_v5 = vsel %vm1727_vm1, %v3700_v13, 256  ;;  %v1760_v20 = vsel %vm1728_vm2, %v3703_v16, 256 }
 0x558   : > { %vm1945_vm3 = vcmp.lt.s32.totalorder %v1759_v5, %v1760_v20  ;;  %v4672_v22 = vcvt.s32.f32 %v1932_v31 }
 0x559   : > { %v1695_v43 = vpop.xlane.xlu1 %1694  ;;  %v4674_v17 = vsel %vm1945_vm3, %v1759_v5, %v1760_v20 }
 0x55a   : > { %vm1729_vm4 = vcmp.le.f32.partialorder %v4530_v1, %v1695_v43  ;;  %vm1730_vm5 = vcmp.le.f32.partialorder %v4533_v27, %v1695_v43  ;;  %1935 = vmin.xlane.f32.xlu0 %v4672_v22  ;;  %v1948_v24 = vshra.s32 %v4674_v17, 16 }
 0x55b   : > { %v1761_v29 = vsel %vm1729_vm4, %v3700_v13, 256  ;;  %v1762_v35 = vsel %vm1730_vm5, %v3703_v16, 256 }
 0x55c   : > { %vm1961_vm6 = vcmp.lt.s32.totalorder %v1761_v29, %v1762_v35  ;;  %v4682_v8 = vcvt.s32.f32 %v1948_v24 }
 0x55d   : > { %v1698_v38 = vpop.xlane.xlu1 %1697  ;;  %v4684_v21 = vsel %vm1961_vm6, %v1761_v29, %v1762_v35 }
 0x55e   : > { %vm1731_vm7 = vcmp.le.f32.partialorder %v4538_v46, %v1698_v38  ;;  %vm1732_vm8 = vcmp.le.f32.partialorder %v4541_v7, %v1698_v38  ;;  %1951 = vmin.xlane.f32.xlu0 %v4682_v8  ;;  %v1964_v1 = vshra.s32 %v4684_v21, 16 }
 0x55f   : > { %v1763_v27 = vsel %vm1731_vm7, %v3700_v13, 256  ;;  %v1764_v25 = vsel %vm1732_vm8, %v3703_v16, 256 }
 0x560   : > { %vm1977_vm9 = vcmp.lt.s32.totalorder %v1763_v27, %v1764_v25  ;;  %v4692_v59 = vcvt.s32.f32 %v1964_v1 }
 0x561   : > { %v1701_v31 = vpop.xlane.xlu0 %1700  ;;  %v4694_v5 = vsel %vm1977_vm9, %v1763_v27, %v1764_v25 }
 0x562   : > { %vm1733_vm10 = vcmp.le.f32.partialorder %v4546_v53, %v1701_v31  ;;  %vm1734_vm11 = vcmp.le.f32.partialorder %v4549_v51, %v1701_v31  ;;  %1967 = vmin.xlane.f32.xlu1 %v4692_v59  ;;  %v1980_v46 = vshra.s32 %v4694_v5, 16 }
 0x563   : > { %v1765_v7 = vsel %vm1733_vm10, %v3700_v13, 256  ;;  %v1766_v20 = vsel %vm1734_vm11, %v3703_v16, 256 }
 0x564   : > { %vm1993_vm12 = vcmp.lt.s32.totalorder %v1765_v7, %v1766_v20  ;;  %v4702_v43 = vcvt.s32.f32 %v1980_v46  ;;  %v1787_v46 = vand.u32 65535, %v4574_v55 }
 0x565   : > { %v1704_v24 = vpop.xlane.xlu1 %1703  ;;  %v4704_v29 = vsel %vm1993_vm12, %v1765_v7, %v1766_v20 }
 0x566   : > { %vm1735_vm13 = vcmp.le.f32.partialorder %v4554_v61, %v1704_v24  ;;  %vm1736_vm14 = vcmp.le.f32.partialorder %v4557_v60, %v1704_v24  ;;  %1983 = vmin.xlane.f32.xlu1 %v4702_v43  ;;  %v1996_v53 = vshra.s32 %v4704_v29, 16  ;;  %v1771_v60 = vand.u32 65535, %v4565_v2 }
 0x567   : > { %v1767_v51 = vsel %vm1735_vm13, %v3700_v13, 256  ;;  %v1768_v35 = vsel %vm1736_vm14, %v3703_v16, 256  ;;  %v1789_v24 = vcvt.s32.f32 %v1787_v46  ;;  %v308_v46 = vadd.s32 24, %v3559_v49 }
 0x568   : > { %vm2009_vm15 = vcmp.lt.s32.totalorder %v1767_v51, %v1768_v35  ;;  %v4712_v38 = vcvt.s32.f32 %v1996_v53  ;;  %v1773_v31 = vcvt.s32.f32 %v1771_v60  ;;  %v1803_v53 = vand.u32 65535, %v4584_v12 }
 0x569   : > { %v4714_v1 = vsel %vm2009_vm15, %v1767_v51, %v1768_v35  ;;  %v4733_v51 = vstv %s2600_s24  ;;  %v306_v35 = vadd.s32 8, %v3559_v49  ;;  %v307_v60 = vadd.s32 16, %v3559_v49  ;;  %s3355_s24 = smov [#allocation10]  }
 0x56a   : > { %1999 = vmin.xlane.f32.xlu0 %v4712_v38  ;;  %v2012_v61 = vshra.s32 %v4714_v1, 16  ;;  %v322_v12 = vadd.s32 %v4733_v51, %v3559_v49  ;;  %v310_v16 = vadd.s32 40, %v3559_v49  ;;  %s3267_s26 = sshll.u32 %s3355_s24, 4  ;;  %s3268_s26 = int_to_ptr.vmem [resolvable:$false] %s3267_s26 }
 0x56b   : > { %s3269_s9 = scalar_lea.vmem %s3268_s26, 4096  ;;  %p3270_p10 = scmp.lt.s32.totalorder %s5218_s8, %s3268_s26 }
 0x56c   : > { %v4718_v27 = vcvt.s32.f32 %v2012_v61  ;;  %v1819_v61 = vand.u32 65535, %v4594_v19  ;;  %v1835_v19 = vand.u32 65535, %v4604_v50  ;;  %vm338_vm4 = vcmp.lt.s32.totalorder %v322_v12, 200  ;;  %p3271_p3 = scmp.lt.s32.totalorder %s3269_s9, %s3263_s13 }
 0x56d   : > { %v5344_v12 = vmov 0.0  }
 0x56e   : > { %2015 = vmin.xlane.f32.xlu1 %v4718_v27  ;;  %p3272_p7 = por %p3271_p3, %p3270_p10 }
 0x570   : > { %p3273_p12 = pnand %p3272_p7, %p3266_p0 }
 0x5bb   : > { %v4722_v25 = vpop.xlane.xlu0 %1775 }
 0x5bc   : > { %vm1777_vm0 = vcmp.eq.f32.partialorder %v4572_v47, %v4722_v25  ;;  %v1805_v47 = vcvt.s32.f32 %v1803_v53  ;;  %v1821_v53 = vcvt.s32.f32 %v1819_v61  ;;  %v312_v61 = vadd.s32 56, %v3559_v49 }
 0x5bd   : > { %v1778_v7 = vsel %vm1777_vm0, %v1773_v31, inf  ;;  %v323_v31 = vadd.s32 %v4733_v51, %v306_v35  ;;  %v325_v35 = vadd.s32 %v4733_v51, %v308_v46 }
 0x5be   : > { %1779 = vmin.xlane.f32.xlu0 %v1778_v7  ;;  %v309_v7 = vadd.s32 32, %v3559_v49 }
 0x5bf   : > { %v4728_v20 = vpop.xlane.xlu1 %1791  ;;  %vm339_vm5 = vcmp.lt.s32.totalorder %v323_v31, 200  ;;  %vm341_vm8 = vcmp.lt.s32.totalorder %v325_v35, 200  ;;  %v313_v35 = vadd.s32 64, %v3559_v49 }
 0x5c0   : > { %vm1793_vm1 = vcmp.eq.f32.partialorder %v4582_v34, %v4728_v20  ;;  %v4767_v31 = vsel %vm339_vm5, 1.0, %v5344_v12 }
 0x5c1   : > { %v1794_v2 = vsel %vm1793_vm1, %v1789_v24, inf }
 0x5c2   : > { %1795 = vmin.xlane.f32.xlu1 %v1794_v2 }
 0x5c3   : > { %v4736_v55 = vpop.xlane.xlu0 %1807 }
 0x5c4   : > { %5415 = vst [vmem:[#allocation65_spill] sm:$0xff] %v4736_v55  ;;  %vm1809_vm2 = vcmp.eq.f32.partialorder %v4592_v30, %v4736_v55  ;;  %v324_v30 = vadd.s32 %v4733_v51, %v307_v60  ;;  %v1837_v55 = vcvt.s32.f32 %v1835_v19  ;;  %v4764_v60 = vsel %vm338_vm4, 1.0, %v5344_v12 }
 0x5c5   : > { %v1810_v34 = vsel %vm1809_vm2, %v1805_v47, inf  ;;  %v326_v47 = vadd.s32 %v4733_v51, %v309_v7  ;;  %v1265_v7 = vsub.f32 %v4227_v32, %v4232_v48  ;;  %v1867_v12 = vand.u32 65535, %v4624_v52 }
 0x5c6   : > { %1811 = vmin.xlane.f32.xlu0 %v1810_v34  ;;  %v311_v34 = vadd.s32 48, %v3559_v49  ;;  %vm340_vm7 = vcmp.lt.s32.totalorder %v324_v30, 200  ;;  %v5417_v30 = vmov 0.0   ;;  %v1266_v48 = vsub.f32 %v4240_v6, %v4247_v44 }
 0x5c7   : > { %v4747_v24 = vpop.xlane.xlu1 %1823  ;;  %vm342_vm9 = vcmp.lt.s32.totalorder %v326_v47, 200  ;;  %v330_v47 = vadd.s32 %v4733_v51, %v313_v35 }
 0x5c8   : > { %vm1825_vm3 = vcmp.eq.f32.partialorder %v4602_v39, %v4747_v24  ;;  %v1851_v39 = vand.u32 65535, %v4614_v37  ;;  %v328_v37 = vadd.s32 %v4733_v51, %v311_v34  ;;  %v314_v34 = vadd.s32 72, %v3559_v49 }
 0x5c9   : > { %v1826_v2 = vsel %vm1825_vm3, %v1821_v53, inf  ;;  %v327_v53 = vadd.s32 %v4733_v51, %v310_v16  ;;  %v4787_v16 = vsel %vm341_vm8, 1.0, %v5417_v30  ;;  %v1282_v32 = vmul.f32 %v1266_v48, %v1266_v48 }
 0x5ca   : > { %1827 = vmin.xlane.f32.xlu1 %v1826_v2  ;;  %v1853_v2 = vcvt.s32.f32 %v1851_v39  ;;  %v4795_v39 = vsel %vm342_vm9, 1.0, %v5417_v30  ;;  %vm344_vm12 = vcmp.lt.s32.totalorder %v328_v37, 200  ;;  %v1270_v37 = vsub.f32 %v4300_v58, %v4307_v0 }
 0x5cb   : > { %v4758_v50 = vpop.xlane.xlu0 %1839  ;;  %vm343_vm11 = vcmp.lt.s32.totalorder %v327_v53, 200  ;;  %v331_v53 = vadd.s32 %v4733_v51, %v314_v34  ;;  %v1899_v34 = vand.u32 65535, %v4644_v42  ;;  %vm346_vm0 = vcmp.lt.s32.totalorder %v330_v47, 200 }
 0x5cc   : > { %5416 = vst [vmem:[#allocation66_spill] sm:$0xff] %v4758_v50  ;;  %vm1841_vm6 = vcmp.eq.f32.partialorder %v4612_v28, %v4758_v50  ;;  %v329_v28 = vadd.s32 %v4733_v51, %v312_v61  ;;  %v4780_v50 = vsel %vm340_vm7, 1.0, %v5417_v30  ;;  %v1281_v61 = vmul.f32 %v1265_v7, %v1265_v7 }
 0x5cd   : > { %v1842_v46 = vsel %vm1841_vm6, %v1837_v55, inf  ;;  %v1264_v55 = vsub.f32 %v4218_v18, %v4221_v26  ;;  %5418 = vst [vmem:[#allocation67_spill] sm:$0xff] %v4780_v50  ;;  %v1267_v26 = vsub.f32 %v4255_v11, %v4262_v23  ;;  %v1268_v7 = vsub.f32 %v4270_v63, %v4277_v57 }
 0x5ce   : > { %1843 = vmin.xlane.f32.xlu0 %v1842_v46  ;;  %vm345_vm13 = vcmp.lt.s32.totalorder %v329_v28, 200  ;;  %v1883_v46 = vand.u32 65535, %v4634_v10  ;;  %v4805_v23 = vsel %vm343_vm11, 1.0, %v5417_v30  ;;  %v1269_v10 = vsub.f32 %v4285_v14, %v4292_v54 }
 0x5cf   : > { %v4774_v19 = vpop.xlane.xlu1 %1855  ;;  %v1280_v6 = vmul.f32 %v1264_v55, %v1264_v55  ;;  %5419 = vst [vmem:[#allocation68_spill] sm:$0xff] %v4805_v23  ;;  %v315_v55 = vadd.s32 80, %v3559_v49  ;;  %v4815_v57 = vsel %vm344_vm12, 1.0, %v5417_v30  ;;  %v1298_v54 = vmul.f32 %v4780_v50, %v1282_v32 }
 0x5d0   : > { %vm1857_vm10 = vcmp.eq.f32.partialorder %v4622_v33, %v4774_v19  ;;  %v1869_v33 = vcvt.s32.f32 %v1867_v12  ;;  %v1297_v12 = vmul.f32 %v4767_v31, %v1281_v61  ;;  %5420 = vst [vmem:[#allocation69_spill] sm:$0xff] %v4815_v57  ;;  %v1885_v35 = vcvt.s32.f32 %v1883_v46 }
 0x5d1   : > { %v1858_v52 = vsel %vm1857_vm10, %v1853_v2, inf  ;;  %v1296_v61 = vmul.f32 %v4764_v60, %v1280_v6  ;;  %vm347_vm1 = vcmp.lt.s32.totalorder %v331_v53, 200  ;;  %v1285_v46 = vmul.f32 %v1269_v10, %v1269_v10 }
 0x5d2   : > { %1859 = vmin.xlane.f32.xlu1 %v1858_v52  ;;  %v1283_v52 = vmul.f32 %v1267_v26, %v1267_v26  ;;  %v1284_v26 = vmul.f32 %v1268_v7, %v1268_v7  ;;  %v332_v42 = vadd.s32 %v4733_v51, %v315_v55  ;;  %v1271_v32 = vsub.f32 %v4315_v3, %v4322_v56 }
 0x5d3   : > { %v4797_v44 = vpop.xlane.xlu0 %1871  ;;  %v316_v6 = vadd.s32 88, %v3559_v49  ;;  %v1915_v0 = vand.u32 65535, %v4654_v15  ;;  %v4844_v10 = vsel %vm346_vm0, 1.0, %v5417_v30  ;;  %v1272_v56 = vsub.f32 %v4330_v36, %v4337_v4 }
 0x5d4   : > { %vm1873_vm14 = vcmp.eq.f32.partialorder %v4632_v41, %v4797_v44  ;;  %v4819_v41 = vsel %vm345_vm13, 1.0, %v5417_v30  ;;  %v1301_v15 = vmul.f32 %v4805_v23, %v1285_v46  ;;  %vm348_vm3 = vcmp.lt.s32.totalorder %v332_v42, 200 }
 0x5d5   : > { %v1874_v2 = vsel %vm1873_vm14, %v1869_v33, inf  ;;  %5421 = vst [vmem:[#allocation70_spill] sm:$0xff] %v4819_v41  ;;  %v1312_v33 = vadd.f32 %v1297_v12, %v1296_v61  ;;  %v317_v12 = vadd.s32 96, %v3559_v49  ;;  %v4851_v61 = vsel %vm347_vm1, 1.0, %v5417_v30 }
 0x5d6   : > { %1875 = vmin.xlane.f32.xlu0 %v1874_v2  ;;  %v1299_v2 = vmul.f32 %v4787_v16, %v1283_v52  ;;  %v1286_v52 = vmul.f32 %v1270_v37, %v1270_v37  ;;  %v1288_v46 = vmul.f32 %v1272_v56, %v1272_v56  ;;  %v1947_v56 = vand.u32 65535, %v4674_v17 }
 0x5d7   : > { %v4821_v48 = vpop.xlane.xlu1 %1887  ;;  %v1313_v50 = vadd.f32 %v1312_v33, %v1298_v54  ;;  %v1287_v54 = vmul.f32 %v1271_v32, %v1271_v32  ;;  %v1931_v33 = vand.u32 65535, %v4664_v9  ;;  %v5424_v9 = vld [vmem:[#allocation48_spill] sm:$0xff]  ;;  %v320_v17 = vadd.s32 120, %v3559_v49 }
 0x5d8   : > { %vm1889_vm15 = vcmp.eq.f32.partialorder %v4642_v45, %v4821_v48  ;;  %v1901_v45 = vcvt.s32.f32 %v1899_v34  ;;  %v1302_v53 = vmul.f32 %v4815_v57, %v1286_v52  ;;  %v5429_v57 = vld [vmem:[#allocation53_spill] sm:$0xff]  ;;  %vm1369_vm0 = vcmp.eq.s32.totalorder %v3700_v13, 0 }
 0x5d9   : > { %v1890_v28 = vsel %vm1889_vm15, %v1885_v35, inf  ;;  %v1300_v35 = vmul.f32 %v4795_v39, %v1284_v26  ;;  %v1314_v34 = vadd.f32 %v1313_v50, %v1299_v2  ;;  %v5423_v26 = vld [vmem:[#allocation44_spill] sm:$0xff]  ;;  %v333_v50 = vadd.s32 %v4733_v51, %v316_v6 }
 0x5da   : > { %1891 = vmin.xlane.f32.xlu1 %v1890_v28  ;;  %v1917_v28 = vcvt.s32.f32 %v1915_v0  ;;  %v334_v2 = vadd.s32 %v4733_v51, %v317_v12  ;;  %v4866_v0 = vsel %vm348_vm3, 1.0, %v5417_v30  ;;  %v319_v6 = vadd.s32 112, %v3559_v49 }
 0x5db   : > { %v4835_v7 = vpop.xlane.xlu0 %1903  ;;  %v1315_v4 = vadd.f32 %v1314_v34, %v1300_v35  ;;  %v5425_v35 = vld [vmem:[#allocation47_spill] sm:$0xff]  ;;  %v1303_v12 = vmul.f32 %v4819_v41, %v1287_v54  ;;  %v1933_v52 = vcvt.s32.f32 %v1931_v33  ;;  %vm349_vm5 = vcmp.lt.s32.totalorder %v333_v50, 200  ;;  %v5428_v41 = vld [vmem:[#allocation54_spill] sm:$0xff]  ;;  %v5432_v50 = vld [vmem:[#allocation60_spill] sm:$0xff] }
 0x5dc   : > { %vm1905_vm2 = vcmp.eq.f32.partialorder %v4652_v40, %v4835_v7  ;;  %v5422_v40 = vld [vmem:[#allocation45_spill] sm:$0xff]  ;;  %v1274_v34 = vsub.f32 %v5425_v35, %v5424_v9  ;;  %vm350_vm6 = vcmp.lt.s32.totalorder %v334_v2, 200  ;;  %v1276_v33 = vsub.f32 %v5429_v57, %v5428_v41  ;;  %v5431_v41 = vld [vmem:[#allocation56_spill] sm:$0xff] }
 0x5dd   : > { %v1906_v55 = vsel %vm1905_vm2, %v1901_v45, inf  ;;  %v1273_v37 = vsub.f32 %v5423_v26, %v5422_v40  ;;  %v318_v45 = vadd.s32 104, %v3559_v49  ;;  %v336_v23 = vadd.s32 %v4733_v51, %v319_v6 }
 0x5de   : > { %1907 = vmin.xlane.f32.xlu0 %v1906_v55  ;;  %v1316_v55 = vadd.f32 %v1315_v4, %v1301_v15  ;;  %v5426_v15 = vld [vmem:[#allocation51_spill] sm:$0xff]  ;;  %v4899_v6 = vsel %vm350_vm6, 1.0, %v5417_v30  ;;  %vm2355_vm1 = vcmp.eq.s32.totalorder %v3700_v13, 1  ;;  %vm2388_vm2 = vcmask 15360  }
 0x5df   : > { %v4855_v47 = vpop.xlane.xlu1 %1919  ;;  %v335_v54 = vadd.s32 %v4733_v51, %v318_v45  ;;  %vm352_vm10 = vcmp.lt.s32.totalorder %v336_v23, 200 }
 0x5e0   : > { %vm1921_vm4 = vcmp.eq.f32.partialorder %v4662_v62, %v4855_v47  ;;  %v1289_v62 = vmul.f32 %v1273_v37, %v1273_v37  ;;  %v1317_v4 = vadd.f32 %v1316_v55, %v1302_v53  ;;  %v1290_v37 = vmul.f32 %v1274_v34, %v1274_v34  ;;  %v5430_v55 = vld [vmem:[#allocation57_spill] sm:$0xff] }
 0x5e1   : > { %v1922_v32 = vsel %vm1921_vm4, %v1917_v28, inf  ;;  %v5427_v28 = vld [vmem:[#allocation50_spill] sm:$0xff]  ;;  %v1963_v53 = vand.u32 65535, %v4684_v21  ;;  %v1277_v34 = vsub.f32 %v5431_v41, %v5430_v55  ;;  %vm351_vm9 = vcmp.lt.s32.totalorder %v335_v54, 200 }
 0x5e2   : > { %1923 = vmin.xlane.f32.xlu1 %v1922_v32  ;;  %v1275_v42 = vsub.f32 %v5427_v28, %v5426_v15  ;;  %v1304_v32 = vmul.f32 %v4844_v10, %v1288_v46  ;;  %v1318_v15 = vadd.f32 %v1317_v4, %v1303_v12  ;;  %v1305_v28 = vmul.f32 %v4851_v61, %v1289_v62  ;;  %v5435_v55 = vld [vmem:[#allocation62_spill] sm:$0xff] }
 0x5e3   : > { %v4872_v40 = vpop.xlane.xlu0 %1935  ;;  %v4891_v46 = vsel %vm349_vm5, 1.0, %v5417_v30  ;;  %v1306_v21 = vmul.f32 %v4866_v0, %v1290_v37  ;;  %v1292_v62 = vmul.f32 %v1276_v33, %v1276_v33 }
 0x5e4   : > { %vm1937_vm7 = vcmp.eq.f32.partialorder %v4672_v22, %v4872_v40  ;;  %v1949_v22 = vcvt.s32.f32 %v1947_v56  ;;  %v1291_v45 = vmul.f32 %v1275_v42, %v1275_v42  ;;  %v1319_v49 = vadd.f32 %v1318_v15, %v1304_v32 }
 0x5e5   : > { %v1938_v9 = vsel %vm1937_vm7, %v1933_v52, inf  ;;  %v5433_v52 = vld [vmem:[#allocation59_spill] sm:$0xff]  ;;  %v337_v42 = vadd.s32 %v4733_v51, %v320_v17  ;;  %v1979_v32 = vand.u32 65535, %v4694_v5  ;;  %v1293_v15 = vmul.f32 %v1277_v34, %v1277_v34 }
 0x5e6   : > { %1939 = vmin.xlane.f32.xlu0 %v1938_v9  ;;  %v1278_v56 = vsub.f32 %v5433_v52, %v5432_v50  ;;  %v1320_v4 = vadd.f32 %v1319_v49, %v1305_v28  ;;  %v1307_v2 = vmul.f32 %v4891_v46, %v1291_v45  ;;  %v4915_v51 = vsel %vm351_vm9, 1.0, %v5417_v30 }
 0x5e7   : > { %v4886_v35 = vpop.xlane.xlu0 %1951  ;;  %v1308_v17 = vmul.f32 %v4899_v6, %v1292_v62  ;;  %vm353_vm12 = vcmp.lt.s32.totalorder %v337_v42, 200  ;;  %v1981_v23 = vcvt.s32.f32 %v1979_v32  ;;  %v1995_v45 = vand.u32 65535, %v4704_v29 }
 0x5e8   : > { %vm1953_vm8 = vcmp.eq.f32.partialorder %v4682_v8, %v4886_v35  ;;  %v1965_v8 = vcvt.s32.f32 %v1963_v53  ;;  %v1321_v28 = vadd.f32 %v1320_v4, %v1306_v21  ;;  %v1294_v53 = vmul.f32 %v1278_v56, %v1278_v56 }
 0x5e9   : > { %v1954_v12 = vsel %vm1953_vm8, %v1949_v22, inf  ;;  %v5434_v22 = vld [vmem:[#allocation63_spill] sm:$0xff]  ;;  %v4922_v34 = vsel %vm352_vm10, 1.0, %v5417_v30  ;;  %v1309_v54 = vmul.f32 %v4915_v51, %v1293_v15  ;;  %v4928_v21 = vsel %vm353_vm12, 1.0, %v5417_v30 }
 0x5ea   : > { %1955 = vmin.xlane.f32.xlu0 %v1954_v12  ;;  %v1279_v37 = vsub.f32 %v5435_v55, %v5434_v22  ;;  %v1322_v49 = vadd.f32 %v1321_v28, %v1307_v2  ;;  %v1310_v62 = vmul.f32 %v4922_v34, %v1294_v53  ;;  %v1997_v29 = vcvt.s32.f32 %v1995_v45  ;;  %v5437_v53 = vld [vmem:[#allocation65_spill] sm:$0xff] }
 0x5eb   : > { %v4905_v9 = vpop.xlane.xlu1 %1967  ;;  %v2011_v42 = vand.u32 65535, %v4714_v1  ;;  %v1798_v1 = vcvt.f32.s32 %v4728_v20 }
 0x5ec   : > { %vm1969_vm11 = vcmp.eq.f32.partialorder %v4692_v59, %v4905_v9  ;;  %v1295_v59 = vmul.f32 %v1279_v37, %v1279_v37  ;;  %v1323_v50 = vadd.f32 %v1322_v49, %v1308_v17  ;;  %v5436_v17 = vld [vmem:[#allocation17_spill] sm:$0xff]  ;;  %v5438_v49 = vld [vmem:[#allocation16_spill] sm:$0xff] }
 0x5ed   : > { %v1970_v33 = vsel %vm1969_vm11, %v1965_v8, inf  ;;  %v2013_v2 = vcvt.s32.f32 %v2011_v42  ;;  %v1799_v20 = vshll.u32 %v1798_v1, 16 }
 0x5ee   : > { %1971 = vmin.xlane.f32.xlu1 %v1970_v33  ;;  %v1324_v4 = vadd.f32 %v1323_v50, %v1309_v54  ;;  %v5440_v50 = vld [vmem:[#allocation18_spill] sm:$0xff] }
 0x5ef   : > { %v4918_v5 = vpop.xlane.xlu1 %1983 }
 0x5f0   : > { %vm1985_vm13 = vcmp.eq.f32.partialorder %v4702_v43, %v4918_v5  ;;  %v1311_v43 = vmul.f32 %v4928_v21, %v1295_v59  ;;  %v1325_v30 = vadd.f32 %v1324_v4, %v1310_v62 }
 0x5f1   : > { %v1986_v12 = vsel %vm1985_vm13, %v1981_v23, inf  ;;  %v1814_v23 = vcvt.f32.s32 %v5437_v53  ;;  %v1862_v53 = vcvt.f32.s32 %v4774_v19 }
 0x5f2   : > { %1987 = vmin.xlane.f32.xlu1 %v1986_v12  ;;  %v1326_v15 = vadd.f32 %v1325_v30, %v1311_v43  ;;  %v5439_v12 = vmov 1.0   ;;  %v1830_v43 = vcvt.f32.s32 %v4747_v24 }
 0x5f3   : > { %v4931_v56 = vpop.xlane.xlu0 %1999  ;;  %v1815_v42 = vshll.u32 %v1814_v23, 16 }
 0x5f4   : > { %vm2001_vm14 = vcmp.eq.f32.partialorder %v4712_v38, %v4931_v56  ;;  %v1782_v38 = vcvt.f32.s32 %v4722_v25  ;;  %v1370_v25 = vsel %vm1369_vm0, %v5436_v17, 0  ;;  %v5443_v17 = vld [vmem:[#allocation20_spill] sm:$0xff] }
 0x5f5   : > { %v2002_v8 = vsel %vm2001_vm14, %v1997_v29, inf  ;;  %v1371_v29 = vsel %vm1369_vm0, %v5440_v50, 0  ;;  %v1863_v50 = vshll.u32 %v1862_v53, 16  ;;  %v5447_v53 = vld [vmem:[#allocation24_spill] sm:$0xff] }
 0x5f6   : > { %2003 = vmin.xlane.f32.xlu0 %v2002_v8  ;;  %v1783_v33 = vshll.u32 %v1782_v38, 16  ;;  %v5442_v38 = vld [vmem:[#allocation66_spill] sm:$0xff] }
 0x5f7   : > { %v4937_v32 = vpop.xlane.xlu1 %2015  ;;  %v1846_v1 = vcvt.f32.s32 %v5442_v38 }
 0x5f8   : > { %vm2017_vm15 = vcmp.eq.f32.partialorder %v4718_v27, %v4937_v32 }
 0x5f9   : > { %v2018_v22 = vsel %vm2017_vm15, %v2013_v2, inf }
 0x5fa   : > { %2019 = vmin.xlane.f32.xlu1 %v2018_v22  ;;  %1327 = vadd.xlane.f32.xlu0 %v1326_v15  ;;  %v5441_v15 = vld [vmem:[#allocation19_spill] sm:$0xff]  ;;  %v1831_v22 = vshll.u32 %v1830_v43, 16 }
 0x5fb   : > { %v1372_v24 = vsel %vm1369_vm0, %v5441_v15, 0  ;;  %v1894_v15 = vcvt.f32.s32 %v4821_v48 }
 0x647   : > { %v1780_v37 = vpop.xlane.xlu0 %1779 }
 0x648   : > { %v1781_v28 = vcvt.f32.s32 %v1780_v37 }
 0x64a   : > { %v1784_v27 = vadd.s32 %v1783_v33, %v1781_v28 }
 0x64b   : > { %v1796_v45 = vpop.xlane.xlu1 %1795 }
 0x64c   : > { %vm2025_vm3 = vcmp.eq.s32.totalorder %v3700_v13, %v1784_v27  ;;  %v2356_v59 = vsel %vm2355_vm1, %v1784_v27, %v1370_v25  ;;  %v1797_v54 = vcvt.f32.s32 %v1796_v45  ;;  %vm2026_vm4 = vcmp.eq.s32.totalorder %v5438_v49, %v1784_v27 }
 0x64d   : > { %2389 = vst.msk [vmem:[%s4949_s14] sm:$0xff] %vm2388_vm2, %v2356_v59  ;;  %2713 = vmatprep.mubr.msk.f32.mxu0 %vm2026_vm4, %v5439_v12  ;;  %v1373_v25 = vsel %vm1369_vm0, %v5443_v17, 0 }
 0x64e   : > { %v1800_v62 = vadd.s32 %v1799_v20, %v1797_v54  ;;  %2714 = vmatmul.mubr.msk.f32.vlgmr.msra.gmra.mxu0 %vm2025_vm3, %v5439_v12  ;;  %v1847_v20 = vshll.u32 %v1846_v1, 16 }
 0x64f   : > { %v1812_v4 = vpop.xlane.xlu0 %1811 }
 0x650   : > { %v2357_v8 = vsel %vm2355_vm1, %v1800_v62, %v1371_v29  ;;  %v1813_v30 = vcvt.f32.s32 %v1812_v4  ;;  %vm2028_vm5 = vcmp.eq.s32.totalorder %v5438_v49, %v1800_v62  ;;  %vm2027_vm6 = vcmp.eq.s32.totalorder %v3700_v13, %v1800_v62  ;;  %v5444_v62 = vld [vmem:[#allocation21_spill] sm:$0xff] }
 0x651   : > { %2390 = vst.msk [vmem:[%s4949_s14 + $0x8] sm:$0xff] %vm2388_vm2, %v2357_v8  ;;  %2715 = vmatprep.mubr.msk.f32.mxu0 %vm2028_vm5, %v5439_v12  ;;  %v1374_v19 = vsel %vm1369_vm0, %v5444_v62, 0  ;;  %v1878_v29 = vcvt.f32.s32 %v4797_v44 }
 0x652   : > { %v1816_v2 = vadd.s32 %v1815_v42, %v1813_v30  ;;  %2716 = vmatmul.mubr.msk.f32.gmra.mxu0 %vm2027_vm6, %v5439_v12  ;;  %v5445_v30 = vld [vmem:[#allocation22_spill] sm:$0xff] }
 0x653   : > { %v1828_v37 = vpop.xlane.xlu1 %1827  ;;  %v1375_v44 = vsel %vm1369_vm0, %v5445_v30, 0 }
 0x654   : > { %v2358_v33 = vsel %vm2355_vm1, %v1816_v2, %v1372_v24  ;;  %v1829_v28 = vcvt.f32.s32 %v1828_v37  ;;  %vm2030_vm7 = vcmp.eq.s32.totalorder %v5438_v49, %v1816_v2  ;;  %vm2029_vm8 = vcmp.eq.s32.totalorder %v3700_v13, %v1816_v2  ;;  %v5446_v37 = vld [vmem:[#allocation23_spill] sm:$0xff] }
 0x655   : > { %2391 = vst.msk [vmem:[%s4949_s14 + $0x10] sm:$0xff] %vm2388_vm2, %v2358_v33  ;;  %2717 = vmatprep.mubr.msk.f32.mxu0 %vm2030_vm7, %v5439_v12  ;;  %v1879_v2 = vshll.u32 %v1878_v29, 16  ;;  %v1376_v48 = vsel %vm1369_vm0, %v5446_v37, 0  ;;  %v1895_v33 = vshll.u32 %v1894_v15, 16  ;;  %v1958_v15 = vcvt.f32.s32 %v4886_v35  ;;  %v5450_v37 = vld [vmem:[#allocation27_spill] sm:$0xff] }
 0x656   : > { %v1832_v27 = vadd.s32 %v1831_v22, %v1829_v28  ;;  %2718 = vmatmul.mubr.msk.f32.gmra.mxu0 %vm2029_vm8, %v5439_v12  ;;  %v1910_v28 = vcvt.f32.s32 %v4835_v7  ;;  %v1377_v7 = vsel %vm1369_vm0, %v5447_v53, 0  ;;  %v1380_v35 = vsel %vm1369_vm0, %v5450_v37, 0 }
 0x657   : > { %v1844_v23 = vpop.xlane.xlu0 %1843 }
 0x658   : > { %v2359_v45 = vsel %vm2355_vm1, %v1832_v27, %v1373_v25  ;;  %v1845_v59 = vcvt.f32.s32 %v1844_v23  ;;  %vm2032_vm9 = vcmp.eq.s32.totalorder %v5438_v49, %v1832_v27  ;;  %vm2031_vm10 = vcmp.eq.s32.totalorder %v3700_v13, %v1832_v27 }
 0x659   : > { %2392 = vst.msk [vmem:[%s4949_s14 + $0x18] sm:$0xff] %vm2388_vm2, %v2359_v45  ;;  %2719 = vmatprep.mubr.msk.f32.mxu0 %vm2032_vm9, %v5439_v12  ;;  %v1911_v23 = vshll.u32 %v1910_v28, 16  ;;  %v1926_v45 = vcvt.f32.s32 %v4855_v47 }
 0x65a   : > { %v1848_v54 = vadd.s32 %v1847_v20, %v1845_v59  ;;  %2720 = vmatmul.mubr.msk.f32.gmra.mxu0 %vm2031_vm10, %v5439_v12 }
 0x65b   : > { %v1860_v42 = vpop.xlane.xlu1 %1859  ;;  %v1927_v29 = vshll.u32 %v1926_v45, 16 }
 0x65c   : > { %v2360_v43 = vsel %vm2355_vm1, %v1848_v54, %v1374_v19  ;;  %v1861_v4 = vcvt.f32.s32 %v1860_v42  ;;  %vm2034_vm11 = vcmp.eq.s32.totalorder %v5438_v49, %v1848_v54  ;;  %vm2033_vm12 = vcmp.eq.s32.totalorder %v3700_v13, %v1848_v54 }
 0x65d   : > { %2393 = vst.msk [vmem:[%s4949_s14 + $0x20] sm:$0xff] %vm2388_vm2, %v2360_v43  ;;  %2721 = vmatprep.mubr.msk.f32.mxu0 %vm2034_vm11, %v5439_v12  ;;  %v1942_v42 = vcvt.f32.s32 %v4872_v40 }
 0x65e   : > { %v1864_v8 = vadd.s32 %v1863_v50, %v1861_v4  ;;  %2722 = vmatmul.mubr.msk.f32.gmra.mxu0 %vm2033_vm12, %v5439_v12  ;;  %v5448_v50 = vld [vmem:[#allocation25_spill] sm:$0xff] }
 0x65f   : > { %v1876_v24 = vpop.xlane.xlu0 %1875  ;;  %v1378_v47 = vsel %vm1369_vm0, %v5448_v50, 0  ;;  %v2006_v50 = vcvt.f32.s32 %v4931_v56 }
 0x660   : > { %v2361_v22 = vsel %vm2355_vm1, %v1864_v8, %v1375_v44  ;;  %v1877_v38 = vcvt.f32.s32 %v1876_v24  ;;  %vm2036_vm13 = vcmp.eq.s32.totalorder %v5438_v49, %v1864_v8  ;;  %vm2035_vm14 = vcmp.eq.s32.totalorder %v3700_v13, %v1864_v8  ;;  %v5449_v44 = vld [vmem:[#allocation26_spill] sm:$0xff] }
 0x661   : > { %2394 = vst.msk [vmem:[%s4949_s14 + $0x28] sm:$0xff] %vm2388_vm2, %v2361_v22  ;;  %2723 = vmatprep.mubr.msk.f32.mxu0 %vm2036_vm13, %v5439_v12  ;;  %v1379_v40 = vsel %vm1369_vm0, %v5449_v44, 0 }
 0x662   : > { %v1880_v1 = vadd.s32 %v1879_v2, %v1877_v38  ;;  %2724 = vmatmul.mubr.msk.f32.gmra.mxu0 %vm2035_vm14, %v5439_v12  ;;  %v1943_v2 = vshll.u32 %v1942_v42, 16 }
 0x663   : > { %v1892_v27 = vpop.xlane.xlu1 %1891 }
 0x664   : > { %v2362_v17 = vsel %vm2355_vm1, %v1880_v1, %v1376_v48  ;;  %v1893_v25 = vcvt.f32.s32 %v1892_v27  ;;  %vm2038_vm15 = vcmp.eq.s32.totalorder %v5438_v49, %v1880_v1  ;;  %vm2037_vm3 = vcmp.eq.s32.totalorder %v3700_v13, %v1880_v1 }
 0x665   : > { %2395 = vst.msk [vmem:[%s4949_s14 + $0x30] sm:$0xff] %vm2388_vm2, %v2362_v17  ;;  %2725 = vmatprep.mubr.msk.f32.mxu0 %vm2038_vm15, %v5439_v12  ;;  %v1959_v48 = vshll.u32 %v1958_v15, 16 }
 0x666   : > { %v1896_v20 = vadd.s32 %v1895_v33, %v1893_v25  ;;  %2726 = vmatmul.mubr.msk.f32.gmra.mxu0 %vm2037_vm3, %v5439_v12  ;;  %v1974_v33 = vcvt.f32.s32 %v4905_v9 }
 0x667   : > { %v1908_v59 = vpop.xlane.xlu0 %1907 }
 0x668   : > { %v2363_v54 = vsel %vm2355_vm1, %v1896_v20, %v1377_v7  ;;  %v1909_v62 = vcvt.f32.s32 %v1908_v59  ;;  %vm2040_vm4 = vcmp.eq.s32.totalorder %v5438_v49, %v1896_v20  ;;  %vm2039_vm5 = vcmp.eq.s32.totalorder %v3700_v13, %v1896_v20  ;;  %v5451_v20 = vld [vmem:[#allocation28_spill] sm:$0xff] }
 0x669   : > { %2396 = vst.msk [vmem:[%s4949_s14 + $0x38] sm:$0xff] %vm2388_vm2, %v2363_v54  ;;  %2727 = vmatprep.mubr.msk.f32.mxu0 %vm2040_vm4, %v5439_v12  ;;  %v1381_v9 = vsel %vm1369_vm0, %v5451_v20, 0  ;;  %v1975_v53 = vshll.u32 %v1974_v33, 16  ;;  %v1990_v7 = vcvt.f32.s32 %v4918_v5 }
 0x66a   : > { %v1912_v19 = vadd.s32 %v1911_v23, %v1909_v62  ;;  %2728 = vmatmul.mubr.msk.f32.gmra.mxu0 %vm2039_vm5, %v5439_v12  ;;  %v5452_v62 = vld [vmem:[#allocation29_spill] sm:$0xff] }
 0x66b   : > { %v1924_v43 = vpop.xlane.xlu1 %1923  ;;  %v1382_v5 = vsel %vm1369_vm0, %v5452_v62, 0 }
 0x66c   : > { %v2364_v4 = vsel %vm2355_vm1, %v1912_v19, %v1378_v47  ;;  %v1925_v8 = vcvt.f32.s32 %v1924_v43  ;;  %vm2042_vm6 = vcmp.eq.s32.totalorder %v5438_v49, %v1912_v19  ;;  %vm2041_vm7 = vcmp.eq.s32.totalorder %v3700_v13, %v1912_v19 }
 0x66d   : > { %2397 = vst.msk [vmem:[%s4949_s14 + $0x40] sm:$0xff] %vm2388_vm2, %v2364_v4  ;;  %2729 = vmatprep.mubr.msk.f32.mxu0 %vm2042_vm6, %v5439_v12  ;;  %v1991_v19 = vshll.u32 %v1990_v7, 16  ;;  %v5453_v4 = vld [vmem:[#allocation30_spill] sm:$0xff] }
 0x66e   : > { %v1928_v30 = vadd.s32 %v1927_v29, %v1925_v8  ;;  %2730 = vmatmul.mubr.msk.f32.gmra.mxu0 %vm2041_vm7, %v5439_v12  ;;  %v1383_v56 = vsel %vm1369_vm0, %v5453_v4, 0  ;;  %v2007_v8 = vshll.u32 %v2006_v50, 16 }
 0x66f   : > { %v1940_v24 = vpop.xlane.xlu0 %1939 }
 0x670   : > { %v2365_v22 = vsel %vm2355_vm1, %v1928_v30, %v1379_v40  ;;  %v1941_v38 = vcvt.f32.s32 %v1940_v24  ;;  %vm2044_vm8 = vcmp.eq.s32.totalorder %v5438_v49, %v1928_v30  ;;  %vm2043_vm9 = vcmp.eq.s32.totalorder %v3700_v13, %v1928_v30  ;;  %v5454_v24 = vld [vmem:[#allocation31_spill] sm:$0xff] }
 0x671   : > { %2398 = vst.msk [vmem:[%s4949_s14 + $0x48] sm:$0xff] %vm2388_vm2, %v2365_v22  ;;  %2731 = vmatprep.mubr.msk.f32.mxu0 %vm2044_vm8, %v5439_v12  ;;  %v2022_v30 = vcvt.f32.s32 %v4937_v32  ;;  %v1384_v32 = vsel %vm1369_vm0, %v5454_v24, 0 }
 0x672   : > { %v1944_v1 = vadd.s32 %v1943_v2, %v1941_v38  ;;  %2732 = vmatmul.mubr.msk.f32.gmra.mxu0 %vm2043_vm9, %v5439_v12 }
 0x673   : > { %v1956_v28 = vpop.xlane.xlu0 %1955  ;;  %v2023_v22 = vshll.u32 %v2022_v30, 16 }
 0x674   : > { %v2366_v27 = vsel %vm2355_vm1, %v1944_v1, %v1380_v35  ;;  %v1957_v17 = vcvt.f32.s32 %v1956_v28  ;;  %vm2046_vm10 = vcmp.eq.s32.totalorder %v5438_v49, %v1944_v1  ;;  %vm2045_vm11 = vcmp.eq.s32.totalorder %v3700_v13, %v1944_v1 }
 0x675   : > { %2399 = vst.msk [vmem:[%s4949_s14 + $0x50] sm:$0xff] %vm2388_vm2, %v2366_v27  ;;  %2733 = vmatprep.mubr.msk.f32.mxu0 %vm2046_vm10, %v5439_v12  ;;  %v5455_v27 = vld [vmem:[#allocation32_spill] sm:$0xff] }
 0x676   : > { %v1960_v25 = vadd.s32 %v1959_v48, %v1957_v17  ;;  %2734 = vmatmul.mubr.msk.f32.gmra.mxu0 %vm2045_vm11, %v5439_v12  ;;  %v1385_v17 = vsel %vm1369_vm0, %v5455_v27, 0  ;;  %v5459_v27 = vld [vmem:[#allocation33_spill] sm:$0xff] }
 0x677   : > { %v1972_v23 = vpop.xlane.xlu1 %1971 }
 0x678   : > { %v2367_v45 = vsel %vm2355_vm1, %v1960_v25, %v1381_v9  ;;  %v1973_v59 = vcvt.f32.s32 %v1972_v23  ;;  %vm2048_vm12 = vcmp.eq.s32.totalorder %v5438_v49, %v1960_v25  ;;  %vm2047_vm13 = vcmp.eq.s32.totalorder %v3700_v13, %v1960_v25 }
 0x679   : > { %2400 = vst.msk [vmem:[%s4949_s14 + $0x58] sm:$0xff] %vm2388_vm2, %v2367_v45  ;;  %2735 = vmatprep.mubr.msk.f32.mxu0 %vm2048_vm12, %v5439_v12 }
 0x67a   : > { %v1976_v54 = vadd.s32 %v1975_v53, %v1973_v59  ;;  %2736 = vmatmul.mubr.msk.f32.gmra.mxu0 %vm2047_vm13, %v5439_v12 }
 0x67b   : > { %v1988_v47 = vpop.xlane.xlu1 %1987 }
 0x67c   : > { %vm2049_vm14 = vcmp.eq.s32.totalorder %v3700_v13, %v1976_v54  ;;  %v2368_v29 = vsel %vm2355_vm1, %v1976_v54, %v1382_v5  ;;  %v1989_v42 = vcvt.f32.s32 %v1988_v47  ;;  %vm2050_vm15 = vcmp.eq.s32.totalorder %v5438_v49, %v1976_v54 }
 0x67d   : > { %2401 = vst.msk [vmem:[%s4949_s14 + $0x60] sm:$0xff] %vm2388_vm2, %v2368_v29  ;;  %2737 = vmatprep.mubr.msk.f32.mxu1 %vm2050_vm15, %v5439_v12 }
 0x67e   : > { %v1992_v43 = vadd.s32 %v1991_v19, %v1989_v42  ;;  %2738 = vmatmul.mubr.msk.f32.vlgmr.msra.gmra.mxu1 %vm2049_vm14, %v5439_v12  ;;  %v5457_v42 = vld [vmem:[#allocation36_spill] sm:$0xff] }
 0x67f   : > { %v2004_v44 = vpop.xlane.xlu0 %2003 }
 0x680   : > { %v2369_v40 = vsel %vm2355_vm1, %v1992_v43, %v1383_v56  ;;  %v2005_v2 = vcvt.f32.s32 %v2004_v44  ;;  %vm2052_vm3 = vcmp.eq.s32.totalorder %v5438_v49, %v1992_v43  ;;  %vm2051_vm4 = vcmp.eq.s32.totalorder %v3700_v13, %v1992_v43 }
 0x681   : > { %2402 = vst.msk [vmem:[%s4949_s14 + $0x68] sm:$0xff] %vm2388_vm2, %v2369_v40  ;;  %2739 = vmatprep.mubr.msk.f32.mxu1 %vm2052_vm3, %v5439_v12 }
 0x682   : > { %v2008_v15 = vadd.s32 %v2007_v8, %v2005_v2  ;;  %2740 = vmatmul.mubr.msk.f32.gmra.mxu1 %vm2051_vm4, %v5439_v12 }
 0x683   : > { %v2020_v38 = vpop.xlane.xlu1 %2019  ;;  %v1328_v1 = vpop.xlane.xlu0 %1327 }
 0x684   : > { %v2370_v37 = vsel %vm2355_vm1, %v2008_v15, %v1384_v32  ;;  %v2021_v35 = vcvt.f32.s32 %v2020_v38  ;;  %v1329_v48 = vrot.slane %v1328_v1, 4  ;;  %vm2054_vm5 = vcmp.eq.s32.totalorder %v5438_v49, %v2008_v15 }
 0x685   : > { %2403 = vst.msk [vmem:[%s4949_s14 + $0x70] sm:$0xff] %vm2388_vm2, %v2370_v37  ;;  %2741 = vmatprep.mubr.msk.f32.mxu1 %vm2054_vm5, %v5439_v12  ;;  %vm2053_vm6 = vcmp.eq.s32.totalorder %v3700_v13, %v2008_v15 }
 0x686   : > { %v2024_v33 = vadd.s32 %v2023_v22, %v2021_v35  ;;  %v1330_v28 = vadd.f32 %v1329_v48, %v1328_v1  ;;  %2742 = vmatmul.mubr.msk.f32.gmra.mxu1 %vm2053_vm6, %v5439_v12  ;;  %v5458_v35 = vld [vmem:[#allocation35_spill] sm:$0xff] }
 0x688   : > { %v2371_v25 = vsel %vm2355_vm1, %v2024_v33, %v1385_v17  ;;  %v1331_v20 = vrot.slane %v1330_v28, 2  ;;  %vm2056_vm7 = vcmp.eq.s32.totalorder %v5438_v49, %v2024_v33  ;;  %vm2055_vm8 = vcmp.eq.s32.totalorder %v3700_v13, %v2024_v33  ;;  %v5460_v17 = vld [vmem:[#allocation37_spill] sm:$0xff] }
 0x689   : > { %2404 = vst.msk [vmem:[%s4949_s14 + $0x78] sm:$0xff] %vm2388_vm2, %v2371_v25  ;;  %2743 = vmatprep.mubr.msk.f32.mxu1 %vm2056_vm7, %v5439_v12 }
 0x68a   : > { %2744 = vmatmul.mubr.msk.f32.gmra.mxu1 %vm2055_vm8, %v5439_v12  ;;  %v1332_v9 = vadd.f32 %v1331_v20, %v1330_v28  ;;  %v5456_v12 = vld [vmem:[#allocation34_spill] sm:$0xff] }
 0x68c   : > { %v1333_v53 = vrot.slane %v1332_v9, 1 }
 0x68e   : > { %v1334_v7 = vadd.f32 %v1333_v53, %v1332_v9  ;;  %v5461_v53 = vld [vmem:[#allocation38_spill] sm:$0xff] }
 0x690   : > { %3076 = vpush %v1334_v7 }
 0x70e   : > { %v2996_v23 = vpop.f32.mrf.mxu0 }
 0x710   : > { %v2997_v45 = vpop.f32.mrf.mxu0 }
 0x711   : > { %v2998_v59 = vadd.f32 %v2997_v45, %v2996_v23 }
 0x712   : > { %v2999_v54 = vpop.f32.mrf.mxu0 }
 0x713   : > { %v2339_v62 = vadd.f32 %v2998_v59, %v4218_v18 }
 0x714   : > { %v3000_v5 = vpop.f32.mrf.mxu0 }
 0x715   : > { %2372 = vst [vmem:[%s5144_s6] sm:$0xff] %v2339_v62  ;;  %v3001_v13 = vadd.f32 %v3000_v5, %v2999_v54  ;;  %v5462_v62 = vld [vmem:[#allocation39_spill] sm:$0xff] }
 0x716   : > { %v3002_v49 = vpop.f32.mrf.mxu0 }
 0x717   : > { %v2340_v19 = vadd.f32 %v3001_v13, %v5456_v12  ;;  %v2267_v48 = vsub.f32 %v3001_v13, %v5458_v35 }
 0x718   : > { %v3003_v50 = vpop.f32.mrf.mxu0 }
 0x719   : > { %2373 = vst [vmem:[%s5144_s6 + $0x8] sm:$0xff] %v2340_v19  ;;  %v3004_v47 = vadd.f32 %v3003_v50, %v3002_v49  ;;  %v2283_v9 = vmul.f32 %v2267_v48, %v2267_v48  ;;  %v5463_v19 = vld [vmem:[#allocation40_spill] sm:$0xff] }
 0x71a   : > { %v3005_v29 = vpop.f32.mrf.mxu0  ;;  %v5469_v48 = vld [vmem:[#allocation68_spill] sm:$0xff] }
 0x71b   : > { %v2341_v18 = vadd.f32 %v3004_v47, %v5457_v42  ;;  %v2268_v25 = vsub.f32 %v3004_v47, %v5460_v17  ;;  %v5464_v42 = vld [vmem:[#allocation67_spill] sm:$0xff] }
 0x71c   : > { %v3006_v43 = vpop.f32.mrf.mxu0 }
 0x71d   : > { %2374 = vst [vmem:[%s5144_s6 + $0x10] sm:$0xff] %v2341_v18  ;;  %v3007_v4 = vadd.f32 %v3006_v43, %v3005_v29  ;;  %v2284_v54 = vmul.f32 %v2268_v25, %v2268_v25 }
 0x71e   : > { %v3008_v56 = vpop.f32.mrf.mxu0 }
 0x71f   : > { %v2342_v8 = vadd.f32 %v3007_v4, %v4255_v11  ;;  %v2269_v7 = vsub.f32 %v3007_v4, %v5461_v53  ;;  %v2300_v18 = vmul.f32 %v5464_v42, %v2284_v54  ;;  %v5465_v4 = vld [vmem:[#allocation41_spill] sm:$0xff]  ;;  %v5474_v54 = vld [vmem:[#allocation70_spill] sm:$0xff] }
 0x720   : > { %v3009_v30 = vpop.f32.mrf.mxu0  ;;  %v5472_v53 = vld [vmem:[#allocation49_spill] sm:$0xff] }
 0x721   : > { %2375 = vst [vmem:[%s5144_s6 + $0x18] sm:$0xff] %v2342_v8  ;;  %v3010_v44 = vadd.f32 %v3009_v30, %v3008_v56  ;;  %v2285_v12 = vmul.f32 %v2269_v7, %v2269_v7 }
 0x722   : > { %v3011_v40 = vpop.f32.mrf.mxu0 }
 0x723   : > { %v2343_v2 = vadd.f32 %v3010_v44, %v4270_v63  ;;  %v2266_v63 = vsub.f32 %v2998_v59, %v5459_v27  ;;  %v2270_v5 = vsub.f32 %v3010_v44, %v5462_v62  ;;  %v2299_v59 = vmul.f32 %v4767_v31, %v2283_v9 }
 0x724   : > { %v3012_v15 = vpop.f32.mrf.mxu0  ;;  %v2301_v31 = vmul.f32 %v4787_v16, %v2285_v12 }
 0x725   : > { %2376 = vst [vmem:[%s5144_s6 + $0x20] sm:$0xff] %v2343_v2  ;;  %v3013_v24 = vadd.f32 %v3012_v15, %v3011_v40  ;;  %v2286_v43 = vmul.f32 %v2270_v5, %v2270_v5  ;;  %v5466_v40 = vld [vmem:[#allocation42_spill] sm:$0xff] }
 0x726   : > { %v3014_v32 = vpop.f32.mrf.mxu0 }
 0x727   : > { %v2344_v22 = vadd.f32 %v3013_v24, %v4285_v14  ;;  %v2271_v50 = vsub.f32 %v3013_v24, %v5463_v19 }
 0x728   : > { %v3015_v38 = vpop.f32.mrf.mxu0 }
 0x729   : > { %2377 = vst [vmem:[%s5144_s6 + $0x28] sm:$0xff] %v2344_v22  ;;  %v3016_v1 = vadd.f32 %v3015_v38, %v3014_v32  ;;  %v2287_v44 = vmul.f32 %v2271_v50, %v2271_v50  ;;  %v5467_v38 = vld [vmem:[#allocation43_spill] sm:$0xff] }
 0x72a   : > { %v3017_v37 = vpop.f32.mrf.mxu0 }
 0x72b   : > { %v2345_v11 = vadd.f32 %v3016_v1, %v4300_v58  ;;  %v2282_v58 = vmul.f32 %v2266_v63, %v2266_v63  ;;  %v2272_v56 = vsub.f32 %v3016_v1, %v5465_v4  ;;  %v5470_v63 = vld [vmem:[#allocation46_spill] sm:$0xff] }
 0x72c   : > { %v3018_v33 = vpop.f32.mrf.mxu0 }
 0x72d   : > { %2378 = vst [vmem:[%s5144_s6 + $0x30] sm:$0xff] %v2345_v11  ;;  %v3019_v28 = vadd.f32 %v3018_v33, %v3017_v37  ;;  %v2298_v29 = vmul.f32 %v4764_v60, %v2282_v58  ;;  %v2302_v60 = vmul.f32 %v4795_v39, %v2286_v43  ;;  %v2288_v22 = vmul.f32 %v2272_v56, %v2272_v56  ;;  %v5468_v11 = vld [vmem:[#allocation47_spill] sm:$0xff] }
 0x72e   : > { %v3020_v20 = vpop.f32.mrf.mxu0  ;;  %v2303_v33 = vmul.f32 %v5469_v48, %v2287_v44 }
 0x72f   : > { %v2346_v14 = vadd.f32 %v3019_v28, %v4315_v3  ;;  %v2273_v2 = vsub.f32 %v3019_v28, %v5466_v40 }
 0x730   : > { %v3021_v23 = vpop.f32.mrf.mxu0 }
 0x731   : > { %2379 = vst [vmem:[%s5144_s6 + $0x38] sm:$0xff] %v2346_v14  ;;  %v3022_v45 = vadd.f32 %v3021_v23, %v3020_v20  ;;  %v2289_v16 = vmul.f32 %v2273_v2, %v2273_v2  ;;  %v5471_v20 = vld [vmem:[#allocation69_spill] sm:$0xff]  ;;  %v5473_v23 = vld [vmem:[#allocation50_spill] sm:$0xff] }
 0x732   : > { %v3023_v13 = vpop.f32.mrf.mxu0  ;;  %v2304_v14 = vmul.f32 %v5471_v20, %v2288_v22 }
 0x733   : > { %v2347_v49 = vadd.f32 %v3022_v45, %v4330_v36  ;;  %v2314_v36 = vadd.f32 %v2299_v59, %v2298_v29  ;;  %v2274_v37 = vsub.f32 %v3022_v45, %v5467_v38  ;;  %v2305_v62 = vmul.f32 %v5474_v54, %v2289_v16  ;;  %v5476_v29 = vld [vmem:[#allocation55_spill] sm:$0xff] }
 0x734   : > { %v3024_v3 = vpop.f32.mrf.mxu0 }
 0x735   : > { %2380 = vst [vmem:[%s5144_s6 + $0x40] sm:$0xff] %v2347_v49  ;;  %v3025_v47 = vadd.f32 %v3024_v3, %v3023_v13  ;;  %v2315_v32 = vadd.f32 %v2314_v36, %v2300_v18  ;;  %v2290_v39 = vmul.f32 %v2274_v37, %v2274_v37  ;;  %v5475_v49 = vld [vmem:[#allocation52_spill] sm:$0xff] }
 0x736   : > { %v3026_v8 = vpop.f32.mrf.mxu0 }
 0x737   : > { %v2348_v30 = vadd.f32 %v3025_v47, %v5423_v26  ;;  %v2316_v26 = vadd.f32 %v2315_v32, %v2301_v31  ;;  %v2275_v28 = vsub.f32 %v3025_v47, %v5470_v63  ;;  %v2306_v50 = vmul.f32 %v4844_v10, %v2290_v39  ;;  %v5477_v10 = vld [vmem:[#allocation58_spill] sm:$0xff] }
 0x738   : > { %v3027_v15 = vpop.f32.mrf.mxu0 }
 0x739   : > { %2381 = vst [vmem:[%s5144_s6 + $0x48] sm:$0xff] %v2348_v30  ;;  %v3028_v24 = vadd.f32 %v3027_v15, %v3026_v8  ;;  %v2317_v25 = vadd.f32 %v2316_v26, %v2302_v60  ;;  %v2291_v13 = vmul.f32 %v2275_v28, %v2275_v28 }
 0x73a   : > { %v3029_v1 = vpop.f32.mrf.mxu0 }
 0x73b   : > { %v2349_v35 = vadd.f32 %v3028_v24, %v5468_v11  ;;  %v2276_v7 = vsub.f32 %v3028_v24, %v5472_v53  ;;  %v2318_v58 = vadd.f32 %v2317_v25, %v2303_v33  ;;  %v2307_v56 = vmul.f32 %v4851_v61, %v2291_v13 }
 0x73c   : > { %v3030_v27 = vpop.f32.mrf.mxu0 }
 0x73d   : > { %2382 = vst [vmem:[%s5144_s6 + $0x50] sm:$0xff] %v2349_v35  ;;  %v3031_v17 = vadd.f32 %v3030_v27, %v3029_v1  ;;  %v2319_v19 = vadd.f32 %v2318_v58, %v2304_v14  ;;  %v2292_v47 = vmul.f32 %v2276_v7, %v2276_v7  ;;  %v5478_v1 = vld [vmem:[#allocation61_spill] sm:$0xff]  ;;  %v5479_v27 = vld [vmem:[#allocation64_spill] sm:$0xff] }
 0x73e   : > { %v3032_v9 = vpop.f32.mrf.mxu1 }
 0x73f   : > { %v2350_v45 = vadd.f32 %v3031_v17, %v5473_v23  ;;  %v2277_v59 = vsub.f32 %v3031_v17, %v5475_v49  ;;  %v2320_v43 = vadd.f32 %v2319_v19, %v2305_v62  ;;  %v2308_v44 = vmul.f32 %v4866_v0, %v2292_v47 }
 0x740   : > { %v3033_v5 = vpop.f32.mrf.mxu1 }
 0x741   : > { %2383 = vst [vmem:[%s5144_s6 + $0x58] sm:$0xff] %v2350_v45  ;;  %v3034_v12 = vadd.f32 %v3033_v5, %v3032_v9  ;;  %v2293_v8 = vmul.f32 %v2277_v59, %v2277_v59  ;;  %v2321_v36 = vadd.f32 %v2320_v43, %v2306_v50 }
 0x742   : > { %v3035_v3 = vpop.f32.mrf.mxu1 }
 0x743   : > { %v2278_v42 = vsub.f32 %v3034_v12, %v5476_v29  ;;  %v2351_v18 = vadd.f32 %v3034_v12, %v5429_v57  ;;  %v2322_v57 = vadd.f32 %v2321_v36, %v2307_v56  ;;  %v2309_v32 = vmul.f32 %v4891_v46, %v2293_v8 }
 0x744   : > { %v3036_v4 = vpop.f32.mrf.mxu1 }
 0x745   : > { %2384 = vst [vmem:[%s5144_s6 + $0x60] sm:$0xff] %v2351_v18  ;;  %v3037_v30 = vadd.f32 %v3036_v4, %v3035_v3  ;;  %v2294_v40 = vmul.f32 %v2278_v42, %v2278_v42  ;;  %v2323_v38 = vadd.f32 %v2322_v57, %v2308_v44 }
 0x746   : > { %v3038_v31 = vpop.f32.mrf.mxu1 }
 0x747   : > { %v2279_v2 = vsub.f32 %v3037_v30, %v5477_v10  ;;  %v2352_v15 = vadd.f32 %v3037_v30, %v5431_v41  ;;  %v2310_v37 = vmul.f32 %v4899_v6, %v2294_v40  ;;  %v2324_v26 = vadd.f32 %v2323_v38, %v2309_v32 }
 0x748   : > { %v3039_v24 = vpop.f32.mrf.mxu1 }
 0x749   : > { %v2295_v60 = vmul.f32 %v2279_v2, %v2279_v2  ;;  %2385 = vst [vmem:[%s5144_s6 + $0x68] sm:$0xff] %v2352_v15  ;;  %v3040_v61 = vadd.f32 %v3039_v24, %v3038_v31  ;;  %v2325_v33 = vadd.f32 %v2324_v26, %v2310_v37 }
 0x74a   : > { %v3041_v22 = vpop.f32.mrf.mxu1 }
 0x74b   : > { %v2280_v0 = vsub.f32 %v3040_v61, %v5478_v1  ;;  %v2353_v11 = vadd.f32 %v3040_v61, %v5433_v52  ;;  %v2311_v41 = vmul.f32 %v4915_v51, %v2295_v60 }
 0x74c   : > { %v3042_v35 = vpop.f32.mrf.mxu1 }
 0x74d   : > { %v2296_v48 = vmul.f32 %v2280_v0, %v2280_v0  ;;  %2386 = vst [vmem:[%s5144_s6 + $0x70] sm:$0xff] %v2353_v11  ;;  %v3043_v46 = vadd.f32 %v3042_v35, %v3041_v22  ;;  %v2326_v52 = vadd.f32 %v2325_v33, %v2311_v41 }
 0x74f   : > { %v2312_v16 = vmul.f32 %v4922_v34, %v2296_v48  ;;  %v2281_v6 = vsub.f32 %v3043_v46, %v5479_v27  ;;  %v2354_v63 = vadd.f32 %v3043_v46, %v5435_v55 }
 0x751   : > { %v2297_v28 = vmul.f32 %v2281_v6, %v2281_v6  ;;  %2387 = vst [vmem:[%s5144_s6 + $0x78] sm:$0xff] %v2354_v63  ;;  %v2327_v17 = vadd.f32 %v2326_v52, %v2312_v16 }
 0x753   : > { %v2313_v51 = vmul.f32 %v4928_v21, %v2297_v28 }
 0x755   : > { %v2328_v25 = vadd.f32 %v2327_v17, %v2313_v51 }
 0x757   : > { %2329 = vadd.xlane.f32.xlu1 %v2328_v25 }
 0x758   : > { %3276 = shalt.err (!%p3273_p12)
}
 0x759   : > { %s3277_s10 = scalar_lea.hbm %s5215_s16, 2048  ;;  %s3281_s6 = scalar_lea.hbm %s5275_s3, 4096 }
 0x75a   : > { %p3278_p1 = scmp.ne.s32.totalorder %s5215_s16, %s3277_s10  ;;  %p3282_p6 = scmp.lt.s32.totalorder %s5215_s16, %s5275_s3 }
 0x75b   : > { %p3283_p8 = scmp.lt.s32.totalorder %s3281_s6, %s3277_s10 }
 0x75c   : > { %p3279_p2 = pnand %p3278_p1, %p5481_p9 }
 0x75d   : > { %p3284_p5 = por %p3283_p8, %p3282_p6 }
 0x75e   : > { %p3280_p4 = pneg %p3279_p2 }
 0x760   : > { %p3285_p11 = pnand %p3284_p5, %p3280_p4 }
 0x762   : > { %3288 = shalt.err (!%p3285_p11)
}
 0x763   : > { %s3356_s11 = smov 128   ;;  %s3357_s17 = smov 8  }
 0x764   : > { %3094 = dma.vmem_to_hbm [thread:$0]  (%p5481_p9), %s5218_s8, 2048, %s5215_s16, %s2423_s29, %s3356_s11, %s3356_s11, %s3357_s17  }
 0x765   : > { %s2411_s13 = sld [smem:[#allocation2]]  ;;  %s3077_s24 = spop %3076 }
 0x766   : > { %p5482_p13 = scmp.eq.s32.totalorder %s3410_s22, 1  ;;  %s3358_s23 = smov [#allocation11]  }
 0x768   : > { %p5483_p9 = pmov %p5482_p13 }
 0x76a   : > { %p5484_p0 = pmov %p5483_p9 }
 0x7e0   : > { %v2330_v55 = vpop.xlane.xlu1 %2329 }
 0x7e1   : > { %v2331_v34 = vrot.slane %v2330_v55, 4 }
 0x7e3   : > { %v2332_v21 = vadd.f32 %v2331_v34, %v2330_v55 }
 0x7e5   : > { %v2333_v20 = vrot.slane %v2332_v21, 2 }
 0x7e7   : > { %v2334_v14 = vadd.f32 %v2333_v20, %v2332_v21 }
 0x7e9   : > { %v2335_v39 = vrot.slane %v2334_v14, 1 }
 0x7eb   : > { %v2336_v9 = vadd.f32 %v2335_v39, %v2334_v14 }
 0x7ed   : > { %3078 = vpush %v2336_v9 }
 0x81e   : > { %s3079_s26 = spop %3078 }
 0x81f   : > { %s2338_s9 = sadd.f32 %s3079_s26, %s3077_s24 }
 0x821   : > { %s2412_s10 = sadd.f32 %s2411_s13, %s2338_s9 }
 0x823   : > { %2414 = sst [smem:[#allocation2]] %s2412_s10 }
 0x824   : > { %3093 = sst [smem:[#allocation11]] (%p5482_p13), %s2412_s10 }
 0x825   : > { %3096 = dma.smem_to_hbm (%p5483_p9), %s3358_s23, 16, %s5277_s5, [#allocation6]  }
 0x826   : > { %3324 = dma.done.wait (%p5484_p0), [#allocation6], 16   ;;  %p5485_p10 = pmov %p5484_p0 }
 0x828   : > { %3326 = vsyncadd (%p5485_p10), [#allocation6], 4294967280 }
 0x829   : > { %2465 = sfence }
 0x82a PF: > { %s2474_s8 = sand.u32 1, %s3333_s18   ;;  %p5486_p3 = scmp.ne.s32.totalorder %s5354_s25, 0 }
 0x82b   : > { %p5487_p7 = scmp.ge.s32.totalorder %s3345_s21, 2  ;;  %s2475_s29 = scalar_lea.sflag [#allocation5], %s2474_s8 }
 0x82d   : > { %p3112_p12 = pnand %p5487_p7, %p5486_p3 }
 0x82f   : > { %p3113_p1 = pneg %p3112_p12 }
 0x831   : > { %3328 = dma.done.wait (%p3113_p1), %s2475_s29, 2048  }
 0x832   : > { %3330 = vsyncadd (%p3113_p1), %s2475_s29, 4294965248  ;;  %p21_p2 = scmp.ge.s32.totalorder %s3464_s15, 4   ;;  %s5488_s18 = smov %s3337_s19 }
 0x833   : > { %s5489_s19 = smov %s3341_s20  ;;  %s5490_s20 = smov %s3480_s27 }
 0x834   : > { %s5491_s21 = smov %s3464_s15  ;;  %23 = sbr.rel (!%p21_p2) target bundleno = 7 (0x7), region = 119 }
 0x839   :  { %2488 = vsyncpa [#allocation4], 1 }
 0x83a   :  { %2490 = vsyncpa [#allocation4 + $0x1], 1 }
 0x83b   :  { %2491 = vsyncpa [#allocation8], 1 }
 0x83c   :  { %2492 = vsyncpa [#allocation5], 1 }
 0x83d   :  { %2494 = vsyncpa [#allocation5 + $0x1], 1 }
 0x83e   :  { %2495 = vsyncpa [#allocation6], 1 }
 0x83f   :  { %2497 = vsyncpa [#allocation6 + $0x1], 1 }

</bundles_post_ra>
